<compile_context>
chip_gen: v6e
topology: v6e:2x2x1
jax: 0.10.0
libtpu: 0.0.40
codegen_flags: <defaults>
</compile_context>

<pallas_src>
import math

import jax
import jax.numpy as jnp
from jax import lax
from jax.experimental import pallas as pl
from jax.experimental.pallas import tpu as pltpu

# ---------------- small synthetic config ----------------
B      = 2            # batch
L      = 8            # text sequence length
D_IN   = 32           # ELLA input_dim (stand-in for 2048 / T5 dim)
W      = 64           # ELLA width
HEADS  = 4
DH     = W // HEADS
N_LAT  = 16           # num_latents
LAYERS = 2            # perceiver blocks
TC     = 32           # sinusoidal time channels
TED    = 64           # time_embed_dim
C      = 4            # sample channels
HWS    = 16           # sample spatial size (H == W == 16)
TOK    = HWS * HWS
EPS    = 1e-5
M_KV   = N_LAT + L    # shared K/V token count per batch element (latents + text)

SCALE_ATTN = 1.0 / math.sqrt(DH)
SCALE_UNET = 1.0 / math.sqrt(W)

ADALN_PAD  = 128              # each of the 6 AdaLN chunks padded to a 128-lane boundary
ADALN_COLS = 6 * ADALN_PAD

F32  = jnp.float32
BF16 = jnp.bfloat16


# ---------------- packed-weight layouts (shared by init_params and the kernel) ----------------
def _make_w64_layout():
    """All weight matrices with 64 output columns, stacked on rows (bf16 slab)."""
    names = [("tw1", TC), ("tw2", TED), ("ta_w", TED), ("pin_w", D_IN)]
    for lp in range(LAYERS):
        names += [(f"wq{lp}", W), (f"wk{lp}", W), (f"pj{lp}", 4 * W)]
    names += [("u_wk", W), ("u_wqin", W), ("u_wvo", W)]   # UNet stand-in (col-padded to 64)
    off, table = 0, {}
    for n, r in names:
        table[n] = (off, r)
        off += r
    return table, off


_W64, _W64_ROWS = _make_w64_layout()                      # all offsets are multiples of 16

# bias table rows (width ADALN_COLS, f32; each bias stored from lane 0)
R_TB1, R_TB2, R_TA, R_PIN = 0, 1, 2, 3
R_LAYER0, R_PER_LAYER = 4, 6
R_LN, R_BQ, R_BK, R_BO, R_FC, R_PJ = 0, 1, 2, 3, 4, 5
BIAS_ROWS = R_LAYER0 + LAYERS * R_PER_LAYER


# ---------------- small in-kernel helpers ----------------
def _silu(x):
    return x / (1.0 + jnp.exp(-x))


def _softmax_last(s):
    m = jnp.max(s, axis=-1, keepdims=True)
    e = jnp.exp(s - m)
    return e * pl.reciprocal(jnp.sum(e, axis=-1, keepdims=True), approx=True)


def _softmax_axis0(s):
    m = jnp.max(s, axis=0, keepdims=True)
    e = jnp.exp(s - m)
    return e * pl.reciprocal(jnp.sum(e, axis=0, keepdims=True), approx=True)


def _ln_mod(x, shift, scale):
    """LayerNorm (no affine) followed by AdaLN modulation with precomputed shift / scale."""
    mu = jnp.mean(x, axis=-1, keepdims=True)
    var = jnp.mean(jnp.square(x - mu), axis=-1, keepdims=True)
    xn = (x - mu) * lax.rsqrt(var + EPS)
    return xn * (1.0 + scale) + shift


def _mm(a, b):
    """MXU matmul: bf16 operands, f32 accumulation."""
    return jnp.dot(a.astype(BF16), b.astype(BF16), preferred_element_type=F32)


def _w64(ref, name):
    off, rows = _W64[name]
    return ref[off:off + rows, :]


def _brow(ref, row, width):
    return ref[row:row + 1, 0:width]


# ---------------- the single fused kernel (grid-less; batch stacked on sublanes) ----------------
def _fused_kernel(sin_ref, ehs_ref, smp_ref, lat0_ref,
                  w64_ref, w256_ref, adaln_ref, bias_ref, ucb_ref, o_ref):
    # ---------------- ELLA: TimestepEmbedding MLP (scalar timestep -> shared across batch) -----
    th = _mm(sin_ref[...], _w64(w64_ref, "tw1")) + _brow(bias_ref, R_TB1, TED)      # (1, TED)
    th = _silu(th)
    t_emb = _mm(th, _w64(w64_ref, "tw2")) + _brow(bias_ref, R_TB2, TED)             # (1, TED)
    silu_t = _silu(t_emb)                                                           # reused everywhere

    # ---------------- ELLA: latent init + proj_in (batch stacked on the sublane axis) ----------
    lat_i = lat0_ref[...] + _mm(silu_t, _w64(w64_ref, "ta_w")) + _brow(bias_ref, R_TA, W)
    lat = jnp.concatenate([lat_i] * B, axis=0)                                      # (B*N_LAT, W)
    x = _mm(ehs_ref[...], _w64(w64_ref, "pin_w")) + _brow(bias_ref, R_PIN, W)       # (B*L, W)

    # ---------------- ELLA: AdaLN Perceiver Resampler blocks -----------------------------------
    for lp in range(LAYERS):                                                        # static unroll
        rb = R_LAYER0 + lp * R_PER_LAYER

        # fused AdaLN projection; each of the 6 chunks starts on a 128-lane (vreg) boundary
        emb = (_mm(silu_t, adaln_ref[lp * TED:(lp + 1) * TED, :])
               + _brow(bias_ref, rb + R_LN, ADALN_COLS))                            # (1, 768)
        sh1 = emb[:, 0 * ADALN_PAD:0 * ADALN_PAD + W]
        sc1 = emb[:, 1 * ADALN_PAD:1 * ADALN_PAD + W]
        sh2 = emb[:, 2 * ADALN_PAD:2 * ADALN_PAD + W]
        sc2 = emb[:, 3 * ADALN_PAD:3 * ADALN_PAD + W]
        shf = emb[:, 4 * ADALN_PAD:4 * ADALN_PAD + W]
        scf = emb[:, 5 * ADALN_PAD:5 * ADALN_PAD + W]

        nl = _ln_mod(lat, sh1, sc1)                                                 # (B*N_LAT, W)
        nx = _ln_mod(x, sh2, sc2)                                                   # (B*L, W)

        # per-batch shared K/V token set [latents_b ; text_b], built in vregs (tile-aligned
        # pieces), one bf16 cast
        pieces = []
        for b in range(B):
            pieces += [nl[b * N_LAT:(b + 1) * N_LAT], nx[b * L:(b + 1) * L]]
        kv16 = jnp.concatenate(pieces, axis=0).astype(BF16)                         # (B*M_KV, W)

        # Q only on the latent rows; K and the out-proj-folded V' on the kv set (wide matmuls)
        q16 = (_mm(nl, _w64(w64_ref, f"wq{lp}"))
               + _brow(bias_ref, rb + R_BQ, W)).astype(BF16)                        # (B*N_LAT, W)
        k16 = (jnp.dot(kv16, _w64(w64_ref, f"wk{lp}"), preferred_element_type=F32)
               + _brow(bias_ref, rb + R_BK, W)).astype(BF16)                        # (B*M_KV, W)
        vp16 = jnp.dot(kv16, w256_ref[lp * 2 * W:lp * 2 * W + W, :],
                       preferred_element_type=F32).astype(BF16)                     # (B*M_KV, 4W)

        attn_rows = []
        for b in range(B):                                                          # static unroll
            qb = q16[b * N_LAT:(b + 1) * N_LAT, :]
            kb = k16[b * M_KV:(b + 1) * M_KV, :]
            vb = vp16[b * M_KV:(b + 1) * M_KV, :]
            acc = jnp.zeros((N_LAT, W), F32)
            for h in range(HEADS):                                                  # static unroll
                r = h * DH
                # NT score matmul via dot_general: no .T relayouts anywhere on the chain
                s = lax.dot_general(qb[:, r:r + DH], kb[:, r:r + DH],
                                    (((1,), (1,)), ((), ())),
                                    preferred_element_type=F32) * SCALE_ATTN        # (N_LAT, M_KV)
                p = _softmax_last(s)
                # out-projection folded into V' host-side -> one attend matmul per head
                acc = acc + jnp.dot(p.astype(BF16), vb[:, h * W:(h + 1) * W],
                                    preferred_element_type=F32)                     # (N_LAT, W)
            attn_rows.append(acc)
        lat = lat + jnp.concatenate(attn_rows, axis=0) + _brow(bias_ref, rb + R_BO, W)

        # SquaredReLU MLP
        nf = _ln_mod(lat, shf, scf)
        h1 = (_mm(nf, w256_ref[lp * 2 * W + W:(lp + 1) * 2 * W, :])
              + _brow(bias_ref, rb + R_FC, 4 * W))                                  # (B*N_LAT, 4W)
        h1 = jnp.maximum(h1, 0.0)
        h1 = h1 * h1
        lat = lat + _mm(h1, _w64(w64_ref, f"pj{lp}")) + _brow(bias_ref, rb + R_PJ, W)

    # ---------------- UNet stand-in: residual cross-attn on the time-aware states --------------
    # TODO(synk): the real diffusers UNet2DConditionModel is an external injected module (huge
    # conv/attn stack); this minimal residual cross-attention block preserves the proxy's data
    # flow and output shape.  Layout: channels on sublanes, TOK=256 tokens on the lane axis.
    lat16 = lat.astype(BF16)                                                        # time-aware states
    k_u16 = jnp.dot(lat16, _w64(w64_ref, "u_wk"),
                    preferred_element_type=F32).astype(BF16)                        # (B*N_LAT, W)
    o_qin, _ = _W64["u_wqin"]
    o_vo, _ = _W64["u_wvo"]
    wqin_t = w64_ref[o_qin:o_qin + W, 0:C]                                          # (W, C) = (Win@Wq)^T
    wvo = w64_ref[o_vo:o_vo + W, 0:C]                                               # (W, C) =  Wv@Wout
    vo16 = jnp.dot(lat16, wvo, preferred_element_type=F32).astype(BF16)             # (B*N_LAT, C)
    ucb = ucb_ref[...]
    bq_col = ucb[:, 0:1]                                                            # (W, 1) = (bin@Wq)^T
    bout_col = ucb[0:C, 1:2]                                                        # (C, 1)

    outs = []
    for b in range(B):                                                              # static unroll
        tok = smp_ref[b * C:(b + 1) * C, :]                                         # (C, TOK)
        q_t = jnp.dot(wqin_t, tok.astype(BF16),
                      preferred_element_type=F32) + bq_col                          # (W, TOK)
        s_t = jnp.dot(k_u16[b * N_LAT:(b + 1) * N_LAT, :], q_t.astype(BF16),
                      preferred_element_type=F32) * SCALE_UNET                      # (N_LAT, TOK)
        p_t = _softmax_axis0(s_t)                                                   # softmax over keys
        # TN dot_general: contract the key axis of folded V' with axis 0 of P (no transposes)
        out_t = lax.dot_general(vo16[b * N_LAT:(b + 1) * N_LAT, :], p_t.astype(BF16),
                                (((0,), (0,)), ((), ())),
                                preferred_element_type=F32) + bout_col              # (C, TOK)
        outs.append(tok + out_t)
    o_ref[...] = jnp.concatenate(outs, axis=0)                                      # one full (B*C, TOK) store


# ---------------- wrapper ----------------
def sinusoidal_embedding(t, dim):
    half = dim // 2
    freqs = jnp.exp(-jnp.log(10000.0) * jnp.arange(half, dtype=F32) / half)
    args = t[:, None] * freqs[None, :]
    return jnp.concatenate([jnp.cos(args), jnp.sin(args)], axis=-1)


def _fused_pallas_call():
    vspec = pl.BlockSpec(memory_space=pltpu.MemorySpace.VMEM)
    return pl.pallas_call(
        _fused_kernel,
        out_shape=jax.ShapeDtypeStruct((B * C, TOK), F32),
        in_specs=[vspec] * 9,
        out_specs=vspec,
    )


@jax.jit
def ella_proxy_unet_forward(sample, timestep, encoder_hidden_states, params):
    # TODO(synk): timestep is a scalar shared by the batch (as at the original call site); a
    # per-example timestep would need per-row broadcast of the AdaLN shift/scale in the kernel.
    t = jnp.reshape(jnp.asarray(timestep, F32), (1,))
    sin_emb = sinusoidal_embedding(t, TC)                 # (1, TC) tiny host-side glue
    smp = sample.reshape(B * C, TOK)                      # free reshape (NCHW contiguity)
    ehs = encoder_hidden_states.reshape(B * L, D_IN)      # free reshape
    out_ct = _fused_pallas_call()(
        sin_emb, ehs, smp, params["latents"],
        params["w64"], params["w256"], params["adaln"], params["bias"], params["u_cbias"])
    return out_ct.reshape(B, C, HWS, HWS)


# ---------------- deterministic parameter init + host-side folds / packing ----------------
def init_params(key):
    keys = iter(jax.random.split(key, 64))

    def nrm(shape, scale=0.02):
        return scale * jax.random.normal(next(keys), shape, F32)

    def z(*s):
        return jnp.zeros(s, F32)

    # ---- raw module weights (f32; what the PyTorch module would hold) ----
    tw1, tb1 = nrm((TC, TED)), z(TED)
    tw2, tb2 = nrm((TED, TED)), z(TED)
    latents = (W ** -0.5) * jax.random.normal(next(keys), (N_LAT, W), F32)
    ta_w, ta_b = nrm((TED, W)), z(W)
    pin_w, pin_b = nrm((D_IN, W)), z(W)

    layers = []
    for _ in range(LAYERS):
        layers.append(dict(
            ln_w=nrm((TED, 6 * W)), ln_b=z(6 * W),
            wq=nrm((W, W)), bq=z(W), wk=nrm((W, W)), bk=z(W),
            wv=nrm((W, W)), bv=z(W), wo=nrm((W, W)), bo=z(W),
            fc_w=nrm((W, 4 * W)), fc_b=z(4 * W),
            pj_w=nrm((4 * W, W)), pj_b=z(W)))

    u_win, u_bin = nrm((C, W)), z(W)
    u_wq = nrm((W, W))
    u_wk = nrm((W, W))
    u_wv = nrm((W, W))
    u_wout, u_bout = nrm((W, C)), z(C)

    # ---- exact host-side folds ----
    # perceiver: V'_h = Wv[:,h] @ Wo[h,:]  (out-proj folded into V); bo' = bo + bv @ Wo
    # UNet     : Wqin^T = (Win @ Wq)^T, bqin = bin @ Wq;  Wvo = Wv @ Wout
    for lyr in layers:
        lyr["wvp"] = jnp.concatenate(
            [lyr["wv"][:, h * DH:(h + 1) * DH] @ lyr["wo"][h * DH:(h + 1) * DH, :]
             for h in range(HEADS)], axis=1)                       # (W, HEADS*W)
        lyr["bo_p"] = lyr["bo"] + lyr["bv"] @ lyr["wo"]            # (W,)
    u_wqin_t = (u_win @ u_wq).T                                    # (W, C)
    u_bqin = u_bin @ u_wq                                          # (W,)
    u_wvo = u_wv @ u_wout                                          # (W, C)

    def pad_cols(a, cols):
        return jnp.zeros((a.shape[0], cols), F32).at[:, :a.shape[1]].set(a)

    # ---- wpack64: every 64-column weight, stacked on rows (offsets = multiples of 16) ----
    blocks = {"tw1": tw1, "tw2": tw2, "ta_w": ta_w, "pin_w": pin_w}
    for lp, lyr in enumerate(layers):
        blocks[f"wq{lp}"] = lyr["wq"]
        blocks[f"wk{lp}"] = lyr["wk"]
        blocks[f"pj{lp}"] = lyr["pj_w"]
    blocks["u_wk"] = u_wk
    blocks["u_wqin"] = pad_cols(u_wqin_t, W)
    blocks["u_wvo"] = pad_cols(u_wvo, W)
    w64 = jnp.zeros((_W64_ROWS, W), F32)
    for name, (off, rows) in _W64.items():
        w64 = w64.at[off:off + rows, :].set(blocks[name])

    # ---- wpack256: per layer [V'-fold ; MLP fc], 256 columns ----
    w256 = jnp.concatenate(
        [jnp.concatenate([lyr["wvp"], lyr["fc_w"]], axis=0) for lyr in layers], axis=0)

    # ---- AdaLN slab: each 64-wide chunk padded to a 128-lane boundary ----
    def pad_adaln_w(ln_w):
        out = jnp.zeros((TED, ADALN_COLS), F32)
        for k2 in range(6):
            out = out.at[:, k2 * ADALN_PAD:k2 * ADALN_PAD + W].set(ln_w[:, k2 * W:(k2 + 1) * W])
        return out

    def pad_adaln_b(ln_b):
        out = jnp.zeros((ADALN_COLS,), F32)
        for k2 in range(6):
            out = out.at[k2 * ADALN_PAD:k2 * ADALN_PAD + W].set(ln_b[k2 * W:(k2 + 1) * W])
        return out

    adaln = jnp.concatenate([pad_adaln_w(lyr["ln_w"]) for lyr in layers], axis=0)

    # ---- bias table: one row per bias vector (f32) ----
    bias = jnp.zeros((BIAS_ROWS, ADALN_COLS), F32)

    def put(b, row, vec):
        return b.at[row, :vec.shape[0]].set(vec)

    bias = put(bias, R_TB1, tb1)
    bias = put(bias, R_TB2, tb2)
    bias = put(bias, R_TA, ta_b)
    bias = put(bias, R_PIN, pin_b)
    for lp, lyr in enumerate(layers):
        rb = R_LAYER0 + lp * R_PER_LAYER
        bias = put(bias, rb + R_LN, pad_adaln_b(lyr["ln_b"]))
        bias = put(bias, rb + R_BQ, lyr["bq"])
        bias = put(bias, rb + R_BK, lyr["bk"])
        bias = put(bias, rb + R_BO, lyr["bo_p"])
        bias = put(bias, rb + R_FC, lyr["fc_b"])
        bias = put(bias, rb + R_PJ, lyr["pj_b"])

    # ---- UNet column biases (bqin over W rows, bout over C rows) ----
    u_cbias = jnp.zeros((W, 2), F32)
    u_cbias = u_cbias.at[:, 0].set(u_bqin)
    u_cbias = u_cbias.at[:C, 1].set(u_bout)

    return {
        "latents": latents,                  # f32
        "w64": w64.astype(BF16),             # (1152, 64)
        "w256": w256.astype(BF16),           # (256, 256)
        "adaln": adaln.astype(BF16),         # (128, 768)
        "bias": bias,                        # (16, 768) f32
        "u_cbias": u_cbias,                  # (64, 2) f32
    }


if __name__ == "__main__":
    key = jax.random.PRNGKey(0)
    k_s, k_e, k_p = jax.random.split(key, 3)
    sample = jax.random.normal(k_s, (B, C, HWS, HWS), F32)            # NCHW, like PyTorch
    encoder_hidden_states = jax.random.normal(k_e, (B, L, D_IN), F32)
    timestep = jnp.float32(500.0)
    params = init_params(k_p)

    out = ella_proxy_unet_forward(sample, timestep, encoder_hidden_states, params)
    out = jax.block_until_ready(out)
    assert out.shape == (B, C, HWS, HWS) and out.dtype == jnp.float32
    assert bool(jnp.all(jnp.isfinite(out)))
    print("KERNEL_OK")
</pallas_src>

<mosaic_0001>
module attributes {stable_mosaic.version = 11 : i64} {
  func.func @_fused_kernel(%arg0: memref<1x32xf32, #tpu.memory_space<vmem>>, %arg1: memref<16x32xf32, #tpu.memory_space<vmem>>, %arg2: memref<8x256xf32, #tpu.memory_space<vmem>>, %arg3: memref<16x64xf32, #tpu.memory_space<vmem>>, %arg4: memref<1152x64xbf16, #tpu.memory_space<vmem>>, %arg5: memref<256x256xbf16, #tpu.memory_space<vmem>>, %arg6: memref<128x768xbf16, #tpu.memory_space<vmem>>, %arg7: memref<16x768xf32, #tpu.memory_space<vmem>>, %arg8: memref<64x2xf32, #tpu.memory_space<vmem>>, %arg9: memref<8x256xf32, #tpu.memory_space<vmem>>) attributes {dimension_semantics = [], scalar_prefetch = 0 : i64, scratch_operands = 0 : i64, tpu.core_type = #tpu.core_type<tc>} {
    %c0 = arith.constant 0 : index
    %c0_0 = arith.constant 0 : index
    %0 = vector.load %arg0[%c0, %c0_0] : memref<1x32xf32, #tpu.memory_space<vmem>>, vector<1x32xf32>
    %c0_1 = arith.constant 0 : index
    %c0_2 = arith.constant 0 : index
    %1 = vector.load %arg4[%c0_1, %c0_2] : memref<1152x64xbf16, #tpu.memory_space<vmem>>, vector<32x64xbf16>
    %2 = arith.truncf %0 : vector<1x32xf32> to vector<1x32xbf16>
    %cst = arith.constant dense<0.000000e+00> : vector<1x64xf32>
    %3 = tpu.matmul %2, %1, %cst {dimension_numbers = #tpu.dot_dimension_numbers<[1], [0], [0], [1], [0, 0, 1, 1], [], []>} : vector<1x32xbf16>, vector<32x64xbf16>, vector<1x64xf32> -> vector<1x64xf32>
    %c0_3 = arith.constant 0 : index
    %c0_4 = arith.constant 0 : index
    %4 = vector.load %arg7[%c0_3, %c0_4] : memref<16x768xf32, #tpu.memory_space<vmem>>, vector<1x64xf32>
    %5 = arith.addf %3, %4 : vector<1x64xf32>
    %cst_5 = arith.constant 0.000000e+00 : f32
    %6 = vector.broadcast %cst_5 : f32 to vector<1x64xf32>
    %7 = arith.subf %6, %5 : vector<1x64xf32>
    %8 = math.exp %7 : vector<1x64xf32>
    %cst_6 = arith.constant 1.000000e+00 : f32
    %9 = vector.broadcast %cst_6 : f32 to vector<1x64xf32>
    %10 = arith.addf %9, %8 : vector<1x64xf32>
    %11 = arith.divf %5, %10 : vector<1x64xf32>
    %c32 = arith.constant 32 : index
    %c0_7 = arith.constant 0 : index
    %12 = vector.load %arg4[%c32, %c0_7] : memref<1152x64xbf16, #tpu.memory_space<vmem>>, vector<64x64xbf16>
    %13 = arith.truncf %11 : vector<1x64xf32> to vector<1x64xbf16>
    %cst_8 = arith.constant dense<0.000000e+00> : vector<1x64xf32>
    %14 = tpu.matmul %13, %12, %cst_8 {dimension_numbers = #tpu.dot_dimension_numbers<[1], [0], [0], [1], [0, 0, 1, 1], [], []>} : vector<1x64xbf16>, vector<64x64xbf16>, vector<1x64xf32> -> vector<1x64xf32>
    %c1 = arith.constant 1 : index
    %c0_9 = arith.constant 0 : index
    %15 = vector.load %arg7[%c1, %c0_9] : memref<16x768xf32, #tpu.memory_space<vmem>>, vector<1x64xf32>
    %16 = arith.addf %14, %15 : vector<1x64xf32>
    %cst_10 = arith.constant 0.000000e+00 : f32
    %17 = vector.broadcast %cst_10 : f32 to vector<1x64xf32>
    %18 = arith.subf %17, %16 : vector<1x64xf32>
    %19 = math.exp %18 : vector<1x64xf32>
    %cst_11 = arith.constant 1.000000e+00 : f32
    %20 = vector.broadcast %cst_11 : f32 to vector<1x64xf32>
    %21 = arith.addf %20, %19 : vector<1x64xf32>
    %22 = arith.divf %16, %21 : vector<1x64xf32>
    %c0_12 = arith.constant 0 : index
    %c0_13 = arith.constant 0 : index
    %23 = vector.load %arg3[%c0_12, %c0_13] : memref<16x64xf32, #tpu.memory_space<vmem>>, vector<16x64xf32>
    %c96 = arith.constant 96 : index
    %c0_14 = arith.constant 0 : index
    %24 = vector.load %arg4[%c96, %c0_14] : memref<1152x64xbf16, #tpu.memory_space<vmem>>, vector<64x64xbf16>
    %25 = arith.truncf %22 : vector<1x64xf32> to vector<1x64xbf16>
    %cst_15 = arith.constant dense<0.000000e+00> : vector<1x64xf32>
    %26 = tpu.matmul %25, %24, %cst_15 {dimension_numbers = #tpu.dot_dimension_numbers<[1], [0], [0], [1], [0, 0, 1, 1], [], []>} : vector<1x64xbf16>, vector<64x64xbf16>, vector<1x64xf32> -> vector<1x64xf32>
    %27 = vector.broadcast %26 : vector<1x64xf32> to vector<16x64xf32>
    %28 = arith.addf %23, %27 : vector<16x64xf32>
    %c2 = arith.constant 2 : index
    %c0_16 = arith.constant 0 : index
    %29 = vector.load %arg7[%c2, %c0_16] : memref<16x768xf32, #tpu.memory_space<vmem>>, vector<1x64xf32>
    %30 = vector.broadcast %29 : vector<1x64xf32> to vector<16x64xf32>
    %31 = arith.addf %28, %30 : vector<16x64xf32>
    %32 = tpu.concatenate %31, %31 in 0 : vector<16x64xf32>, vector<16x64xf32> -> vector<32x64xf32>
    %c0_17 = arith.constant 0 : index
    %c0_18 = arith.constant 0 : index
    %33 = vector.load %arg1[%c0_17, %c0_18] : memref<16x32xf32, #tpu.memory_space<vmem>>, vector<16x32xf32>
    %c160 = arith.constant 160 : index
    %c0_19 = arith.constant 0 : index
    %34 = vector.load %arg4[%c160, %c0_19] : memref<1152x64xbf16, #tpu.memory_space<vmem>>, vector<32x64xbf16>
    %35 = arith.truncf %33 : vector<16x32xf32> to vector<16x32xbf16>
    %cst_20 = arith.constant dense<0.000000e+00> : vector<16x64xf32>
    %36 = tpu.matmul %35, %34, %cst_20 {dimension_numbers = #tpu.dot_dimension_numbers<[1], [0], [0], [1], [0, 0, 1, 1], [], []>} : vector<16x32xbf16>, vector<32x64xbf16>, vector<16x64xf32> -> vector<16x64xf32>
    %c3 = arith.constant 3 : index
    %c0_21 = arith.constant 0 : index
    %37 = vector.load %arg7[%c3, %c0_21] : memref<16x768xf32, #tpu.memory_space<vmem>>, vector<1x64xf32>
    %38 = vector.broadcast %37 : vector<1x64xf32> to vector<16x64xf32>
    %39 = arith.addf %36, %38 : vector<16x64xf32>
    %c0_22 = arith.constant 0 : index
    %c0_23 = arith.constant 0 : index
    %40 = vector.load %arg6[%c0_22, %c0_23] : memref<128x768xbf16, #tpu.memory_space<vmem>>, vector<64x768xbf16>
    %41 = arith.truncf %22 : vector<1x64xf32> to vector<1x64xbf16>
    %cst_24 = arith.constant dense<0.000000e+00> : vector<1x768xf32>
    %42 = tpu.matmul %41, %40, %cst_24 {dimension_numbers = #tpu.dot_dimension_numbers<[1], [0], [0], [1], [0, 0, 1, 1], [], []>} : vector<1x64xbf16>, vector<64x768xbf16>, vector<1x768xf32> -> vector<1x768xf32>
    %c4 = arith.constant 4 : index
    %c0_25 = arith.constant 0 : index
    %43 = vector.load %arg7[%c4, %c0_25] : memref<16x768xf32, #tpu.memory_space<vmem>>, vector<1x768xf32>
    %44 = arith.addf %42, %43 : vector<1x768xf32>
    %45 = vector.extract_strided_slice %44 {offsets = [0, 0], sizes = [1, 64], strides = [1, 1]} : vector<1x768xf32> to vector<1x64xf32>
    %46 = vector.extract_strided_slice %44 {offsets = [0, 128], sizes = [1, 64], strides = [1, 1]} : vector<1x768xf32> to vector<1x64xf32>
    %47 = vector.extract_strided_slice %44 {offsets = [0, 256], sizes = [1, 64], strides = [1, 1]} : vector<1x768xf32> to vector<1x64xf32>
    %48 = vector.extract_strided_slice %44 {offsets = [0, 384], sizes = [1, 64], strides = [1, 1]} : vector<1x768xf32> to vector<1x64xf32>
    %49 = vector.extract_strided_slice %44 {offsets = [0, 512], sizes = [1, 64], strides = [1, 1]} : vector<1x768xf32> to vector<1x64xf32>
    %50 = vector.extract_strided_slice %44 {offsets = [0, 640], sizes = [1, 64], strides = [1, 1]} : vector<1x768xf32> to vector<1x64xf32>
    %cst_26 = arith.constant dense<0.000000e+00> : vector<32xf32>
    %51 = vector.multi_reduction <add>, %32, %cst_26 [1] : vector<32x64xf32> to vector<32xf32>
    %52 = vector.shape_cast %51 : vector<32xf32> to vector<32x1xf32>
    %cst_27 = arith.constant 6.400000e+01 : f32
    %53 = vector.broadcast %cst_27 : f32 to vector<32x1xf32>
    %54 = arith.divf %52, %53 : vector<32x1xf32>
    %55 = vector.broadcast %54 : vector<32x1xf32> to vector<32x64xf32>
    %56 = arith.subf %32, %55 : vector<32x64xf32>
    %57 = arith.mulf %56, %56 : vector<32x64xf32>
    %cst_28 = arith.constant dense<0.000000e+00> : vector<32xf32>
    %58 = vector.multi_reduction <add>, %57, %cst_28 [1] : vector<32x64xf32> to vector<32xf32>
    %59 = vector.shape_cast %58 : vector<32xf32> to vector<32x1xf32>
    %cst_29 = arith.constant 6.400000e+01 : f32
    %60 = vector.broadcast %cst_29 : f32 to vector<32x1xf32>
    %61 = arith.divf %59, %60 : vector<32x1xf32>
    %62 = vector.broadcast %54 : vector<32x1xf32> to vector<32x64xf32>
    %63 = arith.subf %32, %62 : vector<32x64xf32>
    %cst_30 = arith.constant 9.99999974E-6 : f32
    %64 = vector.broadcast %cst_30 : f32 to vector<32x1xf32>
    %65 = arith.addf %61, %64 : vector<32x1xf32>
    %66 = math.rsqrt %65 : vector<32x1xf32>
    %67 = vector.broadcast %66 : vector<32x1xf32> to vector<32x64xf32>
    %68 = arith.mulf %63, %67 : vector<32x64xf32>
    %cst_31 = arith.constant 1.000000e+00 : f32
    %69 = vector.broadcast %cst_31 : f32 to vector<1x64xf32>
    %70 = arith.addf %69, %46 : vector<1x64xf32>
    %71 = vector.broadcast %70 : vector<1x64xf32> to vector<32x64xf32>
    %72 = arith.mulf %68, %71 : vector<32x64xf32>
    %73 = vector.broadcast %45 : vector<1x64xf32> to vector<32x64xf32>
    %74 = arith.addf %72, %73 : vector<32x64xf32>
    %cst_32 = arith.constant dense<0.000000e+00> : vector<16xf32>
    %75 = vector.multi_reduction <add>, %39, %cst_32 [1] : vector<16x64xf32> to vector<16xf32>
    %76 = vector.shape_cast %75 : vector<16xf32> to vector<16x1xf32>
    %cst_33 = arith.constant 6.400000e+01 : f32
    %77 = vector.broadcast %cst_33 : f32 to vector<16x1xf32>
    %78 = arith.divf %76, %77 : vector<16x1xf32>
    %79 = vector.broadcast %78 : vector<16x1xf32> to vector<16x64xf32>
    %80 = arith.subf %39, %79 : vector<16x64xf32>
    %81 = arith.mulf %80, %80 : vector<16x64xf32>
    %cst_34 = arith.constant dense<0.000000e+00> : vector<16xf32>
    %82 = vector.multi_reduction <add>, %81, %cst_34 [1] : vector<16x64xf32> to vector<16xf32>
    %83 = vector.shape_cast %82 : vector<16xf32> to vector<16x1xf32>
    %cst_35 = arith.constant 6.400000e+01 : f32
    %84 = vector.broadcast %cst_35 : f32 to vector<16x1xf32>
    %85 = arith.divf %83, %84 : vector<16x1xf32>
    %86 = vector.broadcast %78 : vector<16x1xf32> to vector<16x64xf32>
    %87 = arith.subf %39, %86 : vector<16x64xf32>
    %cst_36 = arith.constant 9.99999974E-6 : f32
    %88 = vector.broadcast %cst_36 : f32 to vector<16x1xf32>
    %89 = arith.addf %85, %88 : vector<16x1xf32>
    %90 = math.rsqrt %89 : vector<16x1xf32>
    %91 = vector.broadcast %90 : vector<16x1xf32> to vector<16x64xf32>
    %92 = arith.mulf %87, %91 : vector<16x64xf32>
    %cst_37 = arith.constant 1.000000e+00 : f32
    %93 = vector.broadcast %cst_37 : f32 to vector<1x64xf32>
    %94 = arith.addf %93, %48 : vector<1x64xf32>
    %95 = vector.broadcast %94 : vector<1x64xf32> to vector<16x64xf32>
    %96 = arith.mulf %92, %95 : vector<16x64xf32>
    %97 = vector.broadcast %47 : vector<1x64xf32> to vector<16x64xf32>
    %98 = arith.addf %96, %97 : vector<16x64xf32>
    %99 = vector.extract_strided_slice %74 {offsets = [0, 0], sizes = [16, 64], strides = [1, 1]} : vector<32x64xf32> to vector<16x64xf32>
    %100 = vector.extract_strided_slice %98 {offsets = [0, 0], sizes = [8, 64], strides = [1, 1]} : vector<16x64xf32> to vector<8x64xf32>
    %101 = vector.extract_strided_slice %74 {offsets = [16, 0], sizes = [16, 64], strides = [1, 1]} : vector<32x64xf32> to vector<16x64xf32>
    %102 = vector.extract_strided_slice %98 {offsets = [8, 0], sizes = [8, 64], strides = [1, 1]} : vector<16x64xf32> to vector<8x64xf32>
    %103 = tpu.concatenate %99, %100, %101, %102 in 0 : vector<16x64xf32>, vector<8x64xf32>, vector<16x64xf32>, vector<8x64xf32> -> vector<48x64xf32>
    %104 = arith.truncf %103 : vector<48x64xf32> to vector<48x64xbf16>
    %c192 = arith.constant 192 : index
    %c0_38 = arith.constant 0 : index
    %105 = vector.load %arg4[%c192, %c0_38] : memref<1152x64xbf16, #tpu.memory_space<vmem>>, vector<64x64xbf16>
    %106 = arith.truncf %74 : vector<32x64xf32> to vector<32x64xbf16>
    %cst_39 = arith.constant dense<0.000000e+00> : vector<32x64xf32>
    %107 = tpu.matmul %106, %105, %cst_39 {dimension_numbers = #tpu.dot_dimension_numbers<[1], [0], [0], [1], [0, 0, 1, 1], [], []>} : vector<32x64xbf16>, vector<64x64xbf16>, vector<32x64xf32> -> vector<32x64xf32>
    %c5 = arith.constant 5 : index
    %c0_40 = arith.constant 0 : index
    %108 = vector.load %arg7[%c5, %c0_40] : memref<16x768xf32, #tpu.memory_space<vmem>>, vector<1x64xf32>
    %109 = vector.broadcast %108 : vector<1x64xf32> to vector<32x64xf32>
    %110 = arith.addf %107, %109 : vector<32x64xf32>
    %111 = arith.truncf %110 : vector<32x64xf32> to vector<32x64xbf16>
    %c256 = arith.constant 256 : index
    %c0_41 = arith.constant 0 : index
    %112 = vector.load %arg4[%c256, %c0_41] : memref<1152x64xbf16, #tpu.memory_space<vmem>>, vector<64x64xbf16>
    %cst_42 = arith.constant dense<0.000000e+00> : vector<48x64xf32>
    %113 = tpu.matmul %104, %112, %cst_42 {dimension_numbers = #tpu.dot_dimension_numbers<[1], [0], [0], [1], [0, 0, 1, 1], [], []>} : vector<48x64xbf16>, vector<64x64xbf16>, vector<48x64xf32> -> vector<48x64xf32>
    %c6 = arith.constant 6 : index
    %c0_43 = arith.constant 0 : index
    %114 = vector.load %arg7[%c6, %c0_43] : memref<16x768xf32, #tpu.memory_space<vmem>>, vector<1x64xf32>
    %115 = vector.broadcast %114 : vector<1x64xf32> to vector<48x64xf32>
    %116 = arith.addf %113, %115 : vector<48x64xf32>
    %117 = arith.truncf %116 : vector<48x64xf32> to vector<48x64xbf16>
    %c0_44 = arith.constant 0 : index
    %c0_45 = arith.constant 0 : index
    %118 = vector.load %arg5[%c0_44, %c0_45] : memref<256x256xbf16, #tpu.memory_space<vmem>>, vector<64x256xbf16>
    %cst_46 = arith.constant dense<0.000000e+00> : vector<48x256xf32>
    %119 = tpu.matmul %104, %118, %cst_46 {dimension_numbers = #tpu.dot_dimension_numbers<[1], [0], [0], [1], [0, 0, 1, 1], [], []>} : vector<48x64xbf16>, vector<64x256xbf16>, vector<48x256xf32> -> vector<48x256xf32>
    %120 = arith.truncf %119 : vector<48x256xf32> to vector<48x256xbf16>
    %121 = vector.extract_strided_slice %111 {offsets = [0, 0], sizes = [16, 64], strides = [1, 1]} : vector<32x64xbf16> to vector<16x64xbf16>
    %122 = vector.extract_strided_slice %117 {offsets = [0, 0], sizes = [24, 64], strides = [1, 1]} : vector<48x64xbf16> to vector<24x64xbf16>
    %123 = vector.extract_strided_slice %120 {offsets = [0, 0], sizes = [24, 256], strides = [1, 1]} : vector<48x256xbf16> to vector<24x256xbf16>
    %cst_47 = arith.constant 0.000000e+00 : f32
    %124 = vector.broadcast %cst_47 : f32 to vector<16x64xf32>
    %125 = vector.extract_strided_slice %121 {offsets = [0, 0], sizes = [16, 16], strides = [1, 1]} : vector<16x64xbf16> to vector<16x16xbf16>
    %126 = vector.extract_strided_slice %122 {offsets = [0, 0], sizes = [24, 16], strides = [1, 1]} : vector<24x64xbf16> to vector<24x16xbf16>
    %cst_48 = arith.constant dense<0.000000e+00> : vector<16x24xf32>
    %127 = tpu.matmul %125, %126, %cst_48 {dimension_numbers = #tpu.dot_dimension_numbers<[1], [1], [0], [0], [0, 0, 1, 0], [], []>} : vector<16x16xbf16>, vector<24x16xbf16>, vector<16x24xf32> -> vector<16x24xf32>
    %cst_49 = arith.constant 2.500000e-01 : f32
    %128 = vector.broadcast %cst_49 : f32 to vector<16x24xf32>
    %129 = arith.mulf %127, %128 : vector<16x24xf32>
    %cst_50 = arith.constant dense<0xFF800000> : vector<16xf32>
    %130 = vector.multi_reduction <maximumf>, %129, %cst_50 [1] : vector<16x24xf32> to vector<16xf32>
    %131 = vector.shape_cast %130 : vector<16xf32> to vector<16x1xf32>
    %132 = vector.broadcast %131 : vector<16x1xf32> to vector<16x24xf32>
    %133 = arith.subf %129, %132 : vector<16x24xf32>
    %134 = math.exp %133 : vector<16x24xf32>
    %cst_51 = arith.constant dense<0.000000e+00> : vector<16xf32>
    %135 = vector.multi_reduction <add>, %134, %cst_51 [1] : vector<16x24xf32> to vector<16xf32>
    %136 = vector.shape_cast %135 : vector<16xf32> to vector<16x1xf32>
    %137 = tpu.reciprocal %136 {approx = true} : vector<16x1xf32> -> vector<16x1xf32>
    %138 = vector.broadcast %137 : vector<16x1xf32> to vector<16x24xf32>
    %139 = arith.mulf %134, %138 : vector<16x24xf32>
    %140 = arith.truncf %139 : vector<16x24xf32> to vector<16x24xbf16>
    %141 = vector.extract_strided_slice %123 {offsets = [0, 0], sizes = [24, 64], strides = [1, 1]} : vector<24x256xbf16> to vector<24x64xbf16>
    %cst_52 = arith.constant dense<0.000000e+00> : vector<16x64xf32>
    %142 = tpu.matmul %140, %141, %cst_52 {dimension_numbers = #tpu.dot_dimension_numbers<[1], [0], [0], [1], [0, 0, 1, 1], [], []>} : vector<16x24xbf16>, vector<24x64xbf16>, vector<16x64xf32> -> vector<16x64xf32>
    %143 = arith.addf %124, %142 : vector<16x64xf32>
    %144 = vector.extract_strided_slice %121 {offsets = [0, 16], sizes = [16, 16], strides = [1, 1]} : vector<16x64xbf16> to vector<16x16xbf16>
    %145 = vector.extract_strided_slice %122 {offsets = [0, 16], sizes = [24, 16], strides = [1, 1]} : vector<24x64xbf16> to vector<24x16xbf16>
    %cst_53 = arith.constant dense<0.000000e+00> : vector<16x24xf32>
    %146 = tpu.matmul %144, %145, %cst_53 {dimension_numbers = #tpu.dot_dimension_numbers<[1], [1], [0], [0], [0, 0, 1, 0], [], []>} : vector<16x16xbf16>, vector<24x16xbf16>, vector<16x24xf32> -> vector<16x24xf32>
    %cst_54 = arith.constant 2.500000e-01 : f32
    %147 = vector.broadcast %cst_54 : f32 to vector<16x24xf32>
    %148 = arith.mulf %146, %147 : vector<16x24xf32>
    %cst_55 = arith.constant dense<0xFF800000> : vector<16xf32>
    %149 = vector.multi_reduction <maximumf>, %148, %cst_55 [1] : vector<16x24xf32> to vector<16xf32>
    %150 = vector.shape_cast %149 : vector<16xf32> to vector<16x1xf32>
    %151 = vector.broadcast %150 : vector<16x1xf32> to vector<16x24xf32>
    %152 = arith.subf %148, %151 : vector<16x24xf32>
    %153 = math.exp %152 : vector<16x24xf32>
    %cst_56 = arith.constant dense<0.000000e+00> : vector<16xf32>
    %154 = vector.multi_reduction <add>, %153, %cst_56 [1] : vector<16x24xf32> to vector<16xf32>
    %155 = vector.shape_cast %154 : vector<16xf32> to vector<16x1xf32>
    %156 = tpu.reciprocal %155 {approx = true} : vector<16x1xf32> -> vector<16x1xf32>
    %157 = vector.broadcast %156 : vector<16x1xf32> to vector<16x24xf32>
    %158 = arith.mulf %153, %157 : vector<16x24xf32>
    %159 = arith.truncf %158 : vector<16x24xf32> to vector<16x24xbf16>
    %160 = vector.extract_strided_slice %123 {offsets = [0, 64], sizes = [24, 64], strides = [1, 1]} : vector<24x256xbf16> to vector<24x64xbf16>
    %cst_57 = arith.constant dense<0.000000e+00> : vector<16x64xf32>
    %161 = tpu.matmul %159, %160, %cst_57 {dimension_numbers = #tpu.dot_dimension_numbers<[1], [0], [0], [1], [0, 0, 1, 1], [], []>} : vector<16x24xbf16>, vector<24x64xbf16>, vector<16x64xf32> -> vector<16x64xf32>
    %162 = arith.addf %143, %161 : vector<16x64xf32>
    %163 = vector.extract_strided_slice %121 {offsets = [0, 32], sizes = [16, 16], strides = [1, 1]} : vector<16x64xbf16> to vector<16x16xbf16>
    %164 = vector.extract_strided_slice %122 {offsets = [0, 32], sizes = [24, 16], strides = [1, 1]} : vector<24x64xbf16> to vector<24x16xbf16>
    %cst_58 = arith.constant dense<0.000000e+00> : vector<16x24xf32>
    %165 = tpu.matmul %163, %164, %cst_58 {dimension_numbers = #tpu.dot_dimension_numbers<[1], [1], [0], [0], [0, 0, 1, 0], [], []>} : vector<16x16xbf16>, vector<24x16xbf16>, vector<16x24xf32> -> vector<16x24xf32>
    %cst_59 = arith.constant 2.500000e-01 : f32
    %166 = vector.broadcast %cst_59 : f32 to vector<16x24xf32>
    %167 = arith.mulf %165, %166 : vector<16x24xf32>
    %cst_60 = arith.constant dense<0xFF800000> : vector<16xf32>
    %168 = vector.multi_reduction <maximumf>, %167, %cst_60 [1] : vector<16x24xf32> to vector<16xf32>
    %169 = vector.shape_cast %168 : vector<16xf32> to vector<16x1xf32>
    %170 = vector.broadcast %169 : vector<16x1xf32> to vector<16x24xf32>
    %171 = arith.subf %167, %170 : vector<16x24xf32>
    %172 = math.exp %171 : vector<16x24xf32>
    %cst_61 = arith.constant dense<0.000000e+00> : vector<16xf32>
    %173 = vector.multi_reduction <add>, %172, %cst_61 [1] : vector<16x24xf32> to vector<16xf32>
    %174 = vector.shape_cast %173 : vector<16xf32> to vector<16x1xf32>
    %175 = tpu.reciprocal %174 {approx = true} : vector<16x1xf32> -> vector<16x1xf32>
    %176 = vector.broadcast %175 : vector<16x1xf32> to vector<16x24xf32>
    %177 = arith.mulf %172, %176 : vector<16x24xf32>
    %178 = arith.truncf %177 : vector<16x24xf32> to vector<16x24xbf16>
    %179 = vector.extract_strided_slice %123 {offsets = [0, 128], sizes = [24, 64], strides = [1, 1]} : vector<24x256xbf16> to vector<24x64xbf16>
    %cst_62 = arith.constant dense<0.000000e+00> : vector<16x64xf32>
    %180 = tpu.matmul %178, %179, %cst_62 {dimension_numbers = #tpu.dot_dimension_numbers<[1], [0], [0], [1], [0, 0, 1, 1], [], []>} : vector<16x24xbf16>, vector<24x64xbf16>, vector<16x64xf32> -> vector<16x64xf32>
    %181 = arith.addf %162, %180 : vector<16x64xf32>
    %182 = vector.extract_strided_slice %121 {offsets = [0, 48], sizes = [16, 16], strides = [1, 1]} : vector<16x64xbf16> to vector<16x16xbf16>
    %183 = vector.extract_strided_slice %122 {offsets = [0, 48], sizes = [24, 16], strides = [1, 1]} : vector<24x64xbf16> to vector<24x16xbf16>
    %cst_63 = arith.constant dense<0.000000e+00> : vector<16x24xf32>
    %184 = tpu.matmul %182, %183, %cst_63 {dimension_numbers = #tpu.dot_dimension_numbers<[1], [1], [0], [0], [0, 0, 1, 0], [], []>} : vector<16x16xbf16>, vector<24x16xbf16>, vector<16x24xf32> -> vector<16x24xf32>
    %cst_64 = arith.constant 2.500000e-01 : f32
    %185 = vector.broadcast %cst_64 : f32 to vector<16x24xf32>
    %186 = arith.mulf %184, %185 : vector<16x24xf32>
    %cst_65 = arith.constant dense<0xFF800000> : vector<16xf32>
    %187 = vector.multi_reduction <maximumf>, %186, %cst_65 [1] : vector<16x24xf32> to vector<16xf32>
    %188 = vector.shape_cast %187 : vector<16xf32> to vector<16x1xf32>
    %189 = vector.broadcast %188 : vector<16x1xf32> to vector<16x24xf32>
    %190 = arith.subf %186, %189 : vector<16x24xf32>
    %191 = math.exp %190 : vector<16x24xf32>
    %cst_66 = arith.constant dense<0.000000e+00> : vector<16xf32>
    %192 = vector.multi_reduction <add>, %191, %cst_66 [1] : vector<16x24xf32> to vector<16xf32>
    %193 = vector.shape_cast %192 : vector<16xf32> to vector<16x1xf32>
    %194 = tpu.reciprocal %193 {approx = true} : vector<16x1xf32> -> vector<16x1xf32>
    %195 = vector.broadcast %194 : vector<16x1xf32> to vector<16x24xf32>
    %196 = arith.mulf %191, %195 : vector<16x24xf32>
    %197 = arith.truncf %196 : vector<16x24xf32> to vector<16x24xbf16>
    %198 = vector.extract_strided_slice %123 {offsets = [0, 192], sizes = [24, 64], strides = [1, 1]} : vector<24x256xbf16> to vector<24x64xbf16>
    %cst_67 = arith.constant dense<0.000000e+00> : vector<16x64xf32>
    %199 = tpu.matmul %197, %198, %cst_67 {dimension_numbers = #tpu.dot_dimension_numbers<[1], [0], [0], [1], [0, 0, 1, 1], [], []>} : vector<16x24xbf16>, vector<24x64xbf16>, vector<16x64xf32> -> vector<16x64xf32>
    %200 = arith.addf %181, %199 : vector<16x64xf32>
    %201 = vector.extract_strided_slice %111 {offsets = [16, 0], sizes = [16, 64], strides = [1, 1]} : vector<32x64xbf16> to vector<16x64xbf16>
    %202 = vector.extract_strided_slice %117 {offsets = [24, 0], sizes = [24, 64], strides = [1, 1]} : vector<48x64xbf16> to vector<24x64xbf16>
    %203 = vector.extract_strided_slice %120 {offsets = [24, 0], sizes = [24, 256], strides = [1, 1]} : vector<48x256xbf16> to vector<24x256xbf16>
    %cst_68 = arith.constant 0.000000e+00 : f32
    %204 = vector.broadcast %cst_68 : f32 to vector<16x64xf32>
    %205 = vector.extract_strided_slice %201 {offsets = [0, 0], sizes = [16, 16], strides = [1, 1]} : vector<16x64xbf16> to vector<16x16xbf16>
    %206 = vector.extract_strided_slice %202 {offsets = [0, 0], sizes = [24, 16], strides = [1, 1]} : vector<24x64xbf16> to vector<24x16xbf16>
    %cst_69 = arith.constant dense<0.000000e+00> : vector<16x24xf32>
    %207 = tpu.matmul %205, %206, %cst_69 {dimension_numbers = #tpu.dot_dimension_numbers<[1], [1], [0], [0], [0, 0, 1, 0], [], []>} : vector<16x16xbf16>, vector<24x16xbf16>, vector<16x24xf32> -> vector<16x24xf32>
    %cst_70 = arith.constant 2.500000e-01 : f32
    %208 = vector.broadcast %cst_70 : f32 to vector<16x24xf32>
    %209 = arith.mulf %207, %208 : vector<16x24xf32>
    %cst_71 = arith.constant dense<0xFF800000> : vector<16xf32>
    %210 = vector.multi_reduction <maximumf>, %209, %cst_71 [1] : vector<16x24xf32> to vector<16xf32>
    %211 = vector.shape_cast %210 : vector<16xf32> to vector<16x1xf32>
    %212 = vector.broadcast %211 : vector<16x1xf32> to vector<16x24xf32>
    %213 = arith.subf %209, %212 : vector<16x24xf32>
    %214 = math.exp %213 : vector<16x24xf32>
    %cst_72 = arith.constant dense<0.000000e+00> : vector<16xf32>
    %215 = vector.multi_reduction <add>, %214, %cst_72 [1] : vector<16x24xf32> to vector<16xf32>
    %216 = vector.shape_cast %215 : vector<16xf32> to vector<16x1xf32>
    %217 = tpu.reciprocal %216 {approx = true} : vector<16x1xf32> -> vector<16x1xf32>
    %218 = vector.broadcast %217 : vector<16x1xf32> to vector<16x24xf32>
    %219 = arith.mulf %214, %218 : vector<16x24xf32>
    %220 = arith.truncf %219 : vector<16x24xf32> to vector<16x24xbf16>
    %221 = vector.extract_strided_slice %203 {offsets = [0, 0], sizes = [24, 64], strides = [1, 1]} : vector<24x256xbf16> to vector<24x64xbf16>
    %cst_73 = arith.constant dense<0.000000e+00> : vector<16x64xf32>
    %222 = tpu.matmul %220, %221, %cst_73 {dimension_numbers = #tpu.dot_dimension_numbers<[1], [0], [0], [1], [0, 0, 1, 1], [], []>} : vector<16x24xbf16>, vector<24x64xbf16>, vector<16x64xf32> -> vector<16x64xf32>
    %223 = arith.addf %204, %222 : vector<16x64xf32>
    %224 = vector.extract_strided_slice %201 {offsets = [0, 16], sizes = [16, 16], strides = [1, 1]} : vector<16x64xbf16> to vector<16x16xbf16>
    %225 = vector.extract_strided_slice %202 {offsets = [0, 16], sizes = [24, 16], strides = [1, 1]} : vector<24x64xbf16> to vector<24x16xbf16>
    %cst_74 = arith.constant dense<0.000000e+00> : vector<16x24xf32>
    %226 = tpu.matmul %224, %225, %cst_74 {dimension_numbers = #tpu.dot_dimension_numbers<[1], [1], [0], [0], [0, 0, 1, 0], [], []>} : vector<16x16xbf16>, vector<24x16xbf16>, vector<16x24xf32> -> vector<16x24xf32>
    %cst_75 = arith.constant 2.500000e-01 : f32
    %227 = vector.broadcast %cst_75 : f32 to vector<16x24xf32>
    %228 = arith.mulf %226, %227 : vector<16x24xf32>
    %cst_76 = arith.constant dense<0xFF800000> : vector<16xf32>
    %229 = vector.multi_reduction <maximumf>, %228, %cst_76 [1] : vector<16x24xf32> to vector<16xf32>
    %230 = vector.shape_cast %229 : vector<16xf32> to vector<16x1xf32>
    %231 = vector.broadcast %230 : vector<16x1xf32> to vector<16x24xf32>
    %232 = arith.subf %228, %231 : vector<16x24xf32>
    %233 = math.exp %232 : vector<16x24xf32>
    %cst_77 = arith.constant dense<0.000000e+00> : vector<16xf32>
    %234 = vector.multi_reduction <add>, %233, %cst_77 [1] : vector<16x24xf32> to vector<16xf32>
    %235 = vector.shape_cast %234 : vector<16xf32> to vector<16x1xf32>
    %236 = tpu.reciprocal %235 {approx = true} : vector<16x1xf32> -> vector<16x1xf32>
    %237 = vector.broadcast %236 : vector<16x1xf32> to vector<16x24xf32>
    %238 = arith.mulf %233, %237 : vector<16x24xf32>
    %239 = arith.truncf %238 : vector<16x24xf32> to vector<16x24xbf16>
    %240 = vector.extract_strided_slice %203 {offsets = [0, 64], sizes = [24, 64], strides = [1, 1]} : vector<24x256xbf16> to vector<24x64xbf16>
    %cst_78 = arith.constant dense<0.000000e+00> : vector<16x64xf32>
    %241 = tpu.matmul %239, %240, %cst_78 {dimension_numbers = #tpu.dot_dimension_numbers<[1], [0], [0], [1], [0, 0, 1, 1], [], []>} : vector<16x24xbf16>, vector<24x64xbf16>, vector<16x64xf32> -> vector<16x64xf32>
    %242 = arith.addf %223, %241 : vector<16x64xf32>
    %243 = vector.extract_strided_slice %201 {offsets = [0, 32], sizes = [16, 16], strides = [1, 1]} : vector<16x64xbf16> to vector<16x16xbf16>
    %244 = vector.extract_strided_slice %202 {offsets = [0, 32], sizes = [24, 16], strides = [1, 1]} : vector<24x64xbf16> to vector<24x16xbf16>
    %cst_79 = arith.constant dense<0.000000e+00> : vector<16x24xf32>
    %245 = tpu.matmul %243, %244, %cst_79 {dimension_numbers = #tpu.dot_dimension_numbers<[1], [1], [0], [0], [0, 0, 1, 0], [], []>} : vector<16x16xbf16>, vector<24x16xbf16>, vector<16x24xf32> -> vector<16x24xf32>
    %cst_80 = arith.constant 2.500000e-01 : f32
    %246 = vector.broadcast %cst_80 : f32 to vector<16x24xf32>
    %247 = arith.mulf %245, %246 : vector<16x24xf32>
    %cst_81 = arith.constant dense<0xFF800000> : vector<16xf32>
    %248 = vector.multi_reduction <maximumf>, %247, %cst_81 [1] : vector<16x24xf32> to vector<16xf32>
    %249 = vector.shape_cast %248 : vector<16xf32> to vector<16x1xf32>
    %250 = vector.broadcast %249 : vector<16x1xf32> to vector<16x24xf32>
    %251 = arith.subf %247, %250 : vector<16x24xf32>
    %252 = math.exp %251 : vector<16x24xf32>
    %cst_82 = arith.constant dense<0.000000e+00> : vector<16xf32>
    %253 = vector.multi_reduction <add>, %252, %cst_82 [1] : vector<16x24xf32> to vector<16xf32>
    %254 = vector.shape_cast %253 : vector<16xf32> to vector<16x1xf32>
    %255 = tpu.reciprocal %254 {approx = true} : vector<16x1xf32> -> vector<16x1xf32>
    %256 = vector.broadcast %255 : vector<16x1xf32> to vector<16x24xf32>
    %257 = arith.mulf %252, %256 : vector<16x24xf32>
    %258 = arith.truncf %257 : vector<16x24xf32> to vector<16x24xbf16>
    %259 = vector.extract_strided_slice %203 {offsets = [0, 128], sizes = [24, 64], strides = [1, 1]} : vector<24x256xbf16> to vector<24x64xbf16>
    %cst_83 = arith.constant dense<0.000000e+00> : vector<16x64xf32>
    %260 = tpu.matmul %258, %259, %cst_83 {dimension_numbers = #tpu.dot_dimension_numbers<[1], [0], [0], [1], [0, 0, 1, 1], [], []>} : vector<16x24xbf16>, vector<24x64xbf16>, vector<16x64xf32> -> vector<16x64xf32>
    %261 = arith.addf %242, %260 : vector<16x64xf32>
    %262 = vector.extract_strided_slice %201 {offsets = [0, 48], sizes = [16, 16], strides = [1, 1]} : vector<16x64xbf16> to vector<16x16xbf16>
    %263 = vector.extract_strided_slice %202 {offsets = [0, 48], sizes = [24, 16], strides = [1, 1]} : vector<24x64xbf16> to vector<24x16xbf16>
    %cst_84 = arith.constant dense<0.000000e+00> : vector<16x24xf32>
    %264 = tpu.matmul %262, %263, %cst_84 {dimension_numbers = #tpu.dot_dimension_numbers<[1], [1], [0], [0], [0, 0, 1, 0], [], []>} : vector<16x16xbf16>, vector<24x16xbf16>, vector<16x24xf32> -> vector<16x24xf32>
    %cst_85 = arith.constant 2.500000e-01 : f32
    %265 = vector.broadcast %cst_85 : f32 to vector<16x24xf32>
    %266 = arith.mulf %264, %265 : vector<16x24xf32>
    %cst_86 = arith.constant dense<0xFF800000> : vector<16xf32>
    %267 = vector.multi_reduction <maximumf>, %266, %cst_86 [1] : vector<16x24xf32> to vector<16xf32>
    %268 = vector.shape_cast %267 : vector<16xf32> to vector<16x1xf32>
    %269 = vector.broadcast %268 : vector<16x1xf32> to vector<16x24xf32>
    %270 = arith.subf %266, %269 : vector<16x24xf32>
    %271 = math.exp %270 : vector<16x24xf32>
    %cst_87 = arith.constant dense<0.000000e+00> : vector<16xf32>
    %272 = vector.multi_reduction <add>, %271, %cst_87 [1] : vector<16x24xf32> to vector<16xf32>
    %273 = vector.shape_cast %272 : vector<16xf32> to vector<16x1xf32>
    %274 = tpu.reciprocal %273 {approx = true} : vector<16x1xf32> -> vector<16x1xf32>
    %275 = vector.broadcast %274 : vector<16x1xf32> to vector<16x24xf32>
    %276 = arith.mulf %271, %275 : vector<16x24xf32>
    %277 = arith.truncf %276 : vector<16x24xf32> to vector<16x24xbf16>
    %278 = vector.extract_strided_slice %203 {offsets = [0, 192], sizes = [24, 64], strides = [1, 1]} : vector<24x256xbf16> to vector<24x64xbf16>
    %cst_88 = arith.constant dense<0.000000e+00> : vector<16x64xf32>
    %279 = tpu.matmul %277, %278, %cst_88 {dimension_numbers = #tpu.dot_dimension_numbers<[1], [0], [0], [1], [0, 0, 1, 1], [], []>} : vector<16x24xbf16>, vector<24x64xbf16>, vector<16x64xf32> -> vector<16x64xf32>
    %280 = arith.addf %261, %279 : vector<16x64xf32>
    %281 = tpu.concatenate %200, %280 in 0 : vector<16x64xf32>, vector<16x64xf32> -> vector<32x64xf32>
    %282 = arith.addf %32, %281 : vector<32x64xf32>
    %c7 = arith.constant 7 : index
    %c0_89 = arith.constant 0 : index
    %283 = vector.load %arg7[%c7, %c0_89] : memref<16x768xf32, #tpu.memory_space<vmem>>, vector<1x64xf32>
    %284 = vector.broadcast %283 : vector<1x64xf32> to vector<32x64xf32>
    %285 = arith.addf %282, %284 : vector<32x64xf32>
    %cst_90 = arith.constant dense<0.000000e+00> : vector<32xf32>
    %286 = vector.multi_reduction <add>, %285, %cst_90 [1] : vector<32x64xf32> to vector<32xf32>
    %287 = vector.shape_cast %286 : vector<32xf32> to vector<32x1xf32>
    %cst_91 = arith.constant 6.400000e+01 : f32
    %288 = vector.broadcast %cst_91 : f32 to vector<32x1xf32>
    %289 = arith.divf %287, %288 : vector<32x1xf32>
    %290 = vector.broadcast %289 : vector<32x1xf32> to vector<32x64xf32>
    %291 = arith.subf %285, %290 : vector<32x64xf32>
    %292 = arith.mulf %291, %291 : vector<32x64xf32>
    %cst_92 = arith.constant dense<0.000000e+00> : vector<32xf32>
    %293 = vector.multi_reduction <add>, %292, %cst_92 [1] : vector<32x64xf32> to vector<32xf32>
    %294 = vector.shape_cast %293 : vector<32xf32> to vector<32x1xf32>
    %cst_93 = arith.constant 6.400000e+01 : f32
    %295 = vector.broadcast %cst_93 : f32 to vector<32x1xf32>
    %296 = arith.divf %294, %295 : vector<32x1xf32>
    %297 = vector.broadcast %289 : vector<32x1xf32> to vector<32x64xf32>
    %298 = arith.subf %285, %297 : vector<32x64xf32>
    %cst_94 = arith.constant 9.99999974E-6 : f32
    %299 = vector.broadcast %cst_94 : f32 to vector<32x1xf32>
    %300 = arith.addf %296, %299 : vector<32x1xf32>
    %301 = math.rsqrt %300 : vector<32x1xf32>
    %302 = vector.broadcast %301 : vector<32x1xf32> to vector<32x64xf32>
    %303 = arith.mulf %298, %302 : vector<32x64xf32>
    %cst_95 = arith.constant 1.000000e+00 : f32
    %304 = vector.broadcast %cst_95 : f32 to vector<1x64xf32>
    %305 = arith.addf %304, %50 : vector<1x64xf32>
    %306 = vector.broadcast %305 : vector<1x64xf32> to vector<32x64xf32>
    %307 = arith.mulf %303, %306 : vector<32x64xf32>
    %308 = vector.broadcast %49 : vector<1x64xf32> to vector<32x64xf32>
    %309 = arith.addf %307, %308 : vector<32x64xf32>
    %c64 = arith.constant 64 : index
    %c0_96 = arith.constant 0 : index
    %310 = vector.load %arg5[%c64, %c0_96] : memref<256x256xbf16, #tpu.memory_space<vmem>>, vector<64x256xbf16>
    %311 = arith.truncf %309 : vector<32x64xf32> to vector<32x64xbf16>
    %cst_97 = arith.constant dense<0.000000e+00> : vector<32x256xf32>
    %312 = tpu.matmul %311, %310, %cst_97 {dimension_numbers = #tpu.dot_dimension_numbers<[1], [0], [0], [1], [0, 0, 1, 1], [], []>} : vector<32x64xbf16>, vector<64x256xbf16>, vector<32x256xf32> -> vector<32x256xf32>
    %c8 = arith.constant 8 : index
    %c0_98 = arith.constant 0 : index
    %313 = vector.load %arg7[%c8, %c0_98] : memref<16x768xf32, #tpu.memory_space<vmem>>, vector<1x256xf32>
    %314 = vector.broadcast %313 : vector<1x256xf32> to vector<32x256xf32>
    %315 = arith.addf %312, %314 : vector<32x256xf32>
    %cst_99 = arith.constant 0.000000e+00 : f32
    %316 = vector.broadcast %cst_99 : f32 to vector<32x256xf32>
    %317 = arith.maximumf %315, %316 : vector<32x256xf32>
    %318 = arith.mulf %317, %317 : vector<32x256xf32>
    %c320 = arith.constant 320 : index
    %c0_100 = arith.constant 0 : index
    %319 = vector.load %arg4[%c320, %c0_100] : memref<1152x64xbf16, #tpu.memory_space<vmem>>, vector<256x64xbf16>
    %320 = arith.truncf %318 : vector<32x256xf32> to vector<32x256xbf16>
    %cst_101 = arith.constant dense<0.000000e+00> : vector<32x64xf32>
    %321 = tpu.matmul %320, %319, %cst_101 {dimension_numbers = #tpu.dot_dimension_numbers<[1], [0], [0], [1], [0, 0, 1, 1], [], []>} : vector<32x256xbf16>, vector<256x64xbf16>, vector<32x64xf32> -> vector<32x64xf32>
    %322 = arith.addf %285, %321 : vector<32x64xf32>
    %c9 = arith.constant 9 : index
    %c0_102 = arith.constant 0 : index
    %323 = vector.load %arg7[%c9, %c0_102] : memref<16x768xf32, #tpu.memory_space<vmem>>, vector<1x64xf32>
    %324 = vector.broadcast %323 : vector<1x64xf32> to vector<32x64xf32>
    %325 = arith.addf %322, %324 : vector<32x64xf32>
    %c64_103 = arith.constant 64 : index
    %c0_104 = arith.constant 0 : index
    %326 = vector.load %arg6[%c64_103, %c0_104] : memref<128x768xbf16, #tpu.memory_space<vmem>>, vector<64x768xbf16>
    %327 = arith.truncf %22 : vector<1x64xf32> to vector<1x64xbf16>
    %cst_105 = arith.constant dense<0.000000e+00> : vector<1x768xf32>
    %328 = tpu.matmul %327, %326, %cst_105 {dimension_numbers = #tpu.dot_dimension_numbers<[1], [0], [0], [1], [0, 0, 1, 1], [], []>} : vector<1x64xbf16>, vector<64x768xbf16>, vector<1x768xf32> -> vector<1x768xf32>
    %c10 = arith.constant 10 : index
    %c0_106 = arith.constant 0 : index
    %329 = vector.load %arg7[%c10, %c0_106] : memref<16x768xf32, #tpu.memory_space<vmem>>, vector<1x768xf32>
    %330 = arith.addf %328, %329 : vector<1x768xf32>
    %331 = vector.extract_strided_slice %330 {offsets = [0, 0], sizes = [1, 64], strides = [1, 1]} : vector<1x768xf32> to vector<1x64xf32>
    %332 = vector.extract_strided_slice %330 {offsets = [0, 128], sizes = [1, 64], strides = [1, 1]} : vector<1x768xf32> to vector<1x64xf32>
    %333 = vector.extract_strided_slice %330 {offsets = [0, 256], sizes = [1, 64], strides = [1, 1]} : vector<1x768xf32> to vector<1x64xf32>
    %334 = vector.extract_strided_slice %330 {offsets = [0, 384], sizes = [1, 64], strides = [1, 1]} : vector<1x768xf32> to vector<1x64xf32>
    %335 = vector.extract_strided_slice %330 {offsets = [0, 512], sizes = [1, 64], strides = [1, 1]} : vector<1x768xf32> to vector<1x64xf32>
    %336 = vector.extract_strided_slice %330 {offsets = [0, 640], sizes = [1, 64], strides = [1, 1]} : vector<1x768xf32> to vector<1x64xf32>
    %cst_107 = arith.constant dense<0.000000e+00> : vector<32xf32>
    %337 = vector.multi_reduction <add>, %325, %cst_107 [1] : vector<32x64xf32> to vector<32xf32>
    %338 = vector.shape_cast %337 : vector<32xf32> to vector<32x1xf32>
    %cst_108 = arith.constant 6.400000e+01 : f32
    %339 = vector.broadcast %cst_108 : f32 to vector<32x1xf32>
    %340 = arith.divf %338, %339 : vector<32x1xf32>
    %341 = vector.broadcast %340 : vector<32x1xf32> to vector<32x64xf32>
    %342 = arith.subf %325, %341 : vector<32x64xf32>
    %343 = arith.mulf %342, %342 : vector<32x64xf32>
    %cst_109 = arith.constant dense<0.000000e+00> : vector<32xf32>
    %344 = vector.multi_reduction <add>, %343, %cst_109 [1] : vector<32x64xf32> to vector<32xf32>
    %345 = vector.shape_cast %344 : vector<32xf32> to vector<32x1xf32>
    %cst_110 = arith.constant 6.400000e+01 : f32
    %346 = vector.broadcast %cst_110 : f32 to vector<32x1xf32>
    %347 = arith.divf %345, %346 : vector<32x1xf32>
    %348 = vector.broadcast %340 : vector<32x1xf32> to vector<32x64xf32>
    %349 = arith.subf %325, %348 : vector<32x64xf32>
    %cst_111 = arith.constant 9.99999974E-6 : f32
    %350 = vector.broadcast %cst_111 : f32 to vector<32x1xf32>
    %351 = arith.addf %347, %350 : vector<32x1xf32>
    %352 = math.rsqrt %351 : vector<32x1xf32>
    %353 = vector.broadcast %352 : vector<32x1xf32> to vector<32x64xf32>
    %354 = arith.mulf %349, %353 : vector<32x64xf32>
    %cst_112 = arith.constant 1.000000e+00 : f32
    %355 = vector.broadcast %cst_112 : f32 to vector<1x64xf32>
    %356 = arith.addf %355, %332 : vector<1x64xf32>
    %357 = vector.broadcast %356 : vector<1x64xf32> to vector<32x64xf32>
    %358 = arith.mulf %354, %357 : vector<32x64xf32>
    %359 = vector.broadcast %331 : vector<1x64xf32> to vector<32x64xf32>
    %360 = arith.addf %358, %359 : vector<32x64xf32>
    %cst_113 = arith.constant dense<0.000000e+00> : vector<16xf32>
    %361 = vector.multi_reduction <add>, %39, %cst_113 [1] : vector<16x64xf32> to vector<16xf32>
    %362 = vector.shape_cast %361 : vector<16xf32> to vector<16x1xf32>
    %cst_114 = arith.constant 6.400000e+01 : f32
    %363 = vector.broadcast %cst_114 : f32 to vector<16x1xf32>
    %364 = arith.divf %362, %363 : vector<16x1xf32>
    %365 = vector.broadcast %364 : vector<16x1xf32> to vector<16x64xf32>
    %366 = arith.subf %39, %365 : vector<16x64xf32>
    %367 = arith.mulf %366, %366 : vector<16x64xf32>
    %cst_115 = arith.constant dense<0.000000e+00> : vector<16xf32>
    %368 = vector.multi_reduction <add>, %367, %cst_115 [1] : vector<16x64xf32> to vector<16xf32>
    %369 = vector.shape_cast %368 : vector<16xf32> to vector<16x1xf32>
    %cst_116 = arith.constant 6.400000e+01 : f32
    %370 = vector.broadcast %cst_116 : f32 to vector<16x1xf32>
    %371 = arith.divf %369, %370 : vector<16x1xf32>
    %372 = vector.broadcast %364 : vector<16x1xf32> to vector<16x64xf32>
    %373 = arith.subf %39, %372 : vector<16x64xf32>
    %cst_117 = arith.constant 9.99999974E-6 : f32
    %374 = vector.broadcast %cst_117 : f32 to vector<16x1xf32>
    %375 = arith.addf %371, %374 : vector<16x1xf32>
    %376 = math.rsqrt %375 : vector<16x1xf32>
    %377 = vector.broadcast %376 : vector<16x1xf32> to vector<16x64xf32>
    %378 = arith.mulf %373, %377 : vector<16x64xf32>
    %cst_118 = arith.constant 1.000000e+00 : f32
    %379 = vector.broadcast %cst_118 : f32 to vector<1x64xf32>
    %380 = arith.addf %379, %334 : vector<1x64xf32>
    %381 = vector.broadcast %380 : vector<1x64xf32> to vector<16x64xf32>
    %382 = arith.mulf %378, %381 : vector<16x64xf32>
    %383 = vector.broadcast %333 : vector<1x64xf32> to vector<16x64xf32>
    %384 = arith.addf %382, %383 : vector<16x64xf32>
    %385 = vector.extract_strided_slice %360 {offsets = [0, 0], sizes = [16, 64], strides = [1, 1]} : vector<32x64xf32> to vector<16x64xf32>
    %386 = vector.extract_strided_slice %384 {offsets = [0, 0], sizes = [8, 64], strides = [1, 1]} : vector<16x64xf32> to vector<8x64xf32>
    %387 = vector.extract_strided_slice %360 {offsets = [16, 0], sizes = [16, 64], strides = [1, 1]} : vector<32x64xf32> to vector<16x64xf32>
    %388 = vector.extract_strided_slice %384 {offsets = [8, 0], sizes = [8, 64], strides = [1, 1]} : vector<16x64xf32> to vector<8x64xf32>
    %389 = tpu.concatenate %385, %386, %387, %388 in 0 : vector<16x64xf32>, vector<8x64xf32>, vector<16x64xf32>, vector<8x64xf32> -> vector<48x64xf32>
    %390 = arith.truncf %389 : vector<48x64xf32> to vector<48x64xbf16>
    %c576 = arith.constant 576 : index
    %c0_119 = arith.constant 0 : index
    %391 = vector.load %arg4[%c576, %c0_119] : memref<1152x64xbf16, #tpu.memory_space<vmem>>, vector<64x64xbf16>
    %392 = arith.truncf %360 : vector<32x64xf32> to vector<32x64xbf16>
    %cst_120 = arith.constant dense<0.000000e+00> : vector<32x64xf32>
    %393 = tpu.matmul %392, %391, %cst_120 {dimension_numbers = #tpu.dot_dimension_numbers<[1], [0], [0], [1], [0, 0, 1, 1], [], []>} : vector<32x64xbf16>, vector<64x64xbf16>, vector<32x64xf32> -> vector<32x64xf32>
    %c11 = arith.constant 11 : index
    %c0_121 = arith.constant 0 : index
    %394 = vector.load %arg7[%c11, %c0_121] : memref<16x768xf32, #tpu.memory_space<vmem>>, vector<1x64xf32>
    %395 = vector.broadcast %394 : vector<1x64xf32> to vector<32x64xf32>
    %396 = arith.addf %393, %395 : vector<32x64xf32>
    %397 = arith.truncf %396 : vector<32x64xf32> to vector<32x64xbf16>
    %c640 = arith.constant 640 : index
    %c0_122 = arith.constant 0 : index
    %398 = vector.load %arg4[%c640, %c0_122] : memref<1152x64xbf16, #tpu.memory_space<vmem>>, vector<64x64xbf16>
    %cst_123 = arith.constant dense<0.000000e+00> : vector<48x64xf32>
    %399 = tpu.matmul %390, %398, %cst_123 {dimension_numbers = #tpu.dot_dimension_numbers<[1], [0], [0], [1], [0, 0, 1, 1], [], []>} : vector<48x64xbf16>, vector<64x64xbf16>, vector<48x64xf32> -> vector<48x64xf32>
    %c12 = arith.constant 12 : index
    %c0_124 = arith.constant 0 : index
    %400 = vector.load %arg7[%c12, %c0_124] : memref<16x768xf32, #tpu.memory_space<vmem>>, vector<1x64xf32>
    %401 = vector.broadcast %400 : vector<1x64xf32> to vector<48x64xf32>
    %402 = arith.addf %399, %401 : vector<48x64xf32>
    %403 = arith.truncf %402 : vector<48x64xf32> to vector<48x64xbf16>
    %c128 = arith.constant 128 : index
    %c0_125 = arith.constant 0 : index
    %404 = vector.load %arg5[%c128, %c0_125] : memref<256x256xbf16, #tpu.memory_space<vmem>>, vector<64x256xbf16>
    %cst_126 = arith.constant dense<0.000000e+00> : vector<48x256xf32>
    %405 = tpu.matmul %390, %404, %cst_126 {dimension_numbers = #tpu.dot_dimension_numbers<[1], [0], [0], [1], [0, 0, 1, 1], [], []>} : vector<48x64xbf16>, vector<64x256xbf16>, vector<48x256xf32> -> vector<48x256xf32>
    %406 = arith.truncf %405 : vector<48x256xf32> to vector<48x256xbf16>
    %407 = vector.extract_strided_slice %397 {offsets = [0, 0], sizes = [16, 64], strides = [1, 1]} : vector<32x64xbf16> to vector<16x64xbf16>
    %408 = vector.extract_strided_slice %403 {offsets = [0, 0], sizes = [24, 64], strides = [1, 1]} : vector<48x64xbf16> to vector<24x64xbf16>
    %409 = vector.extract_strided_slice %406 {offsets = [0, 0], sizes = [24, 256], strides = [1, 1]} : vector<48x256xbf16> to vector<24x256xbf16>
    %cst_127 = arith.constant 0.000000e+00 : f32
    %410 = vector.broadcast %cst_127 : f32 to vector<16x64xf32>
    %411 = vector.extract_strided_slice %407 {offsets = [0, 0], sizes = [16, 16], strides = [1, 1]} : vector<16x64xbf16> to vector<16x16xbf16>
    %412 = vector.extract_strided_slice %408 {offsets = [0, 0], sizes = [24, 16], strides = [1, 1]} : vector<24x64xbf16> to vector<24x16xbf16>
    %cst_128 = arith.constant dense<0.000000e+00> : vector<16x24xf32>
    %413 = tpu.matmul %411, %412, %cst_128 {dimension_numbers = #tpu.dot_dimension_numbers<[1], [1], [0], [0], [0, 0, 1, 0], [], []>} : vector<16x16xbf16>, vector<24x16xbf16>, vector<16x24xf32> -> vector<16x24xf32>
    %cst_129 = arith.constant 2.500000e-01 : f32
    %414 = vector.broadcast %cst_129 : f32 to vector<16x24xf32>
    %415 = arith.mulf %413, %414 : vector<16x24xf32>
    %cst_130 = arith.constant dense<0xFF800000> : vector<16xf32>
    %416 = vector.multi_reduction <maximumf>, %415, %cst_130 [1] : vector<16x24xf32> to vector<16xf32>
    %417 = vector.shape_cast %416 : vector<16xf32> to vector<16x1xf32>
    %418 = vector.broadcast %417 : vector<16x1xf32> to vector<16x24xf32>
    %419 = arith.subf %415, %418 : vector<16x24xf32>
    %420 = math.exp %419 : vector<16x24xf32>
    %cst_131 = arith.constant dense<0.000000e+00> : vector<16xf32>
    %421 = vector.multi_reduction <add>, %420, %cst_131 [1] : vector<16x24xf32> to vector<16xf32>
    %422 = vector.shape_cast %421 : vector<16xf32> to vector<16x1xf32>
    %423 = tpu.reciprocal %422 {approx = true} : vector<16x1xf32> -> vector<16x1xf32>
    %424 = vector.broadcast %423 : vector<16x1xf32> to vector<16x24xf32>
    %425 = arith.mulf %420, %424 : vector<16x24xf32>
    %426 = arith.truncf %425 : vector<16x24xf32> to vector<16x24xbf16>
    %427 = vector.extract_strided_slice %409 {offsets = [0, 0], sizes = [24, 64], strides = [1, 1]} : vector<24x256xbf16> to vector<24x64xbf16>
    %cst_132 = arith.constant dense<0.000000e+00> : vector<16x64xf32>
    %428 = tpu.matmul %426, %427, %cst_132 {dimension_numbers = #tpu.dot_dimension_numbers<[1], [0], [0], [1], [0, 0, 1, 1], [], []>} : vector<16x24xbf16>, vector<24x64xbf16>, vector<16x64xf32> -> vector<16x64xf32>
    %429 = arith.addf %410, %428 : vector<16x64xf32>
    %430 = vector.extract_strided_slice %407 {offsets = [0, 16], sizes = [16, 16], strides = [1, 1]} : vector<16x64xbf16> to vector<16x16xbf16>
    %431 = vector.extract_strided_slice %408 {offsets = [0, 16], sizes = [24, 16], strides = [1, 1]} : vector<24x64xbf16> to vector<24x16xbf16>
    %cst_133 = arith.constant dense<0.000000e+00> : vector<16x24xf32>
    %432 = tpu.matmul %430, %431, %cst_133 {dimension_numbers = #tpu.dot_dimension_numbers<[1], [1], [0], [0], [0, 0, 1, 0], [], []>} : vector<16x16xbf16>, vector<24x16xbf16>, vector<16x24xf32> -> vector<16x24xf32>
    %cst_134 = arith.constant 2.500000e-01 : f32
    %433 = vector.broadcast %cst_134 : f32 to vector<16x24xf32>
    %434 = arith.mulf %432, %433 : vector<16x24xf32>
    %cst_135 = arith.constant dense<0xFF800000> : vector<16xf32>
    %435 = vector.multi_reduction <maximumf>, %434, %cst_135 [1] : vector<16x24xf32> to vector<16xf32>
    %436 = vector.shape_cast %435 : vector<16xf32> to vector<16x1xf32>
    %437 = vector.broadcast %436 : vector<16x1xf32> to vector<16x24xf32>
    %438 = arith.subf %434, %437 : vector<16x24xf32>
    %439 = math.exp %438 : vector<16x24xf32>
    %cst_136 = arith.constant dense<0.000000e+00> : vector<16xf32>
    %440 = vector.multi_reduction <add>, %439, %cst_136 [1] : vector<16x24xf32> to vector<16xf32>
    %441 = vector.shape_cast %440 : vector<16xf32> to vector<16x1xf32>
    %442 = tpu.reciprocal %441 {approx = true} : vector<16x1xf32> -> vector<16x1xf32>
    %443 = vector.broadcast %442 : vector<16x1xf32> to vector<16x24xf32>
    %444 = arith.mulf %439, %443 : vector<16x24xf32>
    %445 = arith.truncf %444 : vector<16x24xf32> to vector<16x24xbf16>
    %446 = vector.extract_strided_slice %409 {offsets = [0, 64], sizes = [24, 64], strides = [1, 1]} : vector<24x256xbf16> to vector<24x64xbf16>
    %cst_137 = arith.constant dense<0.000000e+00> : vector<16x64xf32>
    %447 = tpu.matmul %445, %446, %cst_137 {dimension_numbers = #tpu.dot_dimension_numbers<[1], [0], [0], [1], [0, 0, 1, 1], [], []>} : vector<16x24xbf16>, vector<24x64xbf16>, vector<16x64xf32> -> vector<16x64xf32>
    %448 = arith.addf %429, %447 : vector<16x64xf32>
    %449 = vector.extract_strided_slice %407 {offsets = [0, 32], sizes = [16, 16], strides = [1, 1]} : vector<16x64xbf16> to vector<16x16xbf16>
    %450 = vector.extract_strided_slice %408 {offsets = [0, 32], sizes = [24, 16], strides = [1, 1]} : vector<24x64xbf16> to vector<24x16xbf16>
    %cst_138 = arith.constant dense<0.000000e+00> : vector<16x24xf32>
    %451 = tpu.matmul %449, %450, %cst_138 {dimension_numbers = #tpu.dot_dimension_numbers<[1], [1], [0], [0], [0, 0, 1, 0], [], []>} : vector<16x16xbf16>, vector<24x16xbf16>, vector<16x24xf32> -> vector<16x24xf32>
    %cst_139 = arith.constant 2.500000e-01 : f32
    %452 = vector.broadcast %cst_139 : f32 to vector<16x24xf32>
    %453 = arith.mulf %451, %452 : vector<16x24xf32>
    %cst_140 = arith.constant dense<0xFF800000> : vector<16xf32>
    %454 = vector.multi_reduction <maximumf>, %453, %cst_140 [1] : vector<16x24xf32> to vector<16xf32>
    %455 = vector.shape_cast %454 : vector<16xf32> to vector<16x1xf32>
    %456 = vector.broadcast %455 : vector<16x1xf32> to vector<16x24xf32>
    %457 = arith.subf %453, %456 : vector<16x24xf32>
    %458 = math.exp %457 : vector<16x24xf32>
    %cst_141 = arith.constant dense<0.000000e+00> : vector<16xf32>
    %459 = vector.multi_reduction <add>, %458, %cst_141 [1] : vector<16x24xf32> to vector<16xf32>
    %460 = vector.shape_cast %459 : vector<16xf32> to vector<16x1xf32>
    %461 = tpu.reciprocal %460 {approx = true} : vector<16x1xf32> -> vector<16x1xf32>
    %462 = vector.broadcast %461 : vector<16x1xf32> to vector<16x24xf32>
    %463 = arith.mulf %458, %462 : vector<16x24xf32>
    %464 = arith.truncf %463 : vector<16x24xf32> to vector<16x24xbf16>
    %465 = vector.extract_strided_slice %409 {offsets = [0, 128], sizes = [24, 64], strides = [1, 1]} : vector<24x256xbf16> to vector<24x64xbf16>
    %cst_142 = arith.constant dense<0.000000e+00> : vector<16x64xf32>
    %466 = tpu.matmul %464, %465, %cst_142 {dimension_numbers = #tpu.dot_dimension_numbers<[1], [0], [0], [1], [0, 0, 1, 1], [], []>} : vector<16x24xbf16>, vector<24x64xbf16>, vector<16x64xf32> -> vector<16x64xf32>
    %467 = arith.addf %448, %466 : vector<16x64xf32>
    %468 = vector.extract_strided_slice %407 {offsets = [0, 48], sizes = [16, 16], strides = [1, 1]} : vector<16x64xbf16> to vector<16x16xbf16>
    %469 = vector.extract_strided_slice %408 {offsets = [0, 48], sizes = [24, 16], strides = [1, 1]} : vector<24x64xbf16> to vector<24x16xbf16>
    %cst_143 = arith.constant dense<0.000000e+00> : vector<16x24xf32>
    %470 = tpu.matmul %468, %469, %cst_143 {dimension_numbers = #tpu.dot_dimension_numbers<[1], [1], [0], [0], [0, 0, 1, 0], [], []>} : vector<16x16xbf16>, vector<24x16xbf16>, vector<16x24xf32> -> vector<16x24xf32>
    %cst_144 = arith.constant 2.500000e-01 : f32
    %471 = vector.broadcast %cst_144 : f32 to vector<16x24xf32>
    %472 = arith.mulf %470, %471 : vector<16x24xf32>
    %cst_145 = arith.constant dense<0xFF800000> : vector<16xf32>
    %473 = vector.multi_reduction <maximumf>, %472, %cst_145 [1] : vector<16x24xf32> to vector<16xf32>
    %474 = vector.shape_cast %473 : vector<16xf32> to vector<16x1xf32>
    %475 = vector.broadcast %474 : vector<16x1xf32> to vector<16x24xf32>
    %476 = arith.subf %472, %475 : vector<16x24xf32>
    %477 = math.exp %476 : vector<16x24xf32>
    %cst_146 = arith.constant dense<0.000000e+00> : vector<16xf32>
    %478 = vector.multi_reduction <add>, %477, %cst_146 [1] : vector<16x24xf32> to vector<16xf32>
    %479 = vector.shape_cast %478 : vector<16xf32> to vector<16x1xf32>
    %480 = tpu.reciprocal %479 {approx = true} : vector<16x1xf32> -> vector<16x1xf32>
    %481 = vector.broadcast %480 : vector<16x1xf32> to vector<16x24xf32>
    %482 = arith.mulf %477, %481 : vector<16x24xf32>
    %483 = arith.truncf %482 : vector<16x24xf32> to vector<16x24xbf16>
    %484 = vector.extract_strided_slice %409 {offsets = [0, 192], sizes = [24, 64], strides = [1, 1]} : vector<24x256xbf16> to vector<24x64xbf16>
    %cst_147 = arith.constant dense<0.000000e+00> : vector<16x64xf32>
    %485 = tpu.matmul %483, %484, %cst_147 {dimension_numbers = #tpu.dot_dimension_numbers<[1], [0], [0], [1], [0, 0, 1, 1], [], []>} : vector<16x24xbf16>, vector<24x64xbf16>, vector<16x64xf32> -> vector<16x64xf32>
    %486 = arith.addf %467, %485 : vector<16x64xf32>
    %487 = vector.extract_strided_slice %397 {offsets = [16, 0], sizes = [16, 64], strides = [1, 1]} : vector<32x64xbf16> to vector<16x64xbf16>
    %488 = vector.extract_strided_slice %403 {offsets = [24, 0], sizes = [24, 64], strides = [1, 1]} : vector<48x64xbf16> to vector<24x64xbf16>
    %489 = vector.extract_strided_slice %406 {offsets = [24, 0], sizes = [24, 256], strides = [1, 1]} : vector<48x256xbf16> to vector<24x256xbf16>
    %cst_148 = arith.constant 0.000000e+00 : f32
    %490 = vector.broadcast %cst_148 : f32 to vector<16x64xf32>
    %491 = vector.extract_strided_slice %487 {offsets = [0, 0], sizes = [16, 16], strides = [1, 1]} : vector<16x64xbf16> to vector<16x16xbf16>
    %492 = vector.extract_strided_slice %488 {offsets = [0, 0], sizes = [24, 16], strides = [1, 1]} : vector<24x64xbf16> to vector<24x16xbf16>
    %cst_149 = arith.constant dense<0.000000e+00> : vector<16x24xf32>
    %493 = tpu.matmul %491, %492, %cst_149 {dimension_numbers = #tpu.dot_dimension_numbers<[1], [1], [0], [0], [0, 0, 1, 0], [], []>} : vector<16x16xbf16>, vector<24x16xbf16>, vector<16x24xf32> -> vector<16x24xf32>
    %cst_150 = arith.constant 2.500000e-01 : f32
    %494 = vector.broadcast %cst_150 : f32 to vector<16x24xf32>
    %495 = arith.mulf %493, %494 : vector<16x24xf32>
    %cst_151 = arith.constant dense<0xFF800000> : vector<16xf32>
    %496 = vector.multi_reduction <maximumf>, %495, %cst_151 [1] : vector<16x24xf32> to vector<16xf32>
    %497 = vector.shape_cast %496 : vector<16xf32> to vector<16x1xf32>
    %498 = vector.broadcast %497 : vector<16x1xf32> to vector<16x24xf32>
    %499 = arith.subf %495, %498 : vector<16x24xf32>
    %500 = math.exp %499 : vector<16x24xf32>
    %cst_152 = arith.constant dense<0.000000e+00> : vector<16xf32>
    %501 = vector.multi_reduction <add>, %500, %cst_152 [1] : vector<16x24xf32> to vector<16xf32>
    %502 = vector.shape_cast %501 : vector<16xf32> to vector<16x1xf32>
    %503 = tpu.reciprocal %502 {approx = true} : vector<16x1xf32> -> vector<16x1xf32>
    %504 = vector.broadcast %503 : vector<16x1xf32> to vector<16x24xf32>
    %505 = arith.mulf %500, %504 : vector<16x24xf32>
    %506 = arith.truncf %505 : vector<16x24xf32> to vector<16x24xbf16>
    %507 = vector.extract_strided_slice %489 {offsets = [0, 0], sizes = [24, 64], strides = [1, 1]} : vector<24x256xbf16> to vector<24x64xbf16>
    %cst_153 = arith.constant dense<0.000000e+00> : vector<16x64xf32>
    %508 = tpu.matmul %506, %507, %cst_153 {dimension_numbers = #tpu.dot_dimension_numbers<[1], [0], [0], [1], [0, 0, 1, 1], [], []>} : vector<16x24xbf16>, vector<24x64xbf16>, vector<16x64xf32> -> vector<16x64xf32>
    %509 = arith.addf %490, %508 : vector<16x64xf32>
    %510 = vector.extract_strided_slice %487 {offsets = [0, 16], sizes = [16, 16], strides = [1, 1]} : vector<16x64xbf16> to vector<16x16xbf16>
    %511 = vector.extract_strided_slice %488 {offsets = [0, 16], sizes = [24, 16], strides = [1, 1]} : vector<24x64xbf16> to vector<24x16xbf16>
    %cst_154 = arith.constant dense<0.000000e+00> : vector<16x24xf32>
    %512 = tpu.matmul %510, %511, %cst_154 {dimension_numbers = #tpu.dot_dimension_numbers<[1], [1], [0], [0], [0, 0, 1, 0], [], []>} : vector<16x16xbf16>, vector<24x16xbf16>, vector<16x24xf32> -> vector<16x24xf32>
    %cst_155 = arith.constant 2.500000e-01 : f32
    %513 = vector.broadcast %cst_155 : f32 to vector<16x24xf32>
    %514 = arith.mulf %512, %513 : vector<16x24xf32>
    %cst_156 = arith.constant dense<0xFF800000> : vector<16xf32>
    %515 = vector.multi_reduction <maximumf>, %514, %cst_156 [1] : vector<16x24xf32> to vector<16xf32>
    %516 = vector.shape_cast %515 : vector<16xf32> to vector<16x1xf32>
    %517 = vector.broadcast %516 : vector<16x1xf32> to vector<16x24xf32>
    %518 = arith.subf %514, %517 : vector<16x24xf32>
    %519 = math.exp %518 : vector<16x24xf32>
    %cst_157 = arith.constant dense<0.000000e+00> : vector<16xf32>
    %520 = vector.multi_reduction <add>, %519, %cst_157 [1] : vector<16x24xf32> to vector<16xf32>
    %521 = vector.shape_cast %520 : vector<16xf32> to vector<16x1xf32>
    %522 = tpu.reciprocal %521 {approx = true} : vector<16x1xf32> -> vector<16x1xf32>
    %523 = vector.broadcast %522 : vector<16x1xf32> to vector<16x24xf32>
    %524 = arith.mulf %519, %523 : vector<16x24xf32>
    %525 = arith.truncf %524 : vector<16x24xf32> to vector<16x24xbf16>
    %526 = vector.extract_strided_slice %489 {offsets = [0, 64], sizes = [24, 64], strides = [1, 1]} : vector<24x256xbf16> to vector<24x64xbf16>
    %cst_158 = arith.constant dense<0.000000e+00> : vector<16x64xf32>
    %527 = tpu.matmul %525, %526, %cst_158 {dimension_numbers = #tpu.dot_dimension_numbers<[1], [0], [0], [1], [0, 0, 1, 1], [], []>} : vector<16x24xbf16>, vector<24x64xbf16>, vector<16x64xf32> -> vector<16x64xf32>
    %528 = arith.addf %509, %527 : vector<16x64xf32>
    %529 = vector.extract_strided_slice %487 {offsets = [0, 32], sizes = [16, 16], strides = [1, 1]} : vector<16x64xbf16> to vector<16x16xbf16>
    %530 = vector.extract_strided_slice %488 {offsets = [0, 32], sizes = [24, 16], strides = [1, 1]} : vector<24x64xbf16> to vector<24x16xbf16>
    %cst_159 = arith.constant dense<0.000000e+00> : vector<16x24xf32>
    %531 = tpu.matmul %529, %530, %cst_159 {dimension_numbers = #tpu.dot_dimension_numbers<[1], [1], [0], [0], [0, 0, 1, 0], [], []>} : vector<16x16xbf16>, vector<24x16xbf16>, vector<16x24xf32> -> vector<16x24xf32>
    %cst_160 = arith.constant 2.500000e-01 : f32
    %532 = vector.broadcast %cst_160 : f32 to vector<16x24xf32>
    %533 = arith.mulf %531, %532 : vector<16x24xf32>
    %cst_161 = arith.constant dense<0xFF800000> : vector<16xf32>
    %534 = vector.multi_reduction <maximumf>, %533, %cst_161 [1] : vector<16x24xf32> to vector<16xf32>
    %535 = vector.shape_cast %534 : vector<16xf32> to vector<16x1xf32>
    %536 = vector.broadcast %535 : vector<16x1xf32> to vector<16x24xf32>
    %537 = arith.subf %533, %536 : vector<16x24xf32>
    %538 = math.exp %537 : vector<16x24xf32>
    %cst_162 = arith.constant dense<0.000000e+00> : vector<16xf32>
    %539 = vector.multi_reduction <add>, %538, %cst_162 [1] : vector<16x24xf32> to vector<16xf32>
    %540 = vector.shape_cast %539 : vector<16xf32> to vector<16x1xf32>
    %541 = tpu.reciprocal %540 {approx = true} : vector<16x1xf32> -> vector<16x1xf32>
    %542 = vector.broadcast %541 : vector<16x1xf32> to vector<16x24xf32>
    %543 = arith.mulf %538, %542 : vector<16x24xf32>
    %544 = arith.truncf %543 : vector<16x24xf32> to vector<16x24xbf16>
    %545 = vector.extract_strided_slice %489 {offsets = [0, 128], sizes = [24, 64], strides = [1, 1]} : vector<24x256xbf16> to vector<24x64xbf16>
    %cst_163 = arith.constant dense<0.000000e+00> : vector<16x64xf32>
    %546 = tpu.matmul %544, %545, %cst_163 {dimension_numbers = #tpu.dot_dimension_numbers<[1], [0], [0], [1], [0, 0, 1, 1], [], []>} : vector<16x24xbf16>, vector<24x64xbf16>, vector<16x64xf32> -> vector<16x64xf32>
    %547 = arith.addf %528, %546 : vector<16x64xf32>
    %548 = vector.extract_strided_slice %487 {offsets = [0, 48], sizes = [16, 16], strides = [1, 1]} : vector<16x64xbf16> to vector<16x16xbf16>
    %549 = vector.extract_strided_slice %488 {offsets = [0, 48], sizes = [24, 16], strides = [1, 1]} : vector<24x64xbf16> to vector<24x16xbf16>
    %cst_164 = arith.constant dense<0.000000e+00> : vector<16x24xf32>
    %550 = tpu.matmul %548, %549, %cst_164 {dimension_numbers = #tpu.dot_dimension_numbers<[1], [1], [0], [0], [0, 0, 1, 0], [], []>} : vector<16x16xbf16>, vector<24x16xbf16>, vector<16x24xf32> -> vector<16x24xf32>
    %cst_165 = arith.constant 2.500000e-01 : f32
    %551 = vector.broadcast %cst_165 : f32 to vector<16x24xf32>
    %552 = arith.mulf %550, %551 : vector<16x24xf32>
    %cst_166 = arith.constant dense<0xFF800000> : vector<16xf32>
    %553 = vector.multi_reduction <maximumf>, %552, %cst_166 [1] : vector<16x24xf32> to vector<16xf32>
    %554 = vector.shape_cast %553 : vector<16xf32> to vector<16x1xf32>
    %555 = vector.broadcast %554 : vector<16x1xf32> to vector<16x24xf32>
    %556 = arith.subf %552, %555 : vector<16x24xf32>
    %557 = math.exp %556 : vector<16x24xf32>
    %cst_167 = arith.constant dense<0.000000e+00> : vector<16xf32>
    %558 = vector.multi_reduction <add>, %557, %cst_167 [1] : vector<16x24xf32> to vector<16xf32>
    %559 = vector.shape_cast %558 : vector<16xf32> to vector<16x1xf32>
    %560 = tpu.reciprocal %559 {approx = true} : vector<16x1xf32> -> vector<16x1xf32>
    %561 = vector.broadcast %560 : vector<16x1xf32> to vector<16x24xf32>
    %562 = arith.mulf %557, %561 : vector<16x24xf32>
    %563 = arith.truncf %562 : vector<16x24xf32> to vector<16x24xbf16>
    %564 = vector.extract_strided_slice %489 {offsets = [0, 192], sizes = [24, 64], strides = [1, 1]} : vector<24x256xbf16> to vector<24x64xbf16>
    %cst_168 = arith.constant dense<0.000000e+00> : vector<16x64xf32>
    %565 = tpu.matmul %563, %564, %cst_168 {dimension_numbers = #tpu.dot_dimension_numbers<[1], [0], [0], [1], [0, 0, 1, 1], [], []>} : vector<16x24xbf16>, vector<24x64xbf16>, vector<16x64xf32> -> vector<16x64xf32>
    %566 = arith.addf %547, %565 : vector<16x64xf32>
    %567 = tpu.concatenate %486, %566 in 0 : vector<16x64xf32>, vector<16x64xf32> -> vector<32x64xf32>
    %568 = arith.addf %325, %567 : vector<32x64xf32>
    %c13 = arith.constant 13 : index
    %c0_169 = arith.constant 0 : index
    %569 = vector.load %arg7[%c13, %c0_169] : memref<16x768xf32, #tpu.memory_space<vmem>>, vector<1x64xf32>
    %570 = vector.broadcast %569 : vector<1x64xf32> to vector<32x64xf32>
    %571 = arith.addf %568, %570 : vector<32x64xf32>
    %cst_170 = arith.constant dense<0.000000e+00> : vector<32xf32>
    %572 = vector.multi_reduction <add>, %571, %cst_170 [1] : vector<32x64xf32> to vector<32xf32>
    %573 = vector.shape_cast %572 : vector<32xf32> to vector<32x1xf32>
    %cst_171 = arith.constant 6.400000e+01 : f32
    %574 = vector.broadcast %cst_171 : f32 to vector<32x1xf32>
    %575 = arith.divf %573, %574 : vector<32x1xf32>
    %576 = vector.broadcast %575 : vector<32x1xf32> to vector<32x64xf32>
    %577 = arith.subf %571, %576 : vector<32x64xf32>
    %578 = arith.mulf %577, %577 : vector<32x64xf32>
    %cst_172 = arith.constant dense<0.000000e+00> : vector<32xf32>
    %579 = vector.multi_reduction <add>, %578, %cst_172 [1] : vector<32x64xf32> to vector<32xf32>
    %580 = vector.shape_cast %579 : vector<32xf32> to vector<32x1xf32>
    %cst_173 = arith.constant 6.400000e+01 : f32
    %581 = vector.broadcast %cst_173 : f32 to vector<32x1xf32>
    %582 = arith.divf %580, %581 : vector<32x1xf32>
    %583 = vector.broadcast %575 : vector<32x1xf32> to vector<32x64xf32>
    %584 = arith.subf %571, %583 : vector<32x64xf32>
    %cst_174 = arith.constant 9.99999974E-6 : f32
    %585 = vector.broadcast %cst_174 : f32 to vector<32x1xf32>
    %586 = arith.addf %582, %585 : vector<32x1xf32>
    %587 = math.rsqrt %586 : vector<32x1xf32>
    %588 = vector.broadcast %587 : vector<32x1xf32> to vector<32x64xf32>
    %589 = arith.mulf %584, %588 : vector<32x64xf32>
    %cst_175 = arith.constant 1.000000e+00 : f32
    %590 = vector.broadcast %cst_175 : f32 to vector<1x64xf32>
    %591 = arith.addf %590, %336 : vector<1x64xf32>
    %592 = vector.broadcast %591 : vector<1x64xf32> to vector<32x64xf32>
    %593 = arith.mulf %589, %592 : vector<32x64xf32>
    %594 = vector.broadcast %335 : vector<1x64xf32> to vector<32x64xf32>
    %595 = arith.addf %593, %594 : vector<32x64xf32>
    %c192_176 = arith.constant 192 : index
    %c0_177 = arith.constant 0 : index
    %596 = vector.load %arg5[%c192_176, %c0_177] : memref<256x256xbf16, #tpu.memory_space<vmem>>, vector<64x256xbf16>
    %597 = arith.truncf %595 : vector<32x64xf32> to vector<32x64xbf16>
    %cst_178 = arith.constant dense<0.000000e+00> : vector<32x256xf32>
    %598 = tpu.matmul %597, %596, %cst_178 {dimension_numbers = #tpu.dot_dimension_numbers<[1], [0], [0], [1], [0, 0, 1, 1], [], []>} : vector<32x64xbf16>, vector<64x256xbf16>, vector<32x256xf32> -> vector<32x256xf32>
    %c14 = arith.constant 14 : index
    %c0_179 = arith.constant 0 : index
    %599 = vector.load %arg7[%c14, %c0_179] : memref<16x768xf32, #tpu.memory_space<vmem>>, vector<1x256xf32>
    %600 = vector.broadcast %599 : vector<1x256xf32> to vector<32x256xf32>
    %601 = arith.addf %598, %600 : vector<32x256xf32>
    %cst_180 = arith.constant 0.000000e+00 : f32
    %602 = vector.broadcast %cst_180 : f32 to vector<32x256xf32>
    %603 = arith.maximumf %601, %602 : vector<32x256xf32>
    %604 = arith.mulf %603, %603 : vector<32x256xf32>
    %c704 = arith.constant 704 : index
    %c0_181 = arith.constant 0 : index
    %605 = vector.load %arg4[%c704, %c0_181] : memref<1152x64xbf16, #tpu.memory_space<vmem>>, vector<256x64xbf16>
    %606 = arith.truncf %604 : vector<32x256xf32> to vector<32x256xbf16>
    %cst_182 = arith.constant dense<0.000000e+00> : vector<32x64xf32>
    %607 = tpu.matmul %606, %605, %cst_182 {dimension_numbers = #tpu.dot_dimension_numbers<[1], [0], [0], [1], [0, 0, 1, 1], [], []>} : vector<32x256xbf16>, vector<256x64xbf16>, vector<32x64xf32> -> vector<32x64xf32>
    %608 = arith.addf %571, %607 : vector<32x64xf32>
    %c15 = arith.constant 15 : index
    %c0_183 = arith.constant 0 : index
    %609 = vector.load %arg7[%c15, %c0_183] : memref<16x768xf32, #tpu.memory_space<vmem>>, vector<1x64xf32>
    %610 = vector.broadcast %609 : vector<1x64xf32> to vector<32x64xf32>
    %611 = arith.addf %608, %610 : vector<32x64xf32>
    %612 = arith.truncf %611 : vector<32x64xf32> to vector<32x64xbf16>
    %c960 = arith.constant 960 : index
    %c0_184 = arith.constant 0 : index
    %613 = vector.load %arg4[%c960, %c0_184] : memref<1152x64xbf16, #tpu.memory_space<vmem>>, vector<64x64xbf16>
    %cst_185 = arith.constant dense<0.000000e+00> : vector<32x64xf32>
    %614 = tpu.matmul %612, %613, %cst_185 {dimension_numbers = #tpu.dot_dimension_numbers<[1], [0], [0], [1], [0, 0, 1, 1], [], []>} : vector<32x64xbf16>, vector<64x64xbf16>, vector<32x64xf32> -> vector<32x64xf32>
    %615 = arith.truncf %614 : vector<32x64xf32> to vector<32x64xbf16>
    %c1024 = arith.constant 1024 : index
    %c0_186 = arith.constant 0 : index
    %616 = vector.load %arg4[%c1024, %c0_186] : memref<1152x64xbf16, #tpu.memory_space<vmem>>, vector<64x4xbf16>
    %c1088 = arith.constant 1088 : index
    %c0_187 = arith.constant 0 : index
    %617 = vector.load %arg4[%c1088, %c0_187] : memref<1152x64xbf16, #tpu.memory_space<vmem>>, vector<64x4xbf16>
    %cst_188 = arith.constant dense<0.000000e+00> : vector<32x4xf32>
    %618 = tpu.matmul %612, %617, %cst_188 {dimension_numbers = #tpu.dot_dimension_numbers<[1], [0], [0], [1], [0, 0, 1, 1], [], []>} : vector<32x64xbf16>, vector<64x4xbf16>, vector<32x4xf32> -> vector<32x4xf32>
    %619 = arith.truncf %618 : vector<32x4xf32> to vector<32x4xbf16>
    %c0_189 = arith.constant 0 : index
    %c0_190 = arith.constant 0 : index
    %620 = vector.load %arg8[%c0_189, %c0_190] : memref<64x2xf32, #tpu.memory_space<vmem>>, vector<64x2xf32>
    %621 = vector.extract_strided_slice %620 {offsets = [0, 0], sizes = [64, 1], strides = [1, 1]} : vector<64x2xf32> to vector<64x1xf32>
    %622 = vector.extract_strided_slice %620 {offsets = [0, 1], sizes = [4, 1], strides = [1, 1]} : vector<64x2xf32> to vector<4x1xf32>
    %c0_191 = arith.constant 0 : index
    %c0_192 = arith.constant 0 : index
    %623 = vector.load %arg2[%c0_191, %c0_192] : memref<8x256xf32, #tpu.memory_space<vmem>>, vector<4x256xf32>
    %624 = arith.truncf %623 : vector<4x256xf32> to vector<4x256xbf16>
    %cst_193 = arith.constant dense<0.000000e+00> : vector<64x256xf32>
    %625 = tpu.matmul %616, %624, %cst_193 {dimension_numbers = #tpu.dot_dimension_numbers<[1], [0], [0], [1], [0, 0, 1, 1], [], []>} : vector<64x4xbf16>, vector<4x256xbf16>, vector<64x256xf32> -> vector<64x256xf32>
    %626 = vector.broadcast %621 : vector<64x1xf32> to vector<64x256xf32>
    %627 = arith.addf %625, %626 : vector<64x256xf32>
    %628 = vector.extract_strided_slice %615 {offsets = [0, 0], sizes = [16, 64], strides = [1, 1]} : vector<32x64xbf16> to vector<16x64xbf16>
    %629 = arith.truncf %627 : vector<64x256xf32> to vector<64x256xbf16>
    %cst_194 = arith.constant dense<0.000000e+00> : vector<16x256xf32>
    %630 = tpu.matmul %628, %629, %cst_194 {dimension_numbers = #tpu.dot_dimension_numbers<[1], [0], [0], [1], [0, 0, 1, 1], [], []>} : vector<16x64xbf16>, vector<64x256xbf16>, vector<16x256xf32> -> vector<16x256xf32>
    %cst_195 = arith.constant 1.250000e-01 : f32
    %631 = vector.broadcast %cst_195 : f32 to vector<16x256xf32>
    %632 = arith.mulf %630, %631 : vector<16x256xf32>
    %cst_196 = arith.constant dense<0xFF800000> : vector<256xf32>
    %633 = vector.multi_reduction <maximumf>, %632, %cst_196 [0] : vector<16x256xf32> to vector<256xf32>
    %634 = vector.shape_cast %633 : vector<256xf32> to vector<1x256xf32>
    %635 = vector.broadcast %634 : vector<1x256xf32> to vector<16x256xf32>
    %636 = arith.subf %632, %635 : vector<16x256xf32>
    %637 = math.exp %636 : vector<16x256xf32>
    %cst_197 = arith.constant dense<0.000000e+00> : vector<256xf32>
    %638 = vector.multi_reduction <add>, %637, %cst_197 [0] : vector<16x256xf32> to vector<256xf32>
    %639 = vector.shape_cast %638 : vector<256xf32> to vector<1x256xf32>
    %640 = tpu.reciprocal %639 {approx = true} : vector<1x256xf32> -> vector<1x256xf32>
    %641 = vector.broadcast %640 : vector<1x256xf32> to vector<16x256xf32>
    %642 = arith.mulf %637, %641 : vector<16x256xf32>
    %643 = vector.extract_strided_slice %619 {offsets = [0, 0], sizes = [16, 4], strides = [1, 1]} : vector<32x4xbf16> to vector<16x4xbf16>
    %644 = arith.truncf %642 : vector<16x256xf32> to vector<16x256xbf16>
    %cst_198 = arith.constant dense<0.000000e+00> : vector<4x256xf32>
    %645 = tpu.matmul %643, %644, %cst_198 {dimension_numbers = #tpu.dot_dimension_numbers<[0], [0], [1], [1], [0, 1, 1, 1], [], []>} : vector<16x4xbf16>, vector<16x256xbf16>, vector<4x256xf32> -> vector<4x256xf32>
    %646 = vector.broadcast %622 : vector<4x1xf32> to vector<4x256xf32>
    %647 = arith.addf %645, %646 : vector<4x256xf32>
    %648 = arith.addf %623, %647 : vector<4x256xf32>
    %c4_199 = arith.constant 4 : index
    %c0_200 = arith.constant 0 : index
    %649 = vector.load %arg2[%c4_199, %c0_200] : memref<8x256xf32, #tpu.memory_space<vmem>>, vector<4x256xf32>
    %650 = arith.truncf %649 : vector<4x256xf32> to vector<4x256xbf16>
    %cst_201 = arith.constant dense<0.000000e+00> : vector<64x256xf32>
    %651 = tpu.matmul %616, %650, %cst_201 {dimension_numbers = #tpu.dot_dimension_numbers<[1], [0], [0], [1], [0, 0, 1, 1], [], []>} : vector<64x4xbf16>, vector<4x256xbf16>, vector<64x256xf32> -> vector<64x256xf32>
    %652 = vector.broadcast %621 : vector<64x1xf32> to vector<64x256xf32>
    %653 = arith.addf %651, %652 : vector<64x256xf32>
    %654 = vector.extract_strided_slice %615 {offsets = [16, 0], sizes = [16, 64], strides = [1, 1]} : vector<32x64xbf16> to vector<16x64xbf16>
    %655 = arith.truncf %653 : vector<64x256xf32> to vector<64x256xbf16>
    %cst_202 = arith.constant dense<0.000000e+00> : vector<16x256xf32>
    %656 = tpu.matmul %654, %655, %cst_202 {dimension_numbers = #tpu.dot_dimension_numbers<[1], [0], [0], [1], [0, 0, 1, 1], [], []>} : vector<16x64xbf16>, vector<64x256xbf16>, vector<16x256xf32> -> vector<16x256xf32>
    %cst_203 = arith.constant 1.250000e-01 : f32
    %657 = vector.broadcast %cst_203 : f32 to vector<16x256xf32>
    %658 = arith.mulf %656, %657 : vector<16x256xf32>
    %cst_204 = arith.constant dense<0xFF800000> : vector<256xf32>
    %659 = vector.multi_reduction <maximumf>, %658, %cst_204 [0] : vector<16x256xf32> to vector<256xf32>
    %660 = vector.shape_cast %659 : vector<256xf32> to vector<1x256xf32>
    %661 = vector.broadcast %660 : vector<1x256xf32> to vector<16x256xf32>
    %662 = arith.subf %658, %661 : vector<16x256xf32>
    %663 = math.exp %662 : vector<16x256xf32>
    %cst_205 = arith.constant dense<0.000000e+00> : vector<256xf32>
    %664 = vector.multi_reduction <add>, %663, %cst_205 [0] : vector<16x256xf32> to vector<256xf32>
    %665 = vector.shape_cast %664 : vector<256xf32> to vector<1x256xf32>
    %666 = tpu.reciprocal %665 {approx = true} : vector<1x256xf32> -> vector<1x256xf32>
    %667 = vector.broadcast %666 : vector<1x256xf32> to vector<16x256xf32>
    %668 = arith.mulf %663, %667 : vector<16x256xf32>
    %669 = vector.extract_strided_slice %619 {offsets = [16, 0], sizes = [16, 4], strides = [1, 1]} : vector<32x4xbf16> to vector<16x4xbf16>
    %670 = arith.truncf %668 : vector<16x256xf32> to vector<16x256xbf16>
    %cst_206 = arith.constant dense<0.000000e+00> : vector<4x256xf32>
    %671 = tpu.matmul %669, %670, %cst_206 {dimension_numbers = #tpu.dot_dimension_numbers<[0], [0], [1], [1], [0, 1, 1, 1], [], []>} : vector<16x4xbf16>, vector<16x256xbf16>, vector<4x256xf32> -> vector<4x256xf32>
    %672 = vector.broadcast %622 : vector<4x1xf32> to vector<4x256xf32>
    %673 = arith.addf %671, %672 : vector<4x256xf32>
    %674 = arith.addf %649, %673 : vector<4x256xf32>
    %675 = tpu.concatenate %648, %674 in 0 : vector<4x256xf32>, vector<4x256xf32> -> vector<8x256xf32>
    %c0_207 = arith.constant 0 : index
    %c0_208 = arith.constant 0 : index
    %676 = vector.load %arg9[%c0_207, %c0_208] : memref<8x256xf32, #tpu.memory_space<vmem>>, vector<8x256xf32>
    tpu.vector_store %arg9[%c0_207, %c0_208], %675 {strides = array<i32>} : memref<8x256xf32, #tpu.memory_space<vmem>>, vector<8x256xf32>,
    return
  }
}

</mosaic_0001>

<bundles_post_ra>
// kernel: ella_proxy_unet_forward.1
= control target key start
LH: loop header
LB: loop body
LE: loop exit
PB: predicated region body
PF: predicated region fallthrough
CT: control target
= control target key end

     0   :  { %v6669_v0 = vmov 0.0   ;;  %vm6670_vm0 = vmmov 0   ;;  %vm52_vm1 = vcmask 261120   ;;  %vm136_vm2 = vcmask 523264   ;;  %s6672_s21 = smov 112   ;;  %s6673_s22 = smov 64   ;;  %s8379_s4 = inlined_call_operand.vmem [shape: bf16[1152,64], index: 4, kind: input, shape index: {}]   ;;  %s8380_s0 = inlined_call_operand.vmem [shape: f32[1,32], index: 0, kind: input, shape index: {}]   ;;  %s8381_s7 = inlined_call_operand.vmem [shape: f32[16,768], index: 7, kind: input, shape index: {}]   ;;  %s8382_s1 = inlined_call_operand.vmem [shape: f32[16,32], index: 1, kind: input, shape index: {}]   ;;  %s8383_s6 = inlined_call_operand.vmem [shape: bf16[128,768], index: 6, kind: input, shape index: {}]   ;;  %s8384_s3 = inlined_call_operand.vmem [shape: f32[16,64], index: 3, kind: input, shape index: {}]   ;;  %s8385_s5 = inlined_call_operand.vmem [shape: bf16[256,256], index: 5, kind: input, shape index: {}]   ;;  %s8386_s2 = inlined_call_operand.vmem [shape: f32[8,256], index: 2, kind: input, shape index: {}]   ;;  %s8387_s8 = inlined_call_operand.vmem [shape: f32[64,2], index: 8, kind: input, shape index: {}]   ;;  %s8388_s9 = inlined_call_operand.vmem [shape: f32[8,256], index: 9, kind: output, shape index: {}]  }
   0x1   :  { %5890 = vmatprep.subr.bf16.mxu1 %v6669_v0  ;;  %v6285_v1 = vld [vmem:[%s8379_s4 + $0x8] sm:$0xff]   ;;  %5894 = vmatprep.mubr.msk.bf16.mxu1 %vm6670_vm0, %v6669_v0  ;;  %v6286_v2 = vld [vmem:[%s8379_s4] sm:$0xff]   ;;  %v6289_v7 = vld [vmem:[%s8379_s4 + $0x18] sm:$0xff]   ;;  %v6671_v40 = vmov 0   ;;  %vm1024_vm3 = vcmask 130048   ;;  %vm1195_vm4 = vcmask 1043456  }
   0x2   :  { %5910 = vmatprep.subr.bf16.mxu0 %v6669_v0  ;;  %5918 = vmatprep.mubr.msk.bf16.mxu0 %vm6670_vm0, %v6669_v0  ;;  %v33_v3 = vld [vmem:[%s8380_s0] sm:$0x1]  ;;  %v6287_v5 = vld [vmem:[%s8379_s4 + $0x28] sm:$0xff]   ;;  %v6290_v8 = vld [vmem:[%s8379_s4 + $0x10] sm:$0xff]   ;;  %vm1077_vm5 = vcmask 195584   ;;  %s6674_s23 = smov 96  }
   0x3   :  { %5891 = vmatpush3.bf16.msra.mxu1 %v6285_v1  ;;  %v38_v4 = vpack.c.bf16 %v33_v3, %v33_v3  ;;  %v6288_v6 = vld [vmem:[%s8379_s4 + $0x20] sm:$0xff]   ;;  %v6291_v21 = vld [vmem:[%s8379_s4 + $0x58] sm:$0xff]   ;;  %v6292_v23 = vld [vmem:[%s8379_s4 + $0x50] sm:$0xff]   ;;  %6283 = vset.pattern.permute.xlu1 %v6671_v40  ;;  %s6675_s24 = smov 80   ;;  %vm4925_vm6 = vcmask 1041408   ;;  %vm4912_vm7 = vcmask 31744  }
   0x4   :  { %5892 = vmatprep.subr.bf16.mxu1 %v6669_v0  ;;  %v39_v9 = vld [vmem:[%s8381_s7] ss:$0 sm:$0xff]  ;;  %v274_v25 = vld [vmem:[%s8382_s1 + $0x8] sm:$0xff]  ;;  %v6294_v28 = vld [vmem:[%s8383_s6 + $0x98] ss:$24 sps:$4 sm:$0xff]   ;;  %6282 = vset.pattern.permute.xlu0 %v6671_v40 }
   0x5   :  { %v273_v24 = vld [vmem:[%s8382_s1] sm:$0xff]  ;;  %v6293_v27 = vld [vmem:[%s8379_s4 + $0x48] sm:$0xff]   ;;  %v6296_v29 = vld [vmem:[%s8383_s6 + $0x9c] ss:$24 sps:$4 sm:$0xff]  }
   0x6   :  { %v279_v26 = vpack.c.bf16 %v274_v25, %v273_v24  ;;  %5911 = vmatpush3.bf16.msra.mxu0 %v6293_v27  ;;  %v6297_v30 = vld [vmem:[%s8379_s4 + $0x40] sm:$0xff]   ;;  %v6301_v33 = vld [vmem:[%s8379_s4 + $0x38] sm:$0xff]   ;;  %v6305_v36 = vld [vmem:[%s8379_s4 + $0x30] sm:$0xff]  }
   0x7   :  { %5893 = vmatpush3.bf16.msra.mxu1 %v6286_v2  ;;  %5912 = vmatprep.subr.bf16.mxu0 %v6669_v0  ;;  %v6300_v31 = vld [vmem:[%s8383_s6 + $0x6c] ss:$24 sps:$4 sm:$0xff]   ;;  %v6298_v32 = vld [vmem:[%s8383_s6 + $0x68] ss:$24 sps:$4 sm:$0xff]   ;;  %v6304_v34 = vld [vmem:[%s8383_s6 + $0x3c] ss:$24 sps:$4 sm:$0xff]  }
   0x8   :  { %5898 = vmatprep.subr.bf16.mxu1 %v6669_v0  ;;  %v6302_v35 = vld [vmem:[%s8383_s6 + $0x38] ss:$24 sps:$4 sm:$0xff]   ;;  %v6308_v37 = vld [vmem:[%s8383_s6 + $0xc] ss:$24 sps:$4 sm:$0xff]   ;;  %v6306_v38 = vld [vmem:[%s8383_s6 + $0x8] ss:$24 sps:$4 sm:$0xff]  }
   0x9   :  { %v6311_v39 = vld [vmem:[%s8383_s6 + $0x94] ss:$24 sps:$4 sm:$0xff]   ;;  %v111_v41 = vld [vmem:[%s8381_s7 + $0x1] ss:$0 sm:$0xff]  ;;  %v280_v49 = vld [vmem:[%s8381_s7 + $0x3] ss:$0 sm:$0xff] }
   0xa   :  { %5895 = vmatmul.mubr.msk.bf16.vlgmr.msra.gmra.mxu1 %vm52_vm1, %v38_v4  ;;  %5913 = vmatpush3.bf16.msra.mxu0 %v6297_v30  ;;  %v6309_v61 = vld [vmem:[%s8383_s6 + $0x90] ss:$24 sps:$4 sm:$0xff]   ;;  %v6314_v63 = vld [vmem:[%s8383_s6 + $0x64] ss:$24 sps:$4 sm:$0xff]   ;;  %v6312_v1 = vld [vmem:[%s8383_s6 + $0x60] ss:$24 sps:$4 sm:$0xff]  }
   0xb   :  { %5906 = vmatprep.mubr.msk.bf16.mxu1 %vm6670_vm0, %v6669_v0  ;;  %5899 = vmatpush3.bf16.msra.mxu1 %v6287_v5  ;;  %v6317_v2 = vld [vmem:[%s8383_s6 + $0x34] ss:$24 sps:$4 sm:$0xff]   ;;  %v6315_v3 = vld [vmem:[%s8383_s6 + $0x30] ss:$24 sps:$4 sm:$0xff]   ;;  %v6320_v4 = vld [vmem:[%s8383_s6 + $0x4] ss:$24 sps:$4 sm:$0xff]  }
   0xc   :  { %5900 = vmatprep.subr.bf16.mxu1 %v6669_v0  ;;  %5914 = vmatprep.subr.bf16.mxu0 %v6669_v0  ;;  %v6318_v5 = vld [vmem:[%s8383_s6] ss:$24 sps:$4 sm:$0xff]  }
   0xe   :  { %5915 = vmatpush3.bf16.msra.mxu0 %v6301_v33 }
   0xf   :  { %5901 = vmatpush3.bf16.msra.mxu1 %v6288_v6  ;;  %5916 = vmatprep.subr.bf16.mxu0 %v6669_v0  ;;  %v6323_v6 = vld [vmem:[%s8383_s6 + $0xa4] ss:$24 sps:$4 sm:$0xff]  }
  0x10   :  { %5902 = vmatprep.subr.bf16.mxu1 %v6669_v0 }
  0x12   :  { %5917 = vmatpush3.bf16.msra.mxu0 %v6305_v36 }
  0x13   :  { %5903 = vmatpush3.bf16.msra.mxu1 %v6289_v7  ;;  %524 = vmatprep.subr.bf16.mxu0 %v6311_v39  ;;  %v6321_v7 = vld [vmem:[%s8383_s6 + $0xa0] ss:$24 sps:$4 sm:$0xff]   ;;  %v5462_v39 = vld [vmem:[%s8381_s7 + $0x4] ss:$8 sm:$0xf] }
  0x14   :  { %5904 = vmatprep.subr.bf16.mxu1 %v6669_v0 }
  0x17   :  { %5905 = vmatpush3.bf16.msra.mxu1 %v6290_v8  ;;  %v6326_v8 = vld [vmem:[%s8383_s6 + $0x74] ss:$24 sps:$4 sm:$0xff]  }
  0x18   :  { %5922 = vmatprep.subr.bf16.mxu1 %v6669_v0 }
  0xca   :  { %v90_v10 = vpop.f32.mrf.mxu1 }
  0xcb   :  { %v91_v11 = vadd.f32 %v90_v10, %v39_v9  ;;  %v6324_v9 = vld [vmem:[%s8383_s6 + $0x70] ss:$24 sps:$4 sm:$0xff]   ;;  %v6329_v10 = vld [vmem:[%s8383_s6 + $0x44] ss:$24 sps:$4 sm:$0xff]  }
  0xcc   :  { %v5896_v12 = vpop.f32.mrf.mxu1 }
  0xcd   :  { %v96_v13 = vsub.f32 0.0, %v91_v11  ;;  %v6332_v12 = vld [vmem:[%s8383_s6 + $0x14] ss:$24 sps:$4 sm:$0xff]  }
  0xce   :  { %v93_v14 = vpop.f32.mrf.mxu1 }
  0xcf   :  { %v97_v15 = vmul.f32 1.442695, %v96_v13  ;;  %v6330_v13 = vld [vmem:[%s8383_s6 + $0x10] ss:$24 sps:$4 sm:$0xff]   ;;  %v264_v14 = vlaneseq }
  0xd0   :  { %v5897_v16 = vpop.f32.mrf.mxu1 }
  0xd1   :  { %6477 = vpow2.f32 %v97_v15  ;;  %v6900_v15 = vshrl.u32 %v264_v14, 7  ;;  %v6339_v14 = vld [vmem:[%s8379_s4 + $0x60] sm:$0xff]  }
  0xd3   :  { %v6903_v16 = vsub.s32 0, %v6900_v15 }
  0xde   :  { %v6478_v17 = vpop.eup %6477 }
  0xdf   :  { %v99_v18 = vadd.f32 1.0, %v6478_v17  ;;  %v186_v17 = vld [vmem:[%s8384_s3] sm:$0xff] }
  0xe1   :  { %6479 = vrcp.f32 %v99_v18  ;;  %v187_v18 = vld [vmem:[%s8384_s3 + $0x8] sm:$0xff] }
  0xee   :  { %v6480_v19 = vpop.eup %6479 }
  0xef   :  { %v101_v20 = vmul.f32 %v6480_v19, %v91_v11  ;;  %v6327_v11 = vld [vmem:[%s8383_s6 + $0x40] ss:$24 sps:$4 sm:$0xff]  }
  0xf1   :  { %v110_v22 = vpack.c.bf16 %v101_v20, %v101_v20 }
  0xf3   :  { %5907 = vmatmul.mubr.msk.bf16.vlgmr.msra.gmra.mxu1 %vm136_vm2, %v110_v22  ;;  %v270_v22 = vld [vmem:[%s8381_s7 + $0x2] ss:$0 sm:$0xff] }
  0xf4   :  { %5923 = vmatpush3.bf16.msra.mxu1 %v6291_v21  ;;  %5926 = vmatprep.mubr.msk.bf16.mxu1 %vm6670_vm0, %v6669_v0 }
  0xf5   :  { %5924 = vmatprep.subr.bf16.mxu1 %v6669_v0 }
  0xf8   :  { %5925 = vmatpush3.bf16.msra.mxu1 %v6292_v23 }
  0xf9   :  { %565 = vmatprep.subr.bf16.mxu1 %v6296_v29 }
  0xfb   :  { %5927 = vmatmul.mubr.msk.bf16.vlgmr.msra.gmra.mxu1 %vm52_vm1, %v279_v26 }
  0xfc   :  { %566 = vmatpush1.bf16.msra.mxu1 %v6294_v28  ;;  %589 = vmatprep.mubr.bf16.mxu1 %v6671_v40 }
  0xfd   :  { %567 = vmatprep.subr.bf16.mxu1 %v6300_v31 }
 0x100   :  { %568 = vmatpush1.bf16.msra.mxu1 %v6298_v32 }
 0x101   :  { %569 = vmatprep.subr.bf16.mxu1 %v6304_v34 }
 0x104   :  { %570 = vmatpush1.bf16.msra.mxu1 %v6302_v35 }
 0x105   :  { %571 = vmatprep.subr.bf16.mxu1 %v6308_v37 }
 0x108   :  { %572 = vmatpush1.bf16.msra.mxu1 %v6306_v38 }
 0x1b3   :  { %v174_v42 = vpop.f32.mrf.mxu1 }
 0x1b4   :  { %v175_v43 = vadd.f32 %v174_v42, %v111_v41  ;;  %v5463_v41 = vld [vmem:[%s8381_s7 + $0x4] ss:$8 sm:$0x30]  ;;  %v504_v42 = vsub.s32 4, %v6900_v15 }
 0x1b5   :  { %v5908_v44 = vpop.f32.mrf.mxu1 }
 0x1b6   :  { %v180_v45 = vsub.f32 0.0, %v175_v43  ;;  %v508_v44 = vsub.s32 5, %v6900_v15 }
 0x1b7   :  { %v177_v46 = vpop.f32.mrf.mxu1 }
 0x1b8   :  { %v181_v47 = vmul.f32 1.442695, %v180_v45 }
 0x1b9   :  { %v5909_v48 = vpop.f32.mrf.mxu1 }
 0x1ba   :  { %6481 = vpow2.f32 %v181_v47 }
 0x1bb   :  { %v330_v50 = vpop.f32.mrf.mxu1 }
 0x1bc   :  { %v6834_v51 = vadd.f32 %v330_v50, %v280_v49 }
 0x1bd   :  { %v5928_v52 = vpop.f32.mrf.mxu1 }
 0x1be   :  { %v679_v53 = vsel %vm136_vm2, %v6834_v51, 0.0 }
 0x1bf   :  { %680 = vadd.xlane.f32.xlu1 %v679_v53  ;;  %v333_v54 = vpop.f32.mrf.mxu1 }
 0x1c0   :  { %v6838_v55 = vadd.f32 %v333_v54, %v280_v49 }
 0x1c1   :  { %v5929_v56 = vpop.f32.mrf.mxu1 }
 0x1c7   :  { %v6482_v57 = vpop.eup %6481 }
 0x1c8   :  { %v183_v58 = vadd.f32 1.0, %v6482_v57 }
 0x1ca   :  { %6483 = vrcp.f32 %v183_v58 }
 0x1d7   :  { %v6484_v59 = vpop.eup %6483 }
 0x1d8   :  { %v185_v60 = vmul.f32 %v6484_v59, %v175_v43  ;;  %v6938_v43 = vor.u32 %v5463_v41, %v5462_v39 }
 0x1da   :  { %v6843_v62 = vpack.c.bf16 %v185_v60, %v185_v60  ;;  %v505_v45 = vrot.slane %v6938_v43, %v504_v42  ;;  %v509_v46 = vrot.slane %v6938_v43, %v508_v44 }
 0x1dc   :  { %5919 = vmatmul.mubr.msk.bf16.vlgmr.msra.gmra.mxu0 %vm136_vm2, %v6843_v62  ;;  %5489 = vmatmul.mubr.msk.bf16.vlgmr.msra.gmra.mxu1 %vm136_vm2, %v6843_v62 }
 0x1dd   :  { %525 = vmatpush1.bf16.msra.mxu0 %v6309_v61  ;;  %548 = vmatprep.mubr.bf16.mxu0 %v6671_v40 }
 0x1de   :  { %526 = vmatprep.subr.bf16.mxu0 %v6314_v63 }
 0x1e1   :  { %527 = vmatpush1.bf16.msra.mxu0 %v6312_v1 }
 0x1e2   :  { %528 = vmatprep.subr.bf16.mxu0 %v6317_v2 }
 0x1e5   :  { %529 = vmatpush1.bf16.msra.mxu0 %v6315_v3 }
 0x1e6   :  { %530 = vmatprep.subr.bf16.mxu0 %v6320_v4 }
 0x1e9   :  { %531 = vmatpush1.bf16.msra.mxu0 %v6318_v5 }
 0x1ea   :  { %606 = vmatprep.subr.bf16.mxu0 %v6323_v6 }
 0x1ec   :  { %5488 = vmatmul.mubr.msk.bf16.vlgmr.msra.gmra.mxu0 %vm136_vm2, %v6843_v62 }
 0x1ed   :  { %607 = vmatpush1.bf16.msra.mxu0 %v6321_v7  ;;  %630 = vmatprep.mubr.bf16.mxu0 %v6671_v40  ;;  %v682_v7 = vsel %vm136_vm2, %v6838_v55, 0.0 }
 0x1ee   :  { %608 = vmatprep.subr.bf16.mxu0 %v6326_v8  ;;  %v6333_v8 = vld [vmem:[%s8379_s4 + $0x78] sm:$0xff]  }
 0x1ef   :  { %5930 = vmatprep.subr.bf16.mxu1 %v6333_v8 }
 0x1f0   :  { %5931 = vmatpush3.bf16.msra.mxu1 %v6333_v8 }
 0x1f1   :  { %609 = vmatpush1.bf16.msra.mxu0 %v6324_v9  ;;  %v6334_v9 = vld [vmem:[%s8379_s4 + $0x98] sm:$0xff]  }
 0x1f2   :  { %610 = vmatprep.subr.bf16.mxu0 %v6329_v10  ;;  %v6335_v10 = vld [vmem:[%s8379_s4 + $0x70] sm:$0xff]  }
 0x1f3   :  { %5932 = vmatprep.subr.bf16.mxu1 %v6335_v10 }
 0x1f4   :  { %5933 = vmatpush3.bf16.msra.mxu1 %v6335_v10 }
 0x1f5   :  { %611 = vmatpush1.bf16.msra.mxu0 %v6327_v11  ;;  %v6336_v11 = vld [vmem:[%s8379_s4 + $0x90] sm:$0xff]  }
 0x1f6   :  { %612 = vmatprep.subr.bf16.mxu0 %v6332_v12  ;;  %v6337_v12 = vld [vmem:[%s8379_s4 + $0x68] sm:$0xff]  }
 0x1f7   :  { %5934 = vmatprep.subr.bf16.mxu1 %v6337_v12 }
 0x1f8   :  { %5935 = vmatpush3.bf16.msra.mxu1 %v6337_v12 }
 0x1f9   :  { %613 = vmatpush1.bf16.msra.mxu0 %v6330_v13  ;;  %v6338_v13 = vld [vmem:[%s8379_s4 + $0x88] sm:$0xff]   ;;  %5936 = vmatprep.subr.bf16.mxu1 %v6339_v14 }
 0x1fa   :  { %5942 = vmatprep.subr.bf16.mxu0 %v6669_v0 }
 0x1fc   :  { %5490 = vmatmul.mubr.msk.bf16.vlgmr.msra.gmra.mxu0 %vm136_vm2, %v6843_v62  ;;  %5937 = vmatpush3.bf16.msra.mxu1 %v6339_v14  ;;  %v6352_v14 = vld [vmem:[%s8385_s5 + $0x4] ss:$8 sps:$4 sm:$0xff]  }
 0x1fd   :  { %5950 = vmatprep.mubr.msk.bf16.mxu0 %vm6670_vm0, %v6669_v0  ;;  %5943 = vmatpush3.bf16.msra.mxu0 %v6334_v9  ;;  %v6341_v9 = vld [vmem:[%s8385_s5 + $0x30] ss:$8 sps:$4 sm:$0xff]  }
 0x1fe   :  { %5944 = vmatprep.subr.bf16.mxu0 %v6669_v0 }
 0x201   :  { %5945 = vmatpush3.bf16.msra.mxu0 %v6336_v11  ;;  %v6349_v11 = vld [vmem:[%s8385_s5 + $0x14] ss:$8 sps:$4 sm:$0xff]  }
 0x202   :  { %5946 = vmatprep.subr.bf16.mxu0 %v6669_v0 }
 0x205   :  { %5947 = vmatpush3.bf16.msra.mxu0 %v6338_v13  ;;  %v6347_v13 = vld [vmem:[%s8385_s5 + $0x10] ss:$8 sps:$4 sm:$0xff]  }
 0x206   :  { %5948 = vmatprep.subr.bf16.mxu0 %v6669_v0 }
 0x248   :  { %v681_v54 = vpop.xlane.xlu1 %680 }
 0x249   :  { %v685_v56 = vmul.f32 0.015625, %v681_v54 }
 0x24b   :  { %v6952_v59 = vsub.f32 %v6834_v51, %v685_v56  ;;  %v496_v56 = vsub.s32 2, %v6900_v15 }
 0x24d   :  { %v689_v4 = vmul.f32 %v6952_v59, %v6952_v59 }
 0x24f   :  { %v691_v6 = vsel %vm136_vm2, %v689_v4, 0.0 }
 0x29c   :  { %v258_v19 = vpop.f32.mrf.mxu0  ;;  %v6911_v20 = vpop.f32.mrf.mxu1 }
 0x29d   :  { %v267_v21 = vrot.slane %v258_v19, %v6903_v16 }
 0x29e   :  { %v5920_v23 = vpop.f32.mrf.mxu0  ;;  %v6917_v24 = vpop.f32.mrf.mxu1 }
 0x29f   :  { %v268_v25 = vadd.f32 %v267_v21, %v186_v17  ;;  %v269_v26 = vadd.f32 %v267_v21, %v187_v18  ;;  %v6340_v17 = vld [vmem:[%s8379_s4 + $0x80] sm:$0xff]   ;;  %v6343_v18 = vld [vmem:[%s8385_s5 + $0x34] ss:$8 sps:$4 sm:$0xff]  }
 0x2a0   :  { %v261_v27 = vpop.f32.mrf.mxu0  ;;  %v595_v28 = vpop.f32.mrf.mxu1  ;;  %5949 = vmatpush3.bf16.msra.mxu0 %v6340_v17  ;;  %963 = vmatprep.subr.bf16.mxu1 %v6343_v18  ;;  %v6350_v17 = vld [vmem:[%s8385_s5] ss:$8 sps:$4 sm:$0xff]  }
 0x2a1   :  { %v6919_v29 = vadd.f32 %v270_v22, %v268_v25  ;;  %v6921_v32 = vadd.f32 %v270_v22, %v269_v26  ;;  %5962 = vmatprep.subr.bf16.mxu0 %v6669_v0  ;;  %v7003_v22 = vsub.s32 1, %v6900_v15 }
 0x2a2   :  { %v5921_v30 = vpop.f32.mrf.mxu0  ;;  %v596_v31 = vpop.f32.mrf.mxu1 }
 0x2a3   :  { %v639_v33 = vsel %vm136_vm2, %v6919_v29, 0.0  ;;  %v642_v34 = vsel %vm136_vm2, %v6921_v32, 0.0  ;;  %v493_v30 = vrot.slane %v6938_v43, %v7003_v22 }
 0x2a4   :  { %640 = vadd.xlane.f32.xlu0 %v639_v33 }
 0x2a8   :  { %643 = vadd.xlane.f32.xlu0 %v642_v34 }
 0x2ac   :  { %v6927_v35 = vpop.f32.mrf.mxu0 }
 0x2ae   :  { %v6929_v36 = vpop.f32.mrf.mxu0 }
 0x2af   :  { %v553_v39 = vadd.f32 %v6929_v36, %v493_v30  ;;  %v729_v30 = vld [vmem:[%s8381_s7 + $0x5] ss:$0 sm:$0xff] }
 0x2b0   :  { %v554_v37 = vpop.f32.mrf.mxu0 }
 0x2b2   :  { %v555_v38 = vpop.f32.mrf.mxu0 }
 0x2b3   :  { %v500_v38 = vsub.s32 3, %v6900_v15  ;;  %v6449_v15 = vld [vmem:[%s8379_s4 + $0x1d8] sm:$0xff]  }
 0x2bc   :  { %v632_v47 = vpop.f32.mrf.mxu0 }
 0x2bd   :  { %v6947_v48 = vadd.f32 %v632_v47, %v505_v45  ;;  %v489_v45 = vrot.slane %v6938_v43, %v6903_v16  ;;  %v501_v47 = vrot.slane %v6938_v43, %v500_v38 }
 0x2be   :  { %v634_v49 = vpop.f32.mrf.mxu0 }
 0x2bf   :  { %v6949_v50 = vadd.f32 %v634_v49, %v509_v46  ;;  %v666_v49 = vadd.f32 1.0, %v553_v39  ;;  %v594_v36 = vadd.f32 %v6917_v24, %v501_v47 }
 0x2c0   :  { %v636_v52 = vpop.f32.mrf.mxu0 }
 0x2c1   :  { %v705_v4 = vadd.f32 1.0, %v594_v36 }
 0x2c2   :  { %v637_v53 = vpop.f32.mrf.mxu0 }
 0x2c3   :  { %v551_v53 = vadd.f32 %v6927_v35, %v489_v45 }
 0x32d   :  { %v641_v57 = vpop.xlane.xlu0 %640 }
 0x32e   :  { %v646_v58 = vmul.f32 0.015625, %v641_v57 }
 0x330   :  { %v6955_v60 = vsub.f32 %v6919_v29, %v646_v58  ;;  %v676_v58 = vrot.slane %v551_v53, %v6903_v16 }
 0x331   :  { %v644_v61 = vpop.xlane.xlu0 %643 }
 0x332   :  { %v647_v63 = vmul.f32 0.015625, %v644_v61  ;;  %v650_v1 = vmul.f32 %v6955_v60, %v6955_v60 }
 0x334   :  { %v6960_v2 = vsub.f32 %v6921_v32, %v647_v63  ;;  %v652_v3 = vsel %vm136_vm2, %v650_v1, 0.0 }
 0x335   :  { %653 = vadd.xlane.f32.xlu1 %v652_v3  ;;  %v497_v3 = vrot.slane %v6938_v43, %v496_v56 }
 0x336   :  { %v651_v51 = vmul.f32 %v6960_v2, %v6960_v2 }
 0x338   :  { %v655_v5 = vsel %vm136_vm2, %v651_v51, 0.0 }
 0x339   :  { %656 = vadd.xlane.f32.xlu0 %v655_v5  ;;  %692 = vadd.xlane.f32.xlu1 %v691_v6  ;;  %v592_v6 = vadd.f32 %v6911_v20, %v497_v3  ;;  %v6344_v20 = vld [vmem:[%s8385_s5 + $0x20] ss:$8 sps:$4 sm:$0xff]  }
 0x33b   :  { %v715_v10 = vrot.slane %v592_v6, %v6903_v16 }
 0x33d   :  { %683 = vadd.xlane.f32.xlu0 %v682_v7 }
 0x3be   :  { %v654_v19 = vpop.xlane.xlu1 %653 }
 0x3bf   :  { %v658_v21 = vmul.f32 0.015625, %v654_v19 }
 0x3c1   :  { %v660_v23 = vadd.f32 1e-05, %v658_v21 }
 0x3c2   :  { %v657_v25 = vpop.xlane.xlu0 %656  ;;  %v693_v26 = vpop.xlane.xlu1 %692 }
 0x3c3   :  { %6485 = vrsqrt.f32 %v660_v23  ;;  %v659_v27 = vmul.f32 0.015625, %v657_v25  ;;  %v697_v28 = vmul.f32 0.015625, %v693_v26 }
 0x3c5   :  { %v661_v31 = vadd.f32 1e-05, %v659_v27  ;;  %v699_v33 = vadd.f32 1e-05, %v697_v28 }
 0x3c6   :  { %v684_v34 = vpop.xlane.xlu0 %683 }
 0x3c7   :  { %6487 = vrsqrt.f32 %v661_v31  ;;  %v686_v37 = vmul.f32 0.015625, %v684_v34  ;;  %v7083_v34 = vld [vmem:[%s8381_s7 + $0x6] ss:$0 sm:$0xff] }
 0x3c8   :  { %6489 = vrsqrt.f32 %v699_v33 }
 0x3c9   :  { %v688_v41 = vsub.f32 %v6838_v55, %v686_v37  ;;  %v670_v55 = vrot.slane %v666_v49, %v6903_v16 }
 0x3cb   :  { %v690_v46 = vmul.f32 %v688_v41, %v688_v41 }
 0x3cd   :  { %v694_v52 = vsel %vm136_vm2, %v690_v46, 0.0 }
 0x3ce   :  { %695 = vadd.xlane.f32.xlu1 %v694_v52 }
 0x3d0   :  { %v6486_v54 = vpop.eup %6485 }
 0x3d1   :  { %v664_v57 = vmul.f32 %v6486_v54, %v6955_v60  ;;  %v709_v60 = vrot.slane %v705_v4, %v6903_v16 }
 0x3d3   :  { %v671_v61 = vmul.f32 %v670_v55, %v664_v57 }
 0x3d4   :  { %v6488_v63 = vpop.eup %6487 }
 0x3d5   :  { %v6490_v1 = vpop.eup %6489  ;;  %v665_v35 = vmul.f32 %v6488_v63, %v6960_v2  ;;  %v677_v51 = vadd.f32 %v676_v58, %v671_v61  ;;  %v6346_v2 = vld [vmem:[%s8385_s5 + $0x24] ss:$8 sps:$4 sm:$0xff]  }
 0x3d6   :  { %v7027_v24 = vmul.f32 %v6490_v1, %v6952_v59 }
 0x3d7   :  { %v672_v5 = vmul.f32 %v670_v55, %v665_v35 }
 0x3d8   :  { %v710_v43 = vmul.f32 %v709_v60, %v7027_v24 }
 0x3d9   :  { %v678_v7 = vadd.f32 %v676_v58, %v672_v5 }
 0x3da   :  { %v716_v59 = vadd.f32 %v715_v10, %v710_v43 }
 0x3db   :  { %v718_v8 = vpack.c.bf16 %v678_v7, %v677_v51 }
 0x3dc   :  { %v719_v12 = vpack.c.bf16 %v677_v51, %v716_v59 }
 0x3dd   :  { %5938 = vmatprep.mubr.msk.bf16.mxu1 %vm136_vm2, %v718_v8  ;;  %5951 = vmatmul.mubr.msk.bf16.vlgmr.msra.gmra.mxu0 %vm136_vm2, %v718_v8 }
 0x3de   :  { %5939 = vmatmul.mubr.msk.bf16.vlgmr.msra.gmra.mxu1 %vm136_vm2, %v718_v8  ;;  %5954 = vmatprep.mubr.msk.bf16.mxu0 %vm6670_vm0, %v6669_v0 }
 0x3df   :  { %964 = vmatpush1.bf16.msra.mxu1 %v6341_v9  ;;  %987 = vmatprep.mubr.bf16.mxu1 %v6671_v40 }
 0x3e0   :  { %965 = vmatprep.subr.bf16.mxu1 %v6346_v2 }
 0x3e3   :  { %966 = vmatpush1.bf16.msra.mxu1 %v6344_v20 }
 0x3e4   :  { %967 = vmatprep.subr.bf16.mxu1 %v6349_v11 }
 0x3e5   :  { %5955 = vmatmul.mubr.msk.bf16.gmra.mxu0 %vm136_vm2, %v719_v12 }
 0x3e6   :  { %5958 = vmatprep.mubr.msk.bf16.mxu0 %vm6670_vm0, %v6669_v0 }
 0x3e7   :  { %968 = vmatpush1.bf16.msra.mxu1 %v6347_v13 }
 0x3e8   :  { %969 = vmatprep.subr.bf16.mxu1 %v6352_v14 }
 0x3eb   :  { %970 = vmatpush1.bf16.msra.mxu1 %v6350_v17 }
 0x3ec   :  { %5970 = vmatprep.subr.bf16.mxu1 %v6669_v0 }
 0x3ee   :  { %5512 = vmatmul.mubr.msk.bf16.vlgmr.msra.gmra.mxu1 %vm136_vm2, %v718_v8 }
 0x3ef   :  { %997 = vmatprep.mubr.bf16.mxu1 %v6671_v40 }
 0x3f6   :  { %5513 = vmatmul.mubr.msk.bf16.gmra.mxu1 %vm136_vm2, %v719_v12 }
 0x3f7   :  { %1007 = vmatprep.mubr.bf16.mxu1 %v6671_v40 }
 0x457   :  { %v696_v18 = vpop.xlane.xlu1 %695 }
 0x458   :  { %v698_v19 = vmul.f32 0.015625, %v696_v18 }
 0x45a   :  { %v700_v21 = vadd.f32 1e-05, %v698_v19 }
 0x45c   :  { %6491 = vrsqrt.f32 %v700_v21 }
 0x469   :  { %v6492_v23 = vpop.eup %6491 }
 0x46a   :  { %v7068_v25 = vmul.f32 %v6492_v23, %v688_v41 }
 0x46c   :  { %v711_v26 = vmul.f32 %v709_v60, %v7068_v25 }
 0x46e   :  { %v717_v27 = vadd.f32 %v715_v10, %v711_v26 }
 0x470   :  { %v720_v28 = vpack.c.bf16 %v717_v27, %v678_v7 }
 0x472   :  { %5959 = vmatmul.mubr.msk.bf16.gmra.mxu0 %vm136_vm2, %v720_v28  ;;  %5514 = vmatmul.mubr.msk.bf16.gmra.mxu1 %vm136_vm2, %v720_v28 }
 0x473   :  { %5966 = vmatprep.mubr.msk.bf16.mxu0 %vm6670_vm0, %v6669_v0  ;;  %5974 = vmatprep.mubr.msk.bf16.mxu1 %vm6670_vm0, %v6669_v0 }
 0x49d   :  { %v881_v31 = vpop.f32.mrf.mxu0 }
 0x49e   :  { %v5940_v33 = vpop.f32.mrf.mxu1  ;;  %v882_v46 = vadd.f32 %v881_v31, %v7083_v34 }
 0x49f   :  { %v800_v37 = vadd.f32 %v5940_v33, %v729_v30  ;;  %v5952_v39 = vpop.f32.mrf.mxu0 }
 0x4a0   :  { %v791_v41 = vpop.f32.mrf.mxu1 }
 0x4a1   :  { %v884_v45 = vpop.f32.mrf.mxu0  ;;  %v792_v55 = vadd.f32 %v791_v41, %v729_v30 }
 0x4a2   :  { %v885_v47 = vadd.f32 %v884_v45, %v7083_v34  ;;  %v5941_v49 = vpop.f32.mrf.mxu1 }
 0x4a3   :  { %v803_v52 = vadd.f32 %v5941_v49, %v729_v30  ;;  %v5953_v53 = vpop.f32.mrf.mxu0 }
 0x4a4   :  { %v7087_v54 = vpack.c.bf16 %v885_v47, %v882_v46  ;;  %v794_v36 = vpop.f32.mrf.mxu1 }
 0x4a5   :  { %v7089_v57 = vpack.c.bf16 %v803_v52, %v800_v37  ;;  %v795_v58 = vadd.f32 %v794_v36, %v729_v30  ;;  %v889_v61 = vpop.f32.mrf.mxu0 }
 0x4a6   :  { %1106 = vrot.lane.b32.xlu1 %v7087_v54, %s6672_s21  ;;  %v890_v4 = vadd.f32 %v889_v61, %v7083_v34  ;;  %v1029_v60 = vsel %vm1024_vm3, %v7087_v54, 0 }
 0x4a7   :  { %v7093_v63 = vpack.c.bf16 %v795_v58, %v792_v55  ;;  %v5956_v1 = vpop.f32.mrf.mxu0 }
 0x4a9   :  { %v892_v3 = vpop.f32.mrf.mxu0 }
 0x4aa   :  { %v893_v35 = vadd.f32 %v892_v3, %v7083_v34  ;;  %1102 = vrot.lane.b32.xlu1 %v7093_v63, %s6672_s21 }
 0x4ab   :  { %v5957_v51 = vpop.f32.mrf.mxu0 }
 0x4ac   :  { %v7099_v5 = vpack.c.bf16 %v893_v35, %v890_v4 }
 0x4ae   :  { %1108 = vrot.lane.b32.xlu0 %v7099_v5, %s6672_s21  ;;  %v1032_v6 = vsel %vm1024_vm3, %v7099_v5, 0  ;;  %v989_v7 = vpop.f32.mrf.mxu1 }
 0x4af   :  { %5963 = vmatpush3.bf16.xpose.msra.mxu0 %v1032_v6 }
 0x4b0   :  { %5964 = vmatprep.subr.bf16.mxu0 %v6669_v0  ;;  %v7113_v8 = vpop.f32.mrf.mxu1 }
 0x4b2   :  { %v993_v9 = vpop.f32.mrf.mxu1 }
 0x4b3   :  { %v1018_v26 = vpack.c.bf16 %v993_v9, %v989_v7 }
 0x4b4   :  { %v7115_v43 = vpop.f32.mrf.mxu1 }
 0x4b6   :  { %v999_v20 = vpop.f32.mrf.mxu1 }
 0x4b7   :  { %5965 = vmatpush3.bf16.xpose.msra.mxu0 %v1029_v60 }
 0x4b8   :  { %5978 = vmatprep.subr.bf16.mxu0 %v6669_v0  ;;  %v7119_v59 = vpop.f32.mrf.mxu1 }
 0x4ba   :  { %v1003_v13 = vpop.f32.mrf.mxu1 }
 0x4bb   :  { %v7123_v14 = vpack.c.bf16 %v1003_v13, %v999_v20 }
 0x4bc   :  { %v7125_v17 = vpop.f32.mrf.mxu1 }
 0x4bd   :  { %v1244_v19 = vsel %vm1195_vm4, %v7123_v14, 0 }
 0x4be   :  { %5967 = vmatmul.mubr.msk.bf16.vlgmr.msra.gmra.mxu0 %vm1024_vm3, %v7093_v63 }
 0x4bf   :  { %5982 = vmatprep.mubr.msk.bf16.mxu0 %vm6670_vm0, %v6669_v0 }
 0x518   :  { %v1107_v11 = vpop.permute.xlu1 %1106 }
 0x519   :  { %v1114_v12 = vsel %vm1024_vm3, %v1107_v11, 0 }
 0x51c   :  { %v1103_v18 = vpop.permute.xlu1 %1102 }
 0x520   :  { %v1109_v2 = vpop.permute.xlu0 %1108 }
 0x521   :  { %v1117_v10 = vsel %vm1024_vm3, %v1109_v2, 0 }
 0x522   :  { %5971 = vmatpush3.bf16.xpose.msra.mxu1 %v1117_v10 }
 0x523   :  { %5972 = vmatprep.subr.bf16.mxu1 %v6669_v0 }
 0x52a   :  { %5973 = vmatpush3.bf16.xpose.msra.mxu1 %v1114_v12 }
 0x52b   :  { %5986 = vmatprep.subr.bf16.mxu1 %v6669_v0 }
 0x531   :  { %5975 = vmatmul.mubr.msk.bf16.vlgmr.msra.gmra.mxu1 %vm1024_vm3, %v1103_v18 }
 0x532   :  { %v897_v21 = vpop.f32.mrf.mxu0  ;;  %v7130_v23 = vpop.f32.mrf.mxu1  ;;  %5987 = vmatpush3.bf16.msra.mxu1 %v1244_v19  ;;  %5990 = vmatprep.mubr.msk.bf16.mxu1 %vm6670_vm0, %v6669_v0 }
 0x533   :  { %5988 = vmatprep.subr.bf16.mxu1 %v6669_v0  ;;  %v7140_v33 = vadd.f32 %v897_v21, %v7083_v34 }
 0x534   :  { %v5960_v27 = vpop.f32.mrf.mxu0  ;;  %v7135_v28 = vpop.f32.mrf.mxu1 }
 0x536   :  { %v900_v30 = vpop.f32.mrf.mxu0  ;;  %v7137_v31 = vpop.f32.mrf.mxu1  ;;  %5989 = vmatpush3.bf16.msra.mxu1 %v1018_v26 }
 0x537   :  { %v7143_v37 = vadd.f32 %v900_v30, %v7083_v34  ;;  %v1022_v39 = vpack.c.bf16 %v7137_v31, %v7130_v23  ;;  %6002 = vmatprep.subr.bf16.mxu1 %v6669_v0 }
 0x538   :  { %v5961_v41 = vpop.f32.mrf.mxu0  ;;  %v7150_v53 = vpop.f32.mrf.mxu1 }
 0x539   :  { %v906_v45 = vpack.c.bf16 %v7143_v37, %v7140_v33 }
 0x57e   :  { %v1068_v46 = vpop.f32.mrf.mxu0 }
 0x580   :  { %v5968_v47 = vpop.f32.mrf.mxu0 }
 0x582   :  { %v1071_v49 = vpop.f32.mrf.mxu0 }
 0x583   :  { %v1076_v35 = vmul.f32 0.25, %v1071_v49 }
 0x584   :  { %v5969_v52 = vpop.f32.mrf.mxu0 }
 0x585   :  { %v1081_v51 = vsel %vm1077_vm5, %v1076_v35, -inf  ;;  %v1075_v52 = vmul.f32 0.25, %v1068_v46 }
 0x5f1   :  { %v1153_v36 = vpop.f32.mrf.mxu1 }
 0x5f2   :  { %v1160_v55 = vmul.f32 0.25, %v1153_v36  ;;  %v1078_v36 = vsel %vm1077_vm5, %v1075_v52, -inf }
 0x5f3   :  { %v5976_v58 = vpop.f32.mrf.mxu1 }
 0x5f4   :  { %v1162_v34 = vsel %vm1077_vm5, %v1160_v55, -inf }
 0x5f5   :  { %1163 = vmax.xlane.f32.xlu1 %v1162_v34  ;;  %v1156_v61 = vpop.f32.mrf.mxu1 }
 0x5f6   :  { %v1161_v1 = vmul.f32 0.25, %v1156_v61 }
 0x5f7   :  { %v5977_v3 = vpop.f32.mrf.mxu1 }
 0x5f8   :  { %v1165_v4 = vsel %vm1077_vm5, %v1161_v1, -inf }
 0x5f9   :  { %1166 = vmax.xlane.f32.xlu0 %v1165_v4 }
 0x606   :  { %1189 = vrot.lane.b32.xlu1 %v7123_v14, %s6673_s22 }
 0x60a   :  { %1291 = vrot.lane.b32.xlu1 %v7099_v5, %s6674_s23 }
 0x60e   :  { %1289 = vrot.lane.b32.xlu1 %v7087_v54, %s6674_s23 }
 0x612   :  { %1287 = vrot.lane.b32.xlu1 %v7093_v63, %s6674_s23 }
 0x636   :  { %1082 = vmax.xlane.f32.xlu1 %v1081_v51 }
 0x67e   :  { %v1164_v6 = vpop.xlane.xlu1 %1163 }
 0x67f   :  { %v1168_v60 = vsub.f32 %v1160_v55, %v1164_v6 }
 0x681   :  { %v1170_v7 = vmul.f32 1.442695, %v1168_v60 }
 0x682   :  { %v1190_v9 = vpop.permute.xlu1 %1189  ;;  %v1167_v2 = vpop.xlane.xlu0 %1166 }
 0x683   :  { %6493 = vpow2.f32 %v1170_v7  ;;  %v1197_v10 = vsel %vm1195_vm4, %v1190_v9, 0  ;;  %v1169_v20 = vsub.f32 %v1161_v1, %v1167_v2 }
 0x684   :  { %5979 = vmatpush3.bf16.msra.mxu0 %v1197_v10 }
 0x685   :  { %v1172_v11 = vmul.f32 1.442695, %v1169_v20  ;;  %5980 = vmatprep.subr.bf16.mxu0 %v6669_v0 }
 0x686   :  { %v1292_v21 = vpop.permute.xlu1 %1291 }
 0x687   :  { %6495 = vpow2.f32 %v1172_v11  ;;  %v1300_v51 = vsel %vm1024_vm3, %v1292_v21, 0 }
 0x68a   :  { %v1290_v27 = vpop.permute.xlu1 %1289 }
 0x68b   :  { %v1297_v6 = vsel %vm1024_vm3, %v1290_v27, 0 }
 0x68e   :  { %v1288_v30 = vpop.permute.xlu1 %1287 }
 0x690   :  { %v6494_v12 = vpop.eup %6493 }
 0x691   :  { %v1174_v13 = vsel %vm1077_vm5, %v6494_v12, 0.0 }
 0x692   :  { %1175 = vadd.xlane.f32.xlu0 %v1174_v13 }
 0x694   :  { %v6496_v18 = vpop.eup %6495 }
 0x695   :  { %v1177_v19 = vsel %vm1077_vm5, %v6496_v18, 0.0 }
 0x696   :  { %1178 = vadd.xlane.f32.xlu0 %v1177_v19 }
 0x6ac   :  { %1187 = vrot.lane.b32.xlu0 %v1018_v26, %s6673_s22 }
 0x6bf   :  { %v1083_v41 = vpop.xlane.xlu1 %1082 }
 0x6c0   :  { %v1085_v47 = vsub.f32 %v1076_v35, %v1083_v41 }
 0x6c2   :  { %v1088_v49 = vmul.f32 1.442695, %v1085_v47 }
 0x6c4   :  { %6497 = vpow2.f32 %v1088_v49 }
 0x6cb   :  { %1079 = vmax.xlane.f32.xlu0 %v1078_v36 }
 0x6d1   :  { %v7169_v55 = vpop.eup %6497 }
 0x6d2   :  { %v1093_v58 = vsel %vm1077_vm5, %v7169_v55, 0.0 }
 0x6d3   :  { %1094 = vadd.xlane.f32.xlu1 %v1093_v58 }
 0x71b   :  { %v1176_v34 = vpop.xlane.xlu0 %1175 }
 0x71c   :  { %6499 = vrcp.f32 %v1176_v34 }
 0x71f   :  { %v1179_v26 = vpop.xlane.xlu0 %1178 }
 0x720   :  { %6501 = vrcp.f32 %v1179_v26 }
 0x723   :  { %v1188_v61 = vpop.permute.xlu0 %1187 }
 0x724   :  { %5981 = vmatpush3.bf16.msra.mxu0 %v1188_v61 }
 0x725   :  { %5994 = vmatprep.subr.bf16.mxu0 %v6669_v0 }
 0x729   :  { %v6500_v1 = vpop.eup %6499 }
 0x72a   :  { %v1182_v46 = vmul.f32 %v6500_v1, %v6494_v12 }
 0x72d   :  { %v6502_v3 = vpop.eup %6501 }
 0x72e   :  { %v1183_v4 = vmul.f32 %v6502_v3, %v6496_v18 }
 0x730   :  { %v1184_v35 = vpack.c.bf16 %v1183_v4, %v1182_v46 }
 0x732   :  { %5983 = vmatmul.mubr.msk.bf16.vlgmr.msra.gmra.mxu0 %vm1077_vm5, %v1184_v35 }
 0x733   :  { %5995 = vmatpush3.bf16.xpose.msra.mxu0 %v1300_v51  ;;  %5998 = vmatprep.mubr.msk.bf16.mxu0 %vm6670_vm0, %v6669_v0 }
 0x734   :  { %5996 = vmatprep.subr.bf16.mxu0 %v6669_v0 }
 0x73b   :  { %5997 = vmatpush3.bf16.xpose.msra.mxu0 %v1297_v6 }
 0x73c   :  { %6018 = vmatprep.subr.bf16.mxu0 %v6669_v0 }
 0x742   :  { %5999 = vmatmul.mubr.msk.bf16.vlgmr.msra.gmra.mxu0 %vm1024_vm3, %v1288_v30 }
 0x743   :  { %6022 = vmatprep.mubr.msk.bf16.mxu0 %vm6670_vm0, %v6669_v0 }
 0x754   :  { %v1080_v60 = vpop.xlane.xlu0 %1079 }
 0x755   :  { %v1084_v2 = vsub.f32 %v1075_v52, %v1080_v60 }
 0x757   :  { %v1086_v11 = vmul.f32 1.442695, %v1084_v2 }
 0x759   :  { %6503 = vpow2.f32 %v1086_v11 }
 0x75c   :  { %v1095_v26 = vpop.xlane.xlu1 %1094 }
 0x766   :  { %v6504_v47 = vpop.eup %6503 }
 0x767   :  { %v1090_v49 = vsel %vm1077_vm5, %v6504_v47, 0.0 }
 0x7f2   :  { %v7184_v7 = vpop.f32.mrf.mxu0 }
 0x7f4   :  { %v5984_v9 = vpop.f32.mrf.mxu0 }
 0x7f5   :  { %v7195_v9 = vpack.c.bf16 %v7125_v17, %v7119_v59  ;;  %v7206_v59 = vpack.c.bf16 %v7115_v43, %v7113_v8  ;;  %v7213_v17 = vrot.slane %v906_v45, 4 }
 0x7f6   :  { %v7186_v10 = vpop.f32.mrf.mxu0 }
 0x7f8   :  { %v5985_v20 = vpop.f32.mrf.mxu0 }
 0x802   :  { %v1336_v12 = vpop.f32.mrf.mxu0 }
 0x803   :  { %v1343_v13 = vmul.f32 0.25, %v1336_v12  ;;  %v1372_v12 = vsel %vm1195_vm4, %v7195_v9, 0 }
 0x804   :  { %v6000_v18 = vpop.f32.mrf.mxu0 }
 0x805   :  { %v1345_v19 = vsel %vm1077_vm5, %v1343_v13, -inf }
 0x806   :  { %1346 = vmax.xlane.f32.xlu0 %v1345_v19  ;;  %v1339_v21 = vpop.f32.mrf.mxu0 }
 0x807   :  { %v1344_v27 = vmul.f32 0.25, %v1339_v21 }
 0x808   :  { %v6001_v30 = vpop.f32.mrf.mxu0 }
 0x809   :  { %v1348_v41 = vsel %vm1077_vm5, %v1344_v27, -inf }
 0x80a   :  { %1349 = vmax.xlane.f32.xlu0 %v1348_v41 }
 0x80e   :  { %1091 = vadd.xlane.f32.xlu0 %v1090_v49 }
 0x88f   :  { %v1347_v52 = vpop.xlane.xlu0 %1346 }
 0x890   :  { %v1351_v36 = vsub.f32 %v1343_v13, %v1347_v52  ;;  %v1718_v52 = vrot.slane %v1022_v39, 4 }
 0x892   :  { %v1353_v58 = vmul.f32 1.442695, %v1351_v36 }
 0x893   :  { %v1350_v34 = vpop.xlane.xlu0 %1349 }
 0x894   :  { %6505 = vpow2.f32 %v1353_v58  ;;  %v1352_v61 = vsub.f32 %v1344_v27, %v1350_v34  ;;  %v1777_v58 = vsel %vm1195_vm4, %v1718_v52, 0  ;;  %v1717_v34 = vrot.slane %v7123_v14, 4 }
 0x895   :  { %6507 = vrcp.f32 %v1095_v26 }
 0x896   :  { %v1355_v1 = vmul.f32 1.442695, %v1352_v61  ;;  %v7256_v26 = vsel %vm1195_vm4, %v1717_v34, %v1718_v52 }
 0x897   :  { %v1092_v3 = vpop.xlane.xlu0 %1091 }
 0x898   :  { %6509 = vpow2.f32 %v1355_v1 }
 0x899   :  { %6511 = vrcp.f32 %v1092_v3 }
 0x8a1   :  { %v6506_v46 = vpop.eup %6505 }
 0x8a2   :  { %v1357_v4 = vsel %vm1077_vm5, %v6506_v46, 0.0  ;;  %v6508_v35 = vpop.eup %6507 }
 0x8a3   :  { %1358 = vadd.xlane.f32.xlu0 %v1357_v4  ;;  %v1099_v20 = vmul.f32 %v6508_v35, %v7169_v55  ;;  %v1556_v55 = vrot.slane %v7099_v5, 4 }
 0x8a5   :  { %v6510_v51 = vpop.eup %6509  ;;  %v7224_v8 = vsel %vm1195_vm4, %v1556_v55, %v7213_v17 }
 0x8a6   :  { %v6512_v6 = vpop.eup %6511  ;;  %v1360_v60 = vsel %vm1077_vm5, %v6510_v51, 0.0 }
 0x8a7   :  { %1361 = vadd.xlane.f32.xlu1 %v1360_v60  ;;  %v1098_v2 = vmul.f32 %v6512_v6, %v6504_v47 }
 0x8a9   :  { %v1100_v11 = vpack.c.bf16 %v1099_v20, %v1098_v2 }
 0x8ab   :  { %5991 = vmatmul.mubr.msk.bf16.vlgmr.msra.gmra.mxu1 %vm1077_vm5, %v1100_v11 }
 0x8ac   :  { %6003 = vmatpush3.bf16.msra.mxu1 %v1372_v12  ;;  %6006 = vmatprep.mubr.msk.bf16.mxu1 %vm6670_vm0, %v6669_v0 }
 0x8ad   :  { %6004 = vmatprep.subr.bf16.mxu1 %v6669_v0 }
 0x8b0   :  { %6005 = vmatpush3.bf16.msra.mxu1 %v7206_v59 }
 0x8b1   :  { %6010 = vmatprep.subr.bf16.mxu1 %v6669_v0 }
 0x8b8   :  { %1419 = vrot.lane.b32.xlu1 %v7087_v54, %s6675_s24 }
 0x8b9   :  { %1421 = vrot.lane.b32.xlu0 %v7099_v5, %s6675_s24 }
 0x8bc   :  { %1417 = vrot.lane.b32.xlu1 %v7093_v63, %s6675_s24 }
 0x8bd   :  { %1637 = vrot.lane.b32.xlu0 %v7224_v8, %s6672_s21 }
 0x8c0   :  { %1639 = vrot.lane.b32.xlu1 %v7213_v17, %s6672_s21 }
 0x8c4   :  { %1635 = vrot.lane.b32.xlu1 %v7089_v57, %s6672_s21 }
 0x92c   :  { %v1359_v54 = vpop.xlane.xlu0 %1358 }
 0x92d   :  { %6513 = vrcp.f32 %v1359_v54 }
 0x930   :  { %v1362_v43 = vpop.xlane.xlu1 %1361  ;;  %v1422_v45 = vpop.permute.xlu0 %1421 }
 0x931   :  { %6515 = vrcp.f32 %v1362_v43  ;;  %v1430_v18 = vsel %vm1024_vm3, %v1422_v45, 0 }
 0x934   :  { %v1420_v19 = vpop.permute.xlu1 %1419  ;;  %v1638_v47 = vpop.permute.xlu0 %1637 }
 0x935   :  { %v1427_v27 = vsel %vm1024_vm3, %v1420_v19, 0  ;;  %v1645_v49 = vsel %vm1024_vm3, %v1638_v47, 0 }
 0x938   :  { %v1418_v21 = vpop.permute.xlu1 %1417 }
 0x93a   :  { %v6514_v5 = vpop.eup %6513 }
 0x93b   :  { %v1365_v63 = vmul.f32 %v6514_v5, %v6506_v46 }
 0x93c   :  { %v1640_v30 = vpop.permute.xlu1 %1639 }
 0x93d   :  { %v1648_v41 = vsel %vm1024_vm3, %v1640_v30, 0 }
 0x93e   :  { %v6516_v33 = vpop.eup %6515 }
 0x93f   :  { %v1366_v37 = vmul.f32 %v6516_v33, %v6510_v51 }
 0x940   :  { %v1636_v36 = vpop.permute.xlu1 %1635 }
 0x941   :  { %v1367_v13 = vpack.c.bf16 %v1366_v37, %v1365_v63 }
 0x943   :  { %6007 = vmatmul.mubr.msk.bf16.vlgmr.msra.gmra.mxu1 %vm1077_vm5, %v1367_v13 }
 0x944   :  { %6011 = vmatpush3.bf16.xpose.msra.mxu1 %v1430_v18  ;;  %6014 = vmatprep.mubr.msk.bf16.mxu1 %vm6670_vm0, %v6669_v0 }
 0x945   :  { %6012 = vmatprep.subr.bf16.mxu1 %v6669_v0 }
 0x94c   :  { %6013 = vmatpush3.bf16.xpose.msra.mxu1 %v1427_v27 }
 0x94d   :  { %6034 = vmatprep.subr.bf16.mxu1 %v6669_v0 }
 0x953   :  { %6015 = vmatmul.mubr.msk.bf16.vlgmr.msra.gmra.mxu1 %vm1024_vm3, %v1418_v21 }
 0x954   :  { %6035 = vmatpush3.bf16.xpose.msra.mxu1 %v1648_v41  ;;  %6038 = vmatprep.mubr.msk.bf16.mxu1 %vm6670_vm0, %v6669_v0 }
 0x955   :  { %6036 = vmatprep.subr.bf16.mxu1 %v6669_v0 }
 0x95c   :  { %6037 = vmatpush3.bf16.xpose.msra.mxu1 %v1645_v49 }
 0x95d   :  { %6050 = vmatprep.subr.bf16.mxu1 %v6669_v0 }
 0x963   :  { %6039 = vmatmul.mubr.msk.bf16.vlgmr.msra.gmra.mxu1 %vm1024_vm3, %v1636_v36 }
 0x964   :  { %6051 = vmatpush3.bf16.msra.mxu1 %v1777_v58  ;;  %6054 = vmatprep.mubr.msk.bf16.mxu1 %vm6670_vm0, %v6669_v0 }
 0x965   :  { %6052 = vmatprep.subr.bf16.mxu1 %v6669_v0 }
 0x968   :  { %6053 = vmatpush3.bf16.msra.mxu1 %v7256_v26 }
 0x969   :  { %6066 = vmatprep.subr.bf16.mxu1 %v6669_v0 }
 0x96b   :  { %v1280_v23 = vpop.f32.mrf.mxu1 }
 0x96c   :  { %v1281_v1 = vadd.f32 %v1280_v23, %v7184_v7 }
 0x96d   :  { %v5992_v31 = vpop.f32.mrf.mxu1 }
 0x96f   :  { %v1283_v39 = vpop.f32.mrf.mxu1 }
 0x970   :  { %v1284_v14 = vadd.f32 %v1283_v39, %v7186_v10 }
 0x971   :  { %v5993_v61 = vpop.f32.mrf.mxu1 }
 0xa03   :  { %v1408_v3 = vpop.f32.mrf.mxu1 }
 0xa04   :  { %v7261_v46 = vadd.f32 %v1408_v3, %v1281_v1 }
 0xa05   :  { %v6008_v4 = vpop.f32.mrf.mxu1 }
 0xa07   :  { %v1411_v35 = vpop.f32.mrf.mxu1 }
 0xa08   :  { %v7264_v51 = vadd.f32 %v1411_v35, %v1284_v14 }
 0xa09   :  { %v6009_v6 = vpop.f32.mrf.mxu1 }
 0xa13   :  { %v1466_v60 = vpop.f32.mrf.mxu1 }
 0xa14   :  { %v1473_v2 = vmul.f32 0.25, %v1466_v60 }
 0xa15   :  { %v6016_v20 = vpop.f32.mrf.mxu1 }
 0xa16   :  { %v1475_v11 = vsel %vm1077_vm5, %v1473_v2, -inf }
 0xa17   :  { %1476 = vmax.xlane.f32.xlu0 %v1475_v11  ;;  %v1469_v12 = vpop.f32.mrf.mxu1 }
 0xa18   :  { %v1474_v55 = vmul.f32 0.25, %v1469_v12 }
 0xa19   :  { %v6017_v54 = vpop.f32.mrf.mxu1 }
 0xa1a   :  { %v1478_v7 = vsel %vm1077_vm5, %v1474_v55, -inf  ;;  %v1566_v54 = vsel %vm1024_vm3, %v7213_v17, 0 }
 0xa1b   :  { %1479 = vmax.xlane.f32.xlu1 %v1478_v7  ;;  %v1563_v7 = vsel %vm1024_vm3, %v7224_v8, 0 }
 0xa23   :  { %v1684_v43 = vpop.f32.mrf.mxu1 }
 0xa24   :  { %v1691_v5 = vmul.f32 0.25, %v1684_v43 }
 0xa25   :  { %v6040_v33 = vpop.f32.mrf.mxu1 }
 0xa26   :  { %v1693_v10 = vsel %vm1077_vm5, %v1691_v5, -inf }
 0xa27   :  { %1694 = vmax.xlane.f32.xlu0 %v1693_v10  ;;  %v1687_v63 = vpop.f32.mrf.mxu1 }
 0xa28   :  { %v1692_v37 = vmul.f32 0.25, %v1687_v63 }
 0xa29   :  { %v6041_v45 = vpop.f32.mrf.mxu1 }
 0xa2a   :  { %v1696_v13 = vsel %vm1077_vm5, %v1692_v37, -inf }
 0xa2b   :  { %1697 = vmax.xlane.f32.xlu0 %v1696_v13 }
 0xaa0   :  { %v1477_v18 = vpop.xlane.xlu0 %1476 }
 0xaa1   :  { %v1481_v19 = vsub.f32 %v1473_v2, %v1477_v18 }
 0xaa3   :  { %v1483_v21 = vmul.f32 1.442695, %v1481_v19 }
 0xaa4   :  { %v1480_v27 = vpop.xlane.xlu1 %1479 }
 0xaa5   :  { %6517 = vpow2.f32 %v1483_v21  ;;  %v1482_v30 = vsub.f32 %v1474_v55, %v1480_v27 }
 0xaa7   :  { %v1485_v41 = vmul.f32 1.442695, %v1482_v30 }
 0xaa9   :  { %6519 = vpow2.f32 %v1485_v41 }
 0xab0   :  { %v1695_v34 = vpop.xlane.xlu0 %1694 }
 0xab1   :  { %v1699_v23 = vsub.f32 %v1691_v5, %v1695_v34 }
 0xab2   :  { %v6518_v47 = vpop.eup %6517 }
 0xab3   :  { %v1487_v49 = vsel %vm1077_vm5, %v6518_v47, 0.0  ;;  %v1701_v39 = vmul.f32 1.442695, %v1699_v23 }
 0xab4   :  { %1488 = vadd.xlane.f32.xlu0 %v1487_v49  ;;  %v1698_v31 = vpop.xlane.xlu0 %1697 }
 0xab5   :  { %v1700_v61 = vsub.f32 %v1692_v37, %v1698_v31  ;;  %6521 = vpow2.f32 %v1701_v39 }
 0xab6   :  { %v6520_v36 = vpop.eup %6519 }
 0xab7   :  { %v1490_v58 = vsel %vm1077_vm5, %v6520_v36, 0.0  ;;  %v1703_v1 = vmul.f32 1.442695, %v1700_v61 }
 0xab8   :  { %1491 = vadd.xlane.f32.xlu1 %v1490_v58 }
 0xab9   :  { %6523 = vpow2.f32 %v1703_v1 }
 0xac9   :  { %1500 = vrot.lane.b32.xlu1 %v7206_v59, %s6673_s22  ;;  %v6522_v59 = vpop.eup %6521 }
 0xaca   :  { %1502 = vrot.lane.b32.xlu0 %v7195_v9, %s6673_s22  ;;  %v1705_v3 = vsel %vm1077_vm5, %v6522_v59, 0.0  ;;  %v6524_v4 = vpop.eup %6523 }
 0xace   :  { %1722 = vrot.lane.b32.xlu0 %v1718_v52, %s6673_s22  ;;  %v1708_v52 = vsel %vm1077_vm5, %v6524_v4, 0.0 }
 0xad2   :  { %1824 = vrot.lane.b32.xlu0 %v7213_v17, %s6674_s23 }
 0xad6   :  { %1820 = vrot.lane.b32.xlu0 %v7089_v57, %s6674_s23 }
 0xaed   :  { %1706 = vadd.xlane.f32.xlu1 %v1705_v3 }
 0xaf1   :  { %1709 = vadd.xlane.f32.xlu1 %v1708_v52 }
 0xb02   :  { %1720 = vrot.lane.b32.xlu1 %v7256_v26, %s6673_s22 }
 0xb06   :  { %1822 = vrot.lane.b32.xlu1 %v7224_v8, %s6674_s23 }
 0xb3d   :  { %v1489_v14 = vpop.xlane.xlu0 %1488 }
 0xb3e   :  { %6525 = vrcp.f32 %v1489_v14 }
 0xb41   :  { %v1492_v35 = vpop.xlane.xlu1 %1491  ;;  %v1503_v6 = vpop.permute.xlu0 %1502 }
 0xb42   :  { %6527 = vrcp.f32 %v1492_v35  ;;  %v1509_v60 = vsel %vm1195_vm4, %v1503_v6, 0 }
 0xb43   :  { %6019 = vmatpush3.bf16.msra.mxu0 %v1509_v60 }
 0xb44   :  { %6020 = vmatprep.subr.bf16.mxu0 %v6669_v0 }
 0xb45   :  { %v1501_v2 = vpop.permute.xlu1 %1500  ;;  %v1723_v43 = vpop.permute.xlu0 %1722 }
 0xb46   :  { %v1729_v5 = vsel %vm1195_vm4, %v1723_v43, 0 }
 0xb47   :  { %6021 = vmatpush3.bf16.msra.mxu0 %v1501_v2 }
 0xb48   :  { %6026 = vmatprep.subr.bf16.mxu0 %v6669_v0 }
 0xb49   :  { %v1825_v19 = vpop.permute.xlu0 %1824 }
 0xb4a   :  { %v1833_v27 = vsel %vm1024_vm3, %v1825_v19, 0 }
 0xb4b   :  { %v6526_v20 = vpop.eup %6525 }
 0xb4c   :  { %v1495_v26 = vmul.f32 %v6526_v20, %v6518_v47 }
 0xb4d   :  { %v1821_v47 = vpop.permute.xlu0 %1820 }
 0xb4f   :  { %v6528_v11 = vpop.eup %6527 }
 0xb50   :  { %v1496_v12 = vmul.f32 %v6528_v11, %v6520_v36 }
 0xb52   :  { %v1497_v55 = vpack.c.bf16 %v1496_v12, %v1495_v26 }
 0xb54   :  { %6023 = vmatmul.mubr.msk.bf16.vlgmr.msra.gmra.mxu0 %vm1077_vm5, %v1497_v55 }
 0xb55   :  { %6027 = vmatpush3.bf16.xpose.msra.mxu0 %v1566_v54  ;;  %6030 = vmatprep.mubr.msk.bf16.mxu0 %vm6670_vm0, %v6669_v0 }
 0xb56   :  { %6028 = vmatprep.subr.bf16.mxu0 %v6669_v0 }
 0xb5d   :  { %6029 = vmatpush3.bf16.xpose.msra.mxu0 %v1563_v7 }
 0xb5e   :  { %6042 = vmatprep.subr.bf16.mxu0 %v6669_v0 }
 0xb64   :  { %6031 = vmatmul.mubr.msk.bf16.vlgmr.msra.gmra.mxu0 %vm1024_vm3, %v7089_v57 }
 0xb65   :  { %6043 = vmatpush3.bf16.msra.mxu0 %v1729_v5  ;;  %6046 = vmatprep.mubr.msk.bf16.mxu0 %vm6670_vm0, %v6669_v0 }
 0xb66   :  { %6044 = vmatprep.subr.bf16.mxu0 %v6669_v0 }
 0xb76   :  { %v1707_v33 = vpop.xlane.xlu1 %1706 }
 0xb77   :  { %6529 = vrcp.f32 %v1707_v33 }
 0xb7a   :  { %v1710_v10 = vpop.xlane.xlu1 %1709 }
 0xb7b   :  { %6531 = vrcp.f32 %v1710_v10 }
 0xb7e   :  { %v1721_v63 = vpop.permute.xlu1 %1720 }
 0xb7f   :  { %6045 = vmatpush3.bf16.msra.mxu0 %v1721_v63 }
 0xb80   :  { %6058 = vmatprep.subr.bf16.mxu0 %v6669_v0 }
 0xb82   :  { %v1823_v30 = vpop.permute.xlu1 %1822 }
 0xb83   :  { %v1830_v41 = vsel %vm1024_vm3, %v1823_v30, 0 }
 0xb84   :  { %v6530_v37 = vpop.eup %6529 }
 0xb85   :  { %v1713_v13 = vmul.f32 %v6530_v37, %v6522_v59 }
 0xb88   :  { %v6532_v45 = vpop.eup %6531 }
 0xb89   :  { %v1714_v18 = vmul.f32 %v6532_v45, %v6524_v4 }
 0xb8b   :  { %v1715_v21 = vpack.c.bf16 %v1714_v18, %v1713_v13 }
 0xb8d   :  { %6047 = vmatmul.mubr.msk.bf16.vlgmr.msra.gmra.mxu0 %vm1077_vm5, %v1715_v21 }
 0xb8e   :  { %6059 = vmatpush3.bf16.xpose.msra.mxu0 %v1833_v27  ;;  %6062 = vmatprep.mubr.msk.bf16.mxu0 %vm6670_vm0, %v6669_v0 }
 0xb8f   :  { %6060 = vmatprep.subr.bf16.mxu0 %v6669_v0 }
 0xb96   :  { %6061 = vmatpush3.bf16.xpose.msra.mxu0 %v1830_v41 }
 0xb97   :  { %6082 = vmatprep.subr.bf16.mxu0 %v6669_v0 }
 0xb9d   :  { %6063 = vmatmul.mubr.msk.bf16.vlgmr.msra.gmra.mxu0 %vm1024_vm3, %v1821_v47 }
 0xb9e   :  { %6086 = vmatprep.mubr.msk.bf16.mxu0 %vm6670_vm0, %v6669_v0 }
 0xc14   :  { %v1545_v49 = vpop.f32.mrf.mxu0 }
 0xc15   :  { %v7317_v36 = vadd.f32 %v1545_v49, %v7261_v46 }
 0xc16   :  { %v6024_v58 = vpop.f32.mrf.mxu0 }
 0xc18   :  { %v1548_v34 = vpop.f32.mrf.mxu0 }
 0xc19   :  { %v7320_v23 = vadd.f32 %v1548_v34, %v7264_v51 }
 0xc1a   :  { %v6025_v31 = vpop.f32.mrf.mxu0 }
 0xc24   :  { %v1602_v39 = vpop.f32.mrf.mxu0 }
 0xc25   :  { %v1609_v61 = vmul.f32 0.25, %v1602_v39 }
 0xc26   :  { %v6032_v1 = vpop.f32.mrf.mxu0 }
 0xc27   :  { %v1611_v59 = vsel %vm1077_vm5, %v1609_v61, -inf  ;;  %v1023_v1 = vpack.c.bf16 %v7150_v53, %v7135_v28 }
 0xc28   :  { %1612 = vmax.xlane.f32.xlu1 %v1611_v59  ;;  %v1605_v3 = vpop.f32.mrf.mxu0 }
 0xc29   :  { %v1610_v4 = vmul.f32 0.25, %v1605_v3 }
 0xc2a   :  { %v6033_v52 = vpop.f32.mrf.mxu0 }
 0xc2b   :  { %v1614_v14 = vsel %vm1077_vm5, %v1610_v4, -inf }
 0xc2c   :  { %1615 = vmax.xlane.f32.xlu0 %v1614_v14 }
 0xc4d   :  { %v7324_v46 = vpop.f32.mrf.mxu0 }
 0xc4f   :  { %v6048_v35 = vpop.f32.mrf.mxu0 }
 0xc51   :  { %v7326_v6 = vpop.f32.mrf.mxu0 }
 0xc53   :  { %v6049_v51 = vpop.f32.mrf.mxu0 }
 0xc5d   :  { %v1869_v60 = vpop.f32.mrf.mxu0 }
 0xc5e   :  { %v1876_v2 = vmul.f32 0.25, %v1869_v60 }
 0xc5f   :  { %v6064_v20 = vpop.f32.mrf.mxu0 }
 0xc60   :  { %v1878_v11 = vsel %vm1077_vm5, %v1876_v2, -inf }
 0xc61   :  { %1879 = vmax.xlane.f32.xlu0 %v1878_v11  ;;  %v1872_v26 = vpop.f32.mrf.mxu0 }
 0xc62   :  { %v1877_v12 = vmul.f32 0.25, %v1872_v26 }
 0xc63   :  { %v6065_v55 = vpop.f32.mrf.mxu0 }
 0xc64   :  { %v1881_v54 = vsel %vm1077_vm5, %v1877_v12, -inf }
 0xc65   :  { %1882 = vmax.xlane.f32.xlu0 %v1881_v54 }
 0xcb1   :  { %v1613_v7 = vpop.xlane.xlu1 %1612 }
 0xcb2   :  { %v1617_v43 = vsub.f32 %v1609_v61, %v1613_v7 }
 0xcb4   :  { %v1619_v5 = vmul.f32 1.442695, %v1617_v43 }
 0xcb5   :  { %v1616_v33 = vpop.xlane.xlu0 %1615 }
 0xcb6   :  { %6533 = vpow2.f32 %v1619_v5  ;;  %v1618_v10 = vsub.f32 %v1610_v4, %v1616_v33  ;;  %v7342_v4 = vrot.slane %v1023_v1, 4 }
 0xcb8   :  { %v1621_v63 = vmul.f32 1.442695, %v1618_v10 }
 0xcba   :  { %6535 = vpow2.f32 %v1621_v63 }
 0xcc3   :  { %v6534_v37 = vpop.eup %6533 }
 0xcc4   :  { %v1623_v45 = vsel %vm1077_vm5, %v6534_v37, 0.0 }
 0xcc5   :  { %1624 = vadd.xlane.f32.xlu1 %v1623_v45 }
 0xcc7   :  { %v6536_v13 = vpop.eup %6535 }
 0xcc8   :  { %v1626_v18 = vsel %vm1077_vm5, %v6536_v13, 0.0 }
 0xcc9   :  { %1627 = vadd.xlane.f32.xlu0 %v1626_v18 }
 0xcea   :  { %v1880_v19 = vpop.xlane.xlu0 %1879 }
 0xceb   :  { %v1884_v21 = vsub.f32 %v1876_v2, %v1880_v19 }
 0xced   :  { %v1886_v27 = vmul.f32 1.442695, %v1884_v21 }
 0xcee   :  { %v1883_v30 = vpop.xlane.xlu0 %1882 }
 0xcef   :  { %6537 = vpow2.f32 %v1886_v27  ;;  %v1885_v41 = vsub.f32 %v1877_v12, %v1883_v30 }
 0xcf1   :  { %v1888_v47 = vmul.f32 1.442695, %v1885_v41 }
 0xcf3   :  { %6539 = vpow2.f32 %v1888_v47 }
 0xcfc   :  { %v6538_v49 = vpop.eup %6537 }
 0xcfd   :  { %v1890_v58 = vsel %vm1077_vm5, %v6538_v49, 0.0 }
 0xcfe   :  { %1891 = vadd.xlane.f32.xlu1 %v1890_v58 }
 0xd00   :  { %v6540_v34 = vpop.eup %6539 }
 0xd01   :  { %v1893_v31 = vsel %vm1077_vm5, %v6540_v34, 0.0 }
 0xd02   :  { %1894 = vadd.xlane.f32.xlu0 %v1893_v31 }
 0xd0f   :  { %1959 = vrot.lane.b32.xlu1 %v7213_v17, %s6675_s24 }
 0xd13   :  { %1955 = vrot.lane.b32.xlu1 %v7089_v57, %s6675_s24  ;;  %v1910_v57 = vsel %vm1195_vm4, %v7342_v4, 0 }
 0xd18   :  { %1957 = vrot.lane.b32.xlu0 %v7224_v8, %s6675_s24  ;;  %v1902_v8 = vrot.slane %v7195_v9, 4 }
 0xd1a   :  { %v1904_v28 = vsel %vm1195_vm4, %v1902_v8, %v7342_v4  ;;  %v2094_v8 = vld [vmem:[%s8381_s7 + $0x7] ss:$0 sm:$0xff] }
 0xd4e   :  { %v1625_v39 = vpop.xlane.xlu1 %1624 }
 0xd4f   :  { %6541 = vrcp.f32 %v1625_v39 }
 0xd52   :  { %v1628_v61 = vpop.xlane.xlu0 %1627 }
 0xd53   :  { %6543 = vrcp.f32 %v1628_v61 }
 0xd5c   :  { %v6542_v59 = vpop.eup %6541 }
 0xd5d   :  { %v1631_v52 = vmul.f32 %v6542_v59, %v6534_v37 }
 0xd60   :  { %v6544_v3 = vpop.eup %6543 }
 0xd61   :  { %v1632_v14 = vmul.f32 %v6544_v3, %v6536_v13 }
 0xd63   :  { %v1633_v17 = vpack.c.bf16 %v1632_v14, %v1631_v52 }
 0xd65   :  { %6055 = vmatmul.mubr.msk.bf16.vlgmr.msra.gmra.mxu1 %vm1077_vm5, %v1633_v17 }
 0xd66   :  { %6067 = vmatpush3.bf16.msra.mxu1 %v1910_v57  ;;  %6070 = vmatprep.mubr.msk.bf16.mxu1 %vm6670_vm0, %v6669_v0  ;;  %v2091_v57 = vadd.f32 %v7320_v23, %v6921_v32 }
 0xd67   :  { %6068 = vmatprep.subr.bf16.mxu1 %v6669_v0 }
 0xd6a   :  { %6069 = vmatpush3.bf16.msra.mxu1 %v1904_v28 }
 0xd6b   :  { %6074 = vmatprep.subr.bf16.mxu1 %v6669_v0 }
 0xd87   :  { %v1892_v53 = vpop.xlane.xlu1 %1891 }
 0xd88   :  { %6545 = vrcp.f32 %v1892_v53  ;;  %v2090_v53 = vadd.f32 %v7317_v36, %v6919_v29 }
 0xd8b   :  { %v1895_v35 = vpop.xlane.xlu0 %1894  ;;  %v1960_v11 = vpop.permute.xlu1 %1959 }
 0xd8c   :  { %6547 = vrcp.f32 %v1895_v35  ;;  %v1968_v9 = vsel %vm1024_vm3, %v1960_v11, 0  ;;  %v7379_v35 = vadd.f32 %v2094_v8, %v2091_v57 }
 0xd8f   :  { %v1958_v12 = vpop.permute.xlu0 %1957  ;;  %v1956_v54 = vpop.permute.xlu1 %1955 }
 0xd90   :  { %v1965_v55 = vsel %vm1024_vm3, %v1958_v12, 0 }
 0xd95   :  { %v6546_v51 = vpop.eup %6545 }
 0xd96   :  { %v1898_v2 = vmul.f32 %v6546_v51, %v6538_v49  ;;  %v7381_v51 = vadd.f32 %v2094_v8, %v2090_v53 }
 0xd99   :  { %v6548_v60 = vpop.eup %6547 }
 0xd9a   :  { %v1899_v20 = vmul.f32 %v6548_v60, %v6540_v34 }
 0xd9c   :  { %v1900_v26 = vpack.c.bf16 %v1899_v20, %v1898_v2 }
 0xd9e   :  { %6071 = vmatmul.mubr.msk.bf16.vlgmr.msra.gmra.mxu1 %vm1077_vm5, %v1900_v26 }
 0xd9f   :  { %6075 = vmatpush3.bf16.xpose.msra.mxu1 %v1968_v9  ;;  %6078 = vmatprep.mubr.msk.bf16.mxu1 %vm6670_vm0, %v6669_v0 }
 0xda0   :  { %6076 = vmatprep.subr.bf16.mxu1 %v6669_v0 }
 0xda7   :  { %6077 = vmatpush3.bf16.xpose.msra.mxu1 %v1965_v55 }
 0xdae   :  { %6079 = vmatmul.mubr.msk.bf16.vlgmr.msra.gmra.mxu1 %vm1024_vm3, %v1956_v54 }
 0xe25   :  { %v1813_v7 = vpop.f32.mrf.mxu1 }
 0xe26   :  { %v1814_v10 = vadd.f32 %v1813_v7, %v7324_v46 }
 0xe27   :  { %v6056_v43 = vpop.f32.mrf.mxu1 }
 0xe29   :  { %v1816_v5 = vpop.f32.mrf.mxu1 }
 0xe2a   :  { %v1817_v13 = vadd.f32 %v1816_v5, %v7326_v6 }
 0xe2b   :  { %v6057_v33 = vpop.f32.mrf.mxu1 }
 0xe5e   :  { %v1946_v63 = vpop.f32.mrf.mxu1 }
 0xe5f   :  { %v1953_v37 = vadd.f32 %v1946_v63, %v1814_v10 }
 0xe60   :  { %v6072_v45 = vpop.f32.mrf.mxu1 }
 0xe62   :  { %v1949_v18 = vpop.f32.mrf.mxu1 }
 0xe63   :  { %v7363_v19 = vadd.f32 %v1949_v18, %v1817_v13 }
 0xe64   :  { %v6073_v21 = vpop.f32.mrf.mxu1 }
 0xe6e   :  { %v2004_v27 = vpop.f32.mrf.mxu1 }
 0xe6f   :  { %v2011_v30 = vmul.f32 0.25, %v2004_v27 }
 0xe70   :  { %v6080_v41 = vpop.f32.mrf.mxu1 }
 0xe71   :  { %v2013_v47 = vsel %vm1077_vm5, %v2011_v30, -inf }
 0xe72   :  { %2014 = vmax.xlane.f32.xlu1 %v2013_v47  ;;  %v2007_v49 = vpop.f32.mrf.mxu1 }
 0xe73   :  { %v2012_v58 = vmul.f32 0.25, %v2007_v49 }
 0xe74   :  { %v6081_v34 = vpop.f32.mrf.mxu1 }
 0xe75   :  { %v2016_v46 = vsel %vm1077_vm5, %v2012_v58, -inf }
 0xe76   :  { %2017 = vmax.xlane.f32.xlu0 %v2016_v46 }
 0xefb   :  { %v2015_v31 = vpop.xlane.xlu1 %2014 }
 0xefc   :  { %v2019_v39 = vsub.f32 %v2011_v30, %v2015_v31  ;;  %v6353_v31 = vld [vmem:[%s8385_s5 + $0x70] ss:$8 sps:$4 sm:$0xff]  }
 0xefe   :  { %v2021_v61 = vmul.f32 1.442695, %v2019_v39  ;;  %v6358_v39 = vld [vmem:[%s8385_s5 + $0x64] ss:$8 sps:$4 sm:$0xff]  }
 0xeff   :  { %v2018_v6 = vpop.xlane.xlu0 %2017 }
 0xf00   :  { %6549 = vpow2.f32 %v2021_v61  ;;  %v2020_v1 = vsub.f32 %v2012_v58, %v2018_v6  ;;  %v6356_v61 = vld [vmem:[%s8385_s5 + $0x60] ss:$8 sps:$4 sm:$0xff]   ;;  %v6361_v6 = vld [vmem:[%s8385_s5 + $0x54] ss:$8 sps:$4 sm:$0xff]  }
 0xf02   :  { %v2023_v59 = vmul.f32 1.442695, %v2020_v1  ;;  %v6359_v1 = vld [vmem:[%s8385_s5 + $0x50] ss:$8 sps:$4 sm:$0xff]  }
 0xf04   :  { %6551 = vpow2.f32 %v2023_v59  ;;  %v6364_v59 = vld [vmem:[%s8385_s5 + $0x44] ss:$8 sps:$4 sm:$0xff]  }
 0xf0d   :  { %v6550_v3 = vpop.eup %6549 }
 0xf0e   :  { %v2025_v52 = vsel %vm1077_vm5, %v6550_v3, 0.0 }
 0xf0f   :  { %2026 = vadd.xlane.f32.xlu0 %v2025_v52 }
 0xf11   :  { %v6552_v14 = vpop.eup %6551 }
 0xf12   :  { %v2028_v17 = vsel %vm1077_vm5, %v6552_v14, 0.0 }
 0xf13   :  { %2029 = vadd.xlane.f32.xlu1 %v2028_v17 }
 0xf24   :  { %2036 = vrot.lane.b32.xlu1 %v1904_v28, %s6673_s22  ;;  %v2102_v28 = vsel %vm136_vm2, %v7379_v35, 0.0 }
 0xf25   :  { %2038 = vrot.lane.b32.xlu0 %v7342_v4, %s6673_s22  ;;  %v2099_v4 = vsel %vm136_vm2, %v7381_v51, 0.0 }
 0xf44   :  { %2103 = vadd.xlane.f32.xlu0 %v2102_v28 }
 0xf48   :  { %2100 = vadd.xlane.f32.xlu1 %v2099_v4 }
 0xf98   :  { %v2027_v23 = vpop.xlane.xlu0 %2026 }
 0xf99   :  { %6553 = vrcp.f32 %v2027_v23 }
 0xf9c   :  { %v2030_v60 = vpop.xlane.xlu1 %2029  ;;  %v2039_v2 = vpop.permute.xlu0 %2038 }
 0xf9d   :  { %6555 = vrcp.f32 %v2030_v60  ;;  %v2045_v20 = vsel %vm1195_vm4, %v2039_v2, 0 }
 0xf9e   :  { %6083 = vmatpush3.bf16.msra.mxu0 %v2045_v20 }
 0xf9f   :  { %6084 = vmatprep.subr.bf16.mxu0 %v6669_v0 }
 0xfa0   :  { %v2037_v36 = vpop.permute.xlu1 %2036 }
 0xfa2   :  { %6085 = vmatpush3.bf16.msra.mxu0 %v2037_v36 }
 0xfa6   :  { %v6554_v11 = vpop.eup %6553 }
 0xfa7   :  { %v2033_v9 = vmul.f32 %v6554_v11, %v6550_v3  ;;  %v6362_v3 = vld [vmem:[%s8385_s5 + $0x40] ss:$8 sps:$4 sm:$0xff]  }
 0xfaa   :  { %v6556_v26 = vpop.eup %6555 }
 0xfab   :  { %v2034_v12 = vmul.f32 %v6556_v26, %v6552_v14 }
 0xfad   :  { %v2035_v55 = vpack.c.bf16 %v2034_v12, %v2033_v9  ;;  %v2151_v12 = vadd.f32 1.0, %v6949_v50 }
 0xfaf   :  { %6087 = vmatmul.mubr.msk.bf16.vlgmr.msra.gmra.mxu0 %vm1077_vm5, %v2035_v55 }
 0xfb0   :  { %2269 = vmatprep.mubr.bf16.mxu0 %v6671_v40 }
 0xfcd   :  { %v2104_v43 = vpop.xlane.xlu0 %2103 }
 0xfce   :  { %v2112_v63 = vmul.f32 0.015625, %v2104_v43 }
 0xfd0   :  { %v2116_v41 = vsub.f32 %v7379_v35, %v2112_v63  ;;  %v7452_v63 = vrot.slane %v6947_v48, %v6903_v16  ;;  %v6368_v48 = vld [vmem:[%s8383_s6 + $0x120] ss:$24 sps:$4 sm:$0xff]  }
 0xfd1   :  { %v2101_v54 = vpop.xlane.xlu1 %2100 }
 0xfd2   :  { %v2111_v7 = vmul.f32 0.015625, %v2101_v54  ;;  %v2120_v46 = vmul.f32 %v2116_v41, %v2116_v41 }
 0xfd4   :  { %v2115_v45 = vsub.f32 %v7381_v51, %v2111_v7  ;;  %v7444_v7 = vrot.slane %v2151_v12, %v6903_v16 }
0x106f   :  { %v2081_v5 = vpop.f32.mrf.mxu0 }
0x1070   :  { %v2088_v33 = vadd.f32 %v2081_v5, %v1953_v37  ;;  %v2119_v37 = vmul.f32 %v2115_v45, %v2115_v45  ;;  %v6367_v5 = vld [vmem:[%s8383_s6 + $0x154] ss:$24 sps:$4 sm:$0xff]  }
0x1071   :  { %v6088_v10 = vpop.f32.mrf.mxu0 }
0x1072   :  { %v2092_v13 = vadd.f32 %v2088_v33, %v6919_v29  ;;  %v2123_v34 = vsel %vm136_vm2, %v2119_v37, 0.0  ;;  %v6376_v37 = vld [vmem:[%s8383_s6 + $0xc4] ss:$24 sps:$4 sm:$0xff]  }
0x1073   :  { %v2084_v18 = vpop.f32.mrf.mxu0 }
0x1074   :  { %v7393_v21 = vadd.f32 %v2094_v8, %v2092_v13  ;;  %v2089_v27 = vadd.f32 %v2084_v18, %v7363_v19  ;;  %v2126_v19 = vsel %vm136_vm2, %v2120_v46, 0.0  ;;  %v6365_v18 = vld [vmem:[%s8383_s6 + $0x150] ss:$24 sps:$4 sm:$0xff]   ;;  %v6390_v46 = vld [vmem:[%s8379_s4 + $0xd8] sm:$0xff]  }
0x1075   :  { %v6089_v30 = vpop.f32.mrf.mxu0 }
0x1076   :  { %v2093_v47 = vadd.f32 %v2089_v27, %v6921_v32  ;;  %v2105_v49 = vsel %vm136_vm2, %v7393_v21, 0.0  ;;  %v6355_v32 = vld [vmem:[%s8385_s5 + $0x74] ss:$8 sps:$4 sm:$0xff]  }
0x1077   :  { %2106 = vadd.xlane.f32.xlu0 %v2105_v49  ;;  %2245 = vmatprep.subr.bf16.mxu0 %v6355_v32  ;;  %v6370_v30 = vld [vmem:[%s8383_s6 + $0x124] ss:$24 sps:$4 sm:$0xff]   ;;  %v6374_v49 = vld [vmem:[%s8383_s6 + $0xc0] ss:$24 sps:$4 sm:$0xff]   ;;  %v6392_v32 = vld [vmem:[%s8379_s4 + $0xd0] sm:$0xff]  }
0x1078   :  { %v7400_v58 = vadd.f32 %v2094_v8, %v2093_v47  ;;  %2246 = vmatpush1.bf16.msra.mxu0 %v6353_v31  ;;  %v6371_v47 = vld [vmem:[%s8383_s6 + $0xf0] ss:$24 sps:$4 sm:$0xff]  }
0x1079   :  { %2247 = vmatprep.subr.bf16.mxu0 %v6358_v39  ;;  %v6393_v31 = vld [vmem:[%s8379_s4 + $0x108] sm:$0xff]  }
0x107a   :  { %v2108_v29 = vsel %vm136_vm2, %v7400_v58, 0.0  ;;  %v6394_v39 = vld [vmem:[%s8379_s4 + $0xc8] sm:$0xff]  }
0x107b   :  { %2124 = vadd.xlane.f32.xlu0 %v2123_v34  ;;  %2109 = vadd.xlane.f32.xlu1 %v2108_v29  ;;  %v6379_v34 = vld [vmem:[%s8383_s6 + $0x15c] ss:$24 sps:$4 sm:$0xff]  }
0x107c   :  { %2248 = vmatpush1.bf16.msra.mxu0 %v6356_v61  ;;  %v6389_v29 = vld [vmem:[%s8379_s4 + $0x118] sm:$0xff]   ;;  %v6395_v61 = vld [vmem:[%s8379_s4 + $0x100] sm:$0xff]  }
0x107d   :  { %2249 = vmatprep.subr.bf16.mxu0 %v6361_v6  ;;  %5761 = vmatprep.subr.bf16.mxu1 %v6389_v29  ;;  %v6396_v6 = vld [vmem:[%s8379_s4 + $0xc0] sm:$0xff]  }
0x107e   :  { %5762 = vmatpush3.bf16.msra.mxu1 %v6390_v46 }
0x107f   :  { %2127 = vadd.xlane.f32.xlu1 %v2126_v19  ;;  %v6391_v19 = vld [vmem:[%s8379_s4 + $0x110] sm:$0xff]  }
0x1080   :  { %2250 = vmatpush1.bf16.msra.mxu0 %v6359_v1  ;;  %5763 = vmatprep.subr.bf16.mxu1 %v6391_v19  ;;  %v6397_v1 = vld [vmem:[%s8379_s4 + $0xf8] sm:$0xff]  }
0x1081   :  { %2251 = vmatprep.subr.bf16.mxu0 %v6364_v59  ;;  %v6398_v59 = vld [vmem:[%s8379_s4 + $0xb8] sm:$0xff]  }
0x1082   :  { %5764 = vmatpush3.bf16.msra.mxu1 %v6392_v32 }
0x1083   :  { %5765 = vmatprep.subr.bf16.mxu1 %v6393_v31 }
0x1084   :  { %2252 = vmatpush1.bf16.msra.mxu0 %v6362_v3  ;;  %v6399_v3 = vld [vmem:[%s8379_s4 + $0xf0] sm:$0xff]  }
0x1085   :  { %2683 = vmatprep.subr.bf16.mxu0 %v6367_v5 }
0x1086   :  { %5766 = vmatpush3.bf16.msra.mxu1 %v6394_v39 }
0x1087   :  { %5767 = vmatprep.subr.bf16.mxu1 %v6395_v61 }
0x108a   :  { %5768 = vmatpush3.bf16.msra.mxu1 %v6396_v6 }
0x108b   :  { %5769 = vmatprep.subr.bf16.mxu1 %v6397_v1 }
0x108e   :  { %5770 = vmatpush3.bf16.msra.mxu1 %v6398_v59 }
0x108f   :  { %5771 = vmatprep.subr.bf16.mxu1 %v6399_v3 }
0x1100   :  { %v2107_v52 = vpop.xlane.xlu0 %2106 }
0x1101   :  { %v2113_v14 = vmul.f32 0.015625, %v2107_v52  ;;  %v6400_v52 = vld [vmem:[%s8379_s4 + $0xb0] sm:$0xff]  }
0x1102   :  { %5772 = vmatpush3.bf16.msra.mxu1 %v6400_v52  ;;  %v6407_v52 = vld [vmem:[%s8383_s6 + $0x164] ss:$24 sps:$4 sm:$0xff]  }
0x1103   :  { %v7431_v17 = vsub.f32 %v7393_v21, %v2113_v14  ;;  %v6401_v14 = vld [vmem:[%s8379_s4 + $0xe8] sm:$0xff]  }
0x1104   :  { %v2125_v57 = vpop.xlane.xlu0 %2124  ;;  %v2110_v8 = vpop.xlane.xlu1 %2109  ;;  %5773 = vmatprep.subr.bf16.mxu1 %v6401_v14  ;;  %v6405_v14 = vld [vmem:[%s8383_s6 + $0x160] ss:$24 sps:$4 sm:$0xff]  }
0x1105   :  { %v2135_v53 = vmul.f32 0.015625, %v2125_v57  ;;  %v2114_v28 = vmul.f32 0.015625, %v2110_v8  ;;  %v2121_v4 = vmul.f32 %v7431_v17, %v7431_v17  ;;  %v6402_v57 = vld [vmem:[%s8379_s4 + $0xa8] sm:$0xff]   ;;  %v6403_v8 = vld [vmem:[%s8379_s4 + $0xe0] sm:$0xff]  }
0x1106   :  { %5774 = vmatpush3.bf16.msra.mxu1 %v6402_v57  ;;  %v6410_v57 = vld [vmem:[%s8383_s6 + $0x134] ss:$24 sps:$4 sm:$0xff]  }
0x1107   :  { %v2139_v23 = vadd.f32 1e-05, %v2135_v53  ;;  %v7436_v60 = vsub.f32 %v7400_v58, %v2114_v28  ;;  %v2129_v2 = vsel %vm136_vm2, %v2121_v4, 0.0  ;;  %v6404_v53 = vld [vmem:[%s8379_s4 + $0xa0] sm:$0xff]   ;;  %5775 = vmatprep.subr.bf16.mxu1 %v6403_v8  ;;  %v6408_v8 = vld [vmem:[%s8383_s6 + $0x130] ss:$24 sps:$4 sm:$0xff]  }
0x1108   :  { %2130 = vadd.xlane.f32.xlu0 %v2129_v2  ;;  %v2128_v20 = vpop.xlane.xlu1 %2127 }
0x1109   :  { %6557 = vrsqrt.f32 %v2139_v23  ;;  %v2136_v36 = vmul.f32 0.015625, %v2128_v20  ;;  %v2122_v11 = vmul.f32 %v7436_v60, %v7436_v60 }
0x110a   :  { %5776 = vmatpush3.bf16.msra.mxu1 %v6404_v53  ;;  %v6413_v53 = vld [vmem:[%s8383_s6 + $0x104] ss:$24 sps:$4 sm:$0xff]  }
0x110b   :  { %v2140_v26 = vadd.f32 1e-05, %v2136_v36  ;;  %v2132_v9 = vsel %vm136_vm2, %v2122_v11, 0.0  ;;  %2765 = vmatprep.subr.bf16.mxu1 %v6407_v52  ;;  %v2491_v52 = vld [vmem:[%s8381_s7 + $0x31] ss:$0 sm:$0xff] }
0x110c   :  { %2133 = vadd.xlane.f32.xlu1 %v2132_v9 }
0x110d   :  { %6559 = vrsqrt.f32 %v2140_v26 }
0x1116   :  { %v6558_v55 = vpop.eup %6557 }
0x1117   :  { %v2147_v54 = vmul.f32 %v6558_v55, %v2115_v45 }
0x1119   :  { %v2156_v10 = vmul.f32 %v7444_v7, %v2147_v54 }
0x111a   :  { %v6560_v43 = vpop.eup %6559 }
0x111b   :  { %v2148_v33 = vmul.f32 %v6560_v43, %v2116_v41  ;;  %v2164_v45 = vadd.f32 %v7452_v63, %v2156_v10  ;;  %v6373_v41 = vld [vmem:[%s8383_s6 + $0xf4] ss:$24 sps:$4 sm:$0xff]  }
0x111c   :  { %v6385_v10 = vld [vmem:[%s8383_s6 + $0xfc] ss:$24 sps:$4 sm:$0xff]  }
0x111d   :  { %v2157_v50 = vmul.f32 %v7444_v7, %v2148_v33 }
0x111f   :  { %v2165_v13 = vadd.f32 %v7452_v63, %v2157_v50  ;;  %v6388_v50 = vld [vmem:[%s8383_s6 + $0xcc] ss:$24 sps:$4 sm:$0xff]  }
0x1121   :  { %v2176_v27 = vpack.c.bf16 %v2165_v13, %v2164_v45  ;;  %v6386_v45 = vld [vmem:[%s8383_s6 + $0xc8] ss:$24 sps:$4 sm:$0xff]   ;;  %v5531_v13 = vld [vmem:[%s8381_s7 + $0x30] ss:$8 sm:$0x3] }
0x1123   :  { %5540 = vmatmul.mubr.msk.bf16.vlgmr.msra.gmra.mxu0 %vm136_vm2, %v2176_v27  ;;  %v2184_v27 = vrot.slane %v5531_v13, %v6903_v16 }
0x1124   :  { %2684 = vmatpush1.bf16.msra.mxu0 %v6365_v18  ;;  %2279 = vmatprep.mubr.bf16.mxu0 %v6671_v40  ;;  %v2188_v18 = vrot.slane %v5531_v13, %v7003_v22 }
0x1125   :  { %2685 = vmatprep.subr.bf16.mxu0 %v6370_v30 }
0x1128   :  { %2686 = vmatpush1.bf16.msra.mxu0 %v6368_v48 }
0x1129   :  { %2687 = vmatprep.subr.bf16.mxu0 %v6373_v41 }
0x112c   :  { %2688 = vmatpush1.bf16.msra.mxu0 %v6371_v47 }
0x112d   :  { %2689 = vmatprep.subr.bf16.mxu0 %v6376_v37 }
0x1130   :  { %2690 = vmatpush1.bf16.msra.mxu0 %v6374_v49 }
0x1131   :  { %2724 = vmatprep.subr.bf16.mxu0 %v6379_v34 }
0x1191   :  { %v2131_v28 = vpop.xlane.xlu0 %2130 }
0x1192   :  { %v2137_v4 = vmul.f32 0.015625, %v2131_v28  ;;  %v6411_v28 = vld [vmem:[%s8383_s6 + $0x100] ss:$24 sps:$4 sm:$0xff]  }
0x1194   :  { %v2141_v23 = vadd.f32 1e-05, %v2137_v4  ;;  %v6416_v4 = vld [vmem:[%s8383_s6 + $0xd4] ss:$24 sps:$4 sm:$0xff]  }
0x1195   :  { %v2134_v2 = vpop.xlane.xlu1 %2133 }
0x1196   :  { %6561 = vrsqrt.f32 %v2141_v23  ;;  %v2138_v20 = vmul.f32 0.015625, %v2134_v2  ;;  %v6414_v23 = vld [vmem:[%s8383_s6 + $0xd0] ss:$24 sps:$4 sm:$0xff]  }
0x1198   :  { %v2142_v36 = vadd.f32 1e-05, %v2138_v20 }
0x119a   :  { %6563 = vrsqrt.f32 %v2142_v36 }
0x11a3   :  { %v6562_v11 = vpop.eup %6561 }
0x11a4   :  { %v2149_v26 = vmul.f32 %v6562_v11, %v7431_v17  ;;  %v6377_v17 = vld [vmem:[%s8383_s6 + $0x158] ss:$24 sps:$4 sm:$0xff]  }
0x11a6   :  { %v2158_v55 = vmul.f32 %v7444_v7, %v2149_v26 }
0x11a7   :  { %v6564_v9 = vpop.eup %6563 }
0x11a8   :  { %v2150_v12 = vmul.f32 %v6564_v9, %v7436_v60  ;;  %v2166_v43 = vadd.f32 %v7452_v63, %v2158_v55  ;;  %v6382_v60 = vld [vmem:[%s8383_s6 + $0x12c] ss:$24 sps:$4 sm:$0xff]  }
0x11aa   :  { %v2159_v54 = vmul.f32 %v7444_v7, %v2150_v12  ;;  %v6380_v7 = vld [vmem:[%s8383_s6 + $0x128] ss:$24 sps:$4 sm:$0xff]  }
0x11ac   :  { %v2167_v5 = vadd.f32 %v7452_v63, %v2159_v54  ;;  %v6383_v63 = vld [vmem:[%s8383_s6 + $0xf8] ss:$24 sps:$4 sm:$0xff]  }
0x11ae   :  { %v2177_v33 = vpack.c.bf16 %v2167_v5, %v2166_v43 }
0x11b0   :  { %5541 = vmatmul.mubr.msk.bf16.gmra.mxu0 %vm136_vm2, %v2177_v33 }
0x11b1   :  { %2707 = vmatprep.mubr.bf16.mxu0 %v6671_v40 }
0x11b8   :  { %5584 = vmatmul.mubr.msk.bf16.vlgmr.msra.gmra.mxu0 %vm136_vm2, %v6843_v62 }
0x11b9   :  { %2725 = vmatpush1.bf16.msra.mxu0 %v6377_v17  ;;  %2748 = vmatprep.mubr.bf16.mxu0 %v6671_v40 }
0x11ba   :  { %2726 = vmatprep.subr.bf16.mxu0 %v6382_v60 }
0x11bd   :  { %2727 = vmatpush1.bf16.msra.mxu0 %v6380_v7 }
0x11be   :  { %2728 = vmatprep.subr.bf16.mxu0 %v6385_v10 }
0x11c1   :  { %2729 = vmatpush1.bf16.msra.mxu0 %v6383_v63 }
0x11c2   :  { %2730 = vmatprep.subr.bf16.mxu0 %v6388_v50 }
0x11c5   :  { %2731 = vmatpush1.bf16.msra.mxu0 %v6386_v45 }
0x11c8   :  { %5585 = vmatmul.mubr.msk.bf16.vlgmr.msra.gmra.mxu0 %vm136_vm2, %v6843_v62 }
0x11e3   :  { %v2271_v30 = vpop.f32.mrf.mxu0 }
0x11e4   :  { %v2272_v47 = vadd.f32 %v2271_v30, %v2184_v27 }
0x11e5   :  { %v2273_v48 = vpop.f32.mrf.mxu0 }
0x11e6   :  { %v2274_v41 = vadd.f32 %v2273_v48, %v2188_v18  ;;  %v2290_v32 = vmax.f32 %v2272_v47, 0.0 }
0x11e7   :  { %v2275_v49 = vpop.f32.mrf.mxu0 }
0x11e8   :  { %v2276_v37 = vadd.f32 %v2275_v49, %v2184_v27  ;;  %v2291_v29 = vmax.f32 %v2274_v41, 0.0  ;;  %v2298_v1 = vmul.f32 %v2290_v32, %v2290_v32 }
0x11e9   :  { %v2277_v34 = vpop.f32.mrf.mxu0 }
0x11ea   :  { %v2292_v46 = vmax.f32 %v2276_v37, 0.0  ;;  %v2278_v19 = vadd.f32 %v2277_v34, %v2188_v18  ;;  %v2299_v61 = vmul.f32 %v2291_v29, %v2291_v29 }
0x11ec   :  { %v2293_v31 = vmax.f32 %v2278_v19, 0.0  ;;  %v2300_v39 = vmul.f32 %v2292_v46, %v2292_v46 }
0x11ee   :  { %v2301_v6 = vmul.f32 %v2293_v31, %v2293_v31  ;;  %v2338_v3 = vpack.c.bf16 %v2300_v39, %v2298_v1 }
0x11f0   :  { %v2339_v59 = vpack.c.bf16 %v2301_v6, %v2299_v61 }
0x11f2   :  { %2470 = vmatprep.mubr.bf16.mxu1 %v2339_v59 }
0x11f3   :  { %2471 = vmatmul.mubr.bf16.vlgmr.msra.gmra.mxu1 %v2338_v3 }
0x11f4   :  { %2766 = vmatpush1.bf16.msra.mxu1 %v6405_v14 }
0x11f5   :  { %2767 = vmatprep.subr.bf16.mxu1 %v6410_v57 }
0x11f8   :  { %2768 = vmatpush1.bf16.msra.mxu1 %v6408_v8 }
0x11f9   :  { %2769 = vmatprep.subr.bf16.mxu1 %v6413_v53 }
0x11fc   :  { %2770 = vmatpush1.bf16.msra.mxu1 %v6411_v28 }
0x11fd   :  { %2771 = vmatprep.subr.bf16.mxu1 %v6416_v4 }
0x1200   :  { %2772 = vmatpush1.bf16.msra.mxu1 %v6414_v23 }
0x1201   :  { %6102 = vmatprep.subr.bf16.mxu1 %v6669_v0 }
0x1270   :  { %v2281_v2 = vpop.f32.mrf.mxu0 }
0x1271   :  { %v2282_v11 = vadd.f32 %v2281_v2, %v2184_v27 }
0x1272   :  { %v2283_v20 = vpop.f32.mrf.mxu0 }
0x1273   :  { %v2284_v36 = vadd.f32 %v2283_v20, %v2188_v18  ;;  %v2294_v5 = vmax.f32 %v2282_v11, 0.0 }
0x1274   :  { %v2285_v26 = vpop.f32.mrf.mxu0 }
0x1275   :  { %v2286_v9 = vadd.f32 %v2285_v26, %v2184_v27  ;;  %v2295_v55 = vmax.f32 %v2284_v36, 0.0  ;;  %v2302_v50 = vmul.f32 %v2294_v5, %v2294_v5  ;;  %v5559_v27 = vld [vmem:[%s8381_s7 + $0x32] ss:$8 sm:$0x30] }
0x1276   :  { %v2287_v12 = vpop.f32.mrf.mxu0 }
0x1277   :  { %v2296_v54 = vmax.f32 %v2286_v9, 0.0  ;;  %v2288_v43 = vadd.f32 %v2287_v12, %v2188_v18  ;;  %v2303_v10 = vmul.f32 %v2295_v55, %v2295_v55  ;;  %v5558_v18 = vld [vmem:[%s8381_s7 + $0x32] ss:$8 sm:$0xf] }
0x1278   :  { %v7595_v33 = vpop.f32.mrf.mxu0  ;;  %v7606_v41 = vor.u32 %v5559_v27, %v5558_v18 }
0x1279   :  { %v2297_v17 = vmax.f32 %v2288_v43, 0.0  ;;  %v2304_v60 = vmul.f32 %v2296_v54, %v2296_v54 }
0x127a   :  { %v7597_v7 = vpop.f32.mrf.mxu0  ;;  %v2660_v47 = vrot.slane %v7606_v41, %v500_v38  ;;  %v2656_v37 = vrot.slane %v7606_v41, %v496_v56 }
0x127b   :  { %v2305_v63 = vmul.f32 %v2297_v17, %v2297_v17  ;;  %v2340_v30 = vpack.c.bf16 %v2304_v60, %v2302_v50 }
0x127c   :  { %v2713_v45 = vpop.f32.mrf.mxu0 }
0x127d   :  { %v2341_v13 = vpack.c.bf16 %v2305_v63, %v2303_v10 }
0x127e   :  { %v2714_v48 = vpop.f32.mrf.mxu0 }
0x127f   :  { %2478 = vmatprep.mubr.bf16.mxu1 %v2341_v13 }
0x1280   :  { %2479 = vmatmul.mubr.bf16.gmra.mxu1 %v2340_v30 }
0x1281   :  { %2789 = vmatprep.mubr.bf16.mxu1 %v6671_v40 }
0x1288   :  { %v2750_v49 = vpop.f32.mrf.mxu0  ;;  %5586 = vmatmul.mubr.msk.bf16.vlgmr.msra.gmra.mxu1 %vm136_vm2, %v6843_v62 }
0x1289   :  { %6110 = vmatprep.mubr.msk.bf16.mxu1 %vm6670_vm0, %v6669_v0  ;;  %v2751_v19 = vadd.f32 %v2750_v49, %v2656_v37  ;;  %v6418_v49 = vld [vmem:[%s8379_s4 + $0x150] sm:$0xff]   ;;  %v6419_v37 = vld [vmem:[%s8379_s4 + $0x148] sm:$0xff]  }
0x128a   :  { %v2752_v34 = vpop.f32.mrf.mxu0 }
0x128b   :  { %v2753_v29 = vadd.f32 %v2752_v34, %v2660_v47  ;;  %v2877_v38 = vrot.slane %v2751_v19, %v6903_v16  ;;  %v6417_v47 = vld [vmem:[%s8379_s4 + $0x158] sm:$0xff]   ;;  %v6420_v34 = vld [vmem:[%s8379_s4 + $0x140] sm:$0xff]  }
0x128c   :  { %v2754_v46 = vpop.f32.mrf.mxu0  ;;  %6103 = vmatpush3.bf16.msra.mxu1 %v6417_v47 }
0x128d   :  { %v2867_v32 = vadd.f32 1.0, %v2753_v29  ;;  %6104 = vmatprep.subr.bf16.mxu1 %v6669_v0 }
0x128e   :  { %v2755_v31 = vpop.f32.mrf.mxu0 }
0x128f   :  { %v2871_v39 = vrot.slane %v2867_v32, %v6903_v16 }
0x1290   :  { %6105 = vmatpush3.bf16.msra.mxu1 %v6418_v49 }
0x1291   :  { %v2872_v61 = vmul.f32 %v2871_v39, %v7027_v24  ;;  %v2873_v62 = vmul.f32 %v2871_v39, %v7068_v25  ;;  %6106 = vmatprep.subr.bf16.mxu1 %v6669_v0 }
0x1293   :  { %v7622_v6 = vadd.f32 %v2877_v38, %v2872_v61  ;;  %v7624_v56 = vadd.f32 %v2877_v38, %v2873_v62 }
0x1294   :  { %6107 = vmatpush3.bf16.msra.mxu1 %v6419_v37 }
0x1295   :  { %6108 = vmatprep.subr.bf16.mxu1 %v6669_v0 }
0x1298   :  { %6109 = vmatpush3.bf16.msra.mxu1 %v6420_v34 }
0x1299   :  { %6122 = vmatprep.subr.bf16.mxu1 %v6669_v0 }
0x12b3   :  { %v5777_v1 = vpop.f32.mrf.mxu1 }
0x12b5   :  { %v5778_v59 = vpop.f32.mrf.mxu1 }
0x12b6   :  { %v5779_v3 = vadd.f32 %v5778_v59, %v5777_v1 }
0x12b7   :  { %v5780_v14 = vpop.f32.mrf.mxu1 }
0x12b8   :  { %v2487_v57 = vadd.f32 %v5779_v3, %v7381_v51 }
0x12b9   :  { %v5781_v8 = vpop.f32.mrf.mxu1 }
0x12ba   :  { %v7630_v53 = vadd.f32 %v2491_v52, %v2487_v57  ;;  %v5782_v24 = vadd.f32 %v5781_v8, %v5780_v14 }
0x12bc   :  { %v2488_v25 = vadd.f32 %v5782_v24, %v7379_v35  ;;  %v2798_v28 = vsel %vm136_vm2, %v7630_v53, 0.0  ;;  %v2652_v24 = vrot.slane %v7606_v41, %v7003_v22 }
0x12bd   :  { %2799 = vadd.xlane.f32.xlu0 %v2798_v28  ;;  %v2648_v28 = vrot.slane %v7606_v41, %v6903_v16 }
0x12be   :  { %v7635_v4 = vadd.f32 %v2491_v52, %v2488_v25  ;;  %v2712_v25 = vadd.f32 %v7597_v7, %v2652_v24  ;;  %v6421_v7 = vld [vmem:[%s8379_s4 + $0x138] sm:$0xff]  }
0x12bf   :  { %6090 = vmatprep.subr.bf16.mxu0 %v6421_v7 }
0x12c0   :  { %v2801_v23 = vsel %vm136_vm2, %v7635_v4, 0.0  ;;  %6091 = vmatpush3.bf16.msra.mxu0 %v6421_v7 }
0x12c1   :  { %2802 = vadd.xlane.f32.xlu1 %v2801_v23  ;;  %v2850_v23 = vadd.f32 1.0, %v2712_v25 }
0x1340   :  { %v5783_v2 = vpop.f32.mrf.mxu1 }
0x1342   :  { %v5784_v20 = vpop.f32.mrf.mxu1 }
0x1343   :  { %v5785_v36 = vadd.f32 %v5784_v20, %v5783_v2 }
0x1344   :  { %v5786_v51 = vpop.f32.mrf.mxu1 }
0x1345   :  { %v2489_v11 = vadd.f32 %v5785_v36, %v7393_v21  ;;  %v2710_v36 = vadd.f32 %v7595_v33, %v2648_v28  ;;  %v6422_v33 = vld [vmem:[%s8379_s4 + $0x130] sm:$0xff]  }
0x1346   :  { %v5787_v26 = vpop.f32.mrf.mxu1  ;;  %v2800_v9 = vpop.xlane.xlu0 %2799  ;;  %6092 = vmatprep.subr.bf16.mxu0 %v6422_v33 }
0x1347   :  { %v7640_v12 = vadd.f32 %v2491_v52, %v2489_v11  ;;  %v5788_v35 = vadd.f32 %v5787_v26, %v5786_v51  ;;  %v2810_v55 = vmul.f32 0.015625, %v2800_v9  ;;  %v2854_v51 = vrot.slane %v2850_v23, %v6903_v16  ;;  %6093 = vmatpush3.bf16.msra.mxu0 %v6422_v33 }
0x1348   :  { %v7642_v54 = vpop.f32.mrf.mxu1 }
0x1349   :  { %v2490_v43 = vadd.f32 %v5788_v35, %v7400_v58  ;;  %v2814_v5 = vsub.f32 %v7630_v53, %v2810_v55  ;;  %v2804_v17 = vsel %vm136_vm2, %v7640_v12, 0.0  ;;  %v2862_v35 = vrot.slane %v2710_v36, %v6903_v16 }
0x134a   :  { %v7648_v60 = vpop.f32.mrf.mxu1  ;;  %v2803_v10 = vpop.xlane.xlu1 %2802  ;;  %2805 = vadd.xlane.f32.xlu0 %v2804_v17 }
0x134b   :  { %v7650_v21 = vadd.f32 %v2491_v52, %v2490_v43  ;;  %v2811_v63 = vmul.f32 0.015625, %v2803_v10  ;;  %v2818_v45 = vmul.f32 %v2814_v5, %v2814_v5 }
0x134c   :  { %v2795_v50 = vpop.f32.mrf.mxu1 }
0x134d   :  { %v2815_v13 = vsub.f32 %v7635_v4, %v2811_v63  ;;  %v2807_v30 = vsel %vm136_vm2, %v7650_v21, 0.0  ;;  %v2822_v48 = vsel %vm136_vm2, %v2818_v45, 0.0  ;;  %v6424_v63 = vld [vmem:[%s8379_s4 + $0x120] sm:$0xff]   ;;  %v6427_v50 = vld [vmem:[%s8385_s5 + $0xb4] ss:$8 sps:$4 sm:$0xff]  }
0x134e   :  { %v2796_v58 = vpop.f32.mrf.mxu1  ;;  %2808 = vadd.xlane.f32.xlu1 %v2807_v30  ;;  %2823 = vadd.xlane.f32.xlu0 %v2822_v48 }
0x134f   :  { %v2819_v18 = vmul.f32 %v2815_v13, %v2815_v13 }
0x1351   :  { %v2825_v27 = vsel %vm136_vm2, %v2819_v18, 0.0 }
0x1352   :  { %2826 = vadd.xlane.f32.xlu1 %v2825_v27 }
0x13d3   :  { %v2806_v29 = vpop.xlane.xlu0 %2805 }
0x13d4   :  { %v2812_v46 = vmul.f32 0.015625, %v2806_v29 }
0x13d6   :  { %v2816_v19 = vsub.f32 %v7640_v12, %v2812_v46 }
0x13d7   :  { %v2809_v32 = vpop.xlane.xlu1 %2808  ;;  %v2824_v39 = vpop.xlane.xlu0 %2823 }
0x13d8   :  { %v2813_v31 = vmul.f32 0.015625, %v2809_v32  ;;  %v2820_v38 = vmul.f32 %v2816_v19, %v2816_v19  ;;  %v2834_v61 = vmul.f32 0.015625, %v2824_v39  ;;  %v6425_v39 = vld [vmem:[%s8385_s5 + $0xb0] ss:$8 sps:$4 sm:$0xff]  }
0x13da   :  { %v2817_v62 = vsub.f32 %v7650_v21, %v2813_v31  ;;  %v2828_v1 = vsel %vm136_vm2, %v2820_v38, 0.0  ;;  %v2838_v59 = vadd.f32 1e-05, %v2834_v61 }
0x13db   :  { %v2827_v3 = vpop.xlane.xlu1 %2826  ;;  %2829 = vadd.xlane.f32.xlu0 %v2828_v1  ;;  %v6431_v1 = vld [vmem:[%s8385_s5 + $0x90] ss:$8 sps:$4 sm:$0xff]  }
0x13dc   :  { %v2835_v52 = vmul.f32 0.015625, %v2827_v3  ;;  %v2821_v14 = vmul.f32 %v2817_v62, %v2817_v62  ;;  %6565 = vrsqrt.f32 %v2838_v59  ;;  %v6436_v59 = vld [vmem:[%s8385_s5 + $0x84] ss:$8 sps:$4 sm:$0xff]  }
0x13de   :  { %v2839_v57 = vadd.f32 1e-05, %v2835_v52  ;;  %v2831_v8 = vsel %vm136_vm2, %v2821_v14, 0.0  ;;  %v2982_v52 = vld [vmem:[%s8381_s7 + $0x34] ss:$0 sm:$0xff] }
0x13df   :  { %2832 = vadd.xlane.f32.xlu1 %v2831_v8 }
0x13e0   :  { %6567 = vrsqrt.f32 %v2839_v57 }
0x13e9   :  { %v6566_v2 = vpop.eup %6565 }
0x13ea   :  { %v2846_v20 = vmul.f32 %v6566_v2, %v2814_v5  ;;  %v6423_v5 = vld [vmem:[%s8379_s4 + $0x128] sm:$0xff]  }
0x13eb   :  { %6094 = vmatprep.subr.bf16.mxu0 %v6423_v5 }
0x13ec   :  { %v2855_v9 = vmul.f32 %v2854_v51, %v2846_v20  ;;  %6095 = vmatpush3.bf16.msra.mxu0 %v6423_v5  ;;  %v2892_v20 = vld [vmem:[%s8381_s7 + $0x33] ss:$0 sm:$0xff] }
0x13ed   :  { %v6568_v11 = vpop.eup %6567  ;;  %6096 = vmatprep.subr.bf16.mxu0 %v6424_v63 }
0x13ee   :  { %v2847_v26 = vmul.f32 %v6568_v11, %v2815_v13  ;;  %v2863_v43 = vadd.f32 %v2862_v35, %v2855_v9 }
0x13f0   :  { %v2856_v55 = vmul.f32 %v2854_v51, %v2847_v26  ;;  %6097 = vmatpush3.bf16.msra.mxu0 %v6424_v63 }
0x13f1   :  { %3129 = vmatprep.subr.bf16.mxu0 %v6427_v50 }
0x13f2   :  { %v2864_v17 = vadd.f32 %v2862_v35, %v2856_v55 }
0x13f4   :  { %v2880_v10 = vpack.c.bf16 %v2864_v17, %v2863_v43 }
0x13f6   :  { %6098 = vmatprep.mubr.msk.bf16.mxu0 %vm136_vm2, %v2880_v10  ;;  %6111 = vmatmul.mubr.msk.bf16.vlgmr.msra.gmra.mxu1 %vm136_vm2, %v2880_v10 }
0x13f7   :  { %6114 = vmatprep.mubr.msk.bf16.mxu1 %vm6670_vm0, %v6669_v0 }
0x1464   :  { %v2830_v45 = vpop.xlane.xlu0 %2829 }
0x1465   :  { %v2836_v13 = vmul.f32 0.015625, %v2830_v45 }
0x1467   :  { %v2840_v30 = vadd.f32 1e-05, %v2836_v13 }
0x1468   :  { %v2833_v58 = vpop.xlane.xlu1 %2832 }
0x1469   :  { %6569 = vrsqrt.f32 %v2840_v30  ;;  %v2837_v48 = vmul.f32 0.015625, %v2833_v58 }
0x146b   :  { %v2841_v18 = vadd.f32 1e-05, %v2837_v48 }
0x146d   :  { %6571 = vrsqrt.f32 %v2841_v18 }
0x1476   :  { %v6570_v27 = vpop.eup %6569 }
0x1477   :  { %v2848_v47 = vmul.f32 %v6570_v27, %v2816_v19  ;;  %v6430_v19 = vld [vmem:[%s8385_s5 + $0xa4] ss:$8 sps:$4 sm:$0xff]  }
0x1479   :  { %v2857_v49 = vmul.f32 %v2854_v51, %v2848_v47 }
0x147a   :  { %v6572_v37 = vpop.eup %6571 }
0x147b   :  { %v2849_v34 = vmul.f32 %v6572_v37, %v2817_v62  ;;  %v2865_v29 = vadd.f32 %v2862_v35, %v2857_v49  ;;  %v6433_v62 = vld [vmem:[%s8385_s5 + $0x94] ss:$8 sps:$4 sm:$0xff]  }
0x147d   :  { %v2858_v46 = vmul.f32 %v2854_v51, %v2849_v34  ;;  %v2881_v32 = vpack.c.bf16 %v2865_v29, %v7622_v6  ;;  %v6428_v6 = vld [vmem:[%s8385_s5 + $0xa0] ss:$8 sps:$4 sm:$0xff]  }
0x147f   :  { %v2866_v31 = vadd.f32 %v2862_v35, %v2858_v46  ;;  %6115 = vmatmul.mubr.msk.bf16.gmra.mxu1 %vm136_vm2, %v2881_v32 }
0x1480   :  { %6118 = vmatprep.mubr.msk.bf16.mxu1 %vm6670_vm0, %v6669_v0 }
0x1481   :  { %v2891_v38 = vpack.c.bf16 %v2866_v31, %v2865_v29  ;;  %v2882_v61 = vpack.c.bf16 %v7624_v56, %v2866_v31  ;;  %v6434_v56 = vld [vmem:[%s8385_s5 + $0x80] ss:$8 sps:$4 sm:$0xff]  }
0x1483   :  { %6099 = vmatmul.mubr.msk.bf16.vlgmr.msra.gmra.mxu0 %vm136_vm2, %v2891_v38 }
0x1484   :  { %3130 = vmatpush1.bf16.msra.mxu0 %v6425_v39  ;;  %3153 = vmatprep.mubr.bf16.mxu0 %v6671_v40 }
0x1485   :  { %3131 = vmatprep.subr.bf16.mxu0 %v6430_v19 }
0x1487   :  { %6119 = vmatmul.mubr.msk.bf16.gmra.mxu1 %vm136_vm2, %v2882_v61 }
0x1488   :  { %3132 = vmatpush1.bf16.msra.mxu0 %v6428_v6  ;;  %6126 = vmatprep.mubr.msk.bf16.mxu1 %vm6670_vm0, %v6669_v0 }
0x1489   :  { %3133 = vmatprep.subr.bf16.mxu0 %v6433_v62 }
0x148c   :  { %3134 = vmatpush1.bf16.msra.mxu0 %v6431_v1 }
0x148d   :  { %3135 = vmatprep.subr.bf16.mxu0 %v6436_v59 }
0x1490   :  { %3136 = vmatpush1.bf16.msra.mxu0 %v6434_v56 }
0x1491   :  { %6130 = vmatprep.subr.bf16.mxu0 %v6669_v0 }
0x1493   :  { %5608 = vmatmul.mubr.msk.bf16.vlgmr.msra.gmra.mxu0 %vm136_vm2, %v2880_v10 }
0x1494   :  { %3163 = vmatprep.mubr.bf16.mxu0 %v6671_v40 }
0x149b   :  { %5609 = vmatmul.mubr.msk.bf16.gmra.mxu0 %vm136_vm2, %v2881_v32 }
0x149c   :  { %3173 = vmatprep.mubr.bf16.mxu0 %v6671_v40 }
0x14a3   :  { %5610 = vmatmul.mubr.msk.bf16.gmra.mxu0 %vm136_vm2, %v2882_v61 }
0x14a4   :  { %6134 = vmatprep.mubr.msk.bf16.mxu0 %vm6670_vm0, %v6669_v0 }
0x14b6   :  { %v3047_v3 = vpop.f32.mrf.mxu1 }
0x14b7   :  { %v3048_v8 = vadd.f32 %v3047_v3, %v2982_v52 }
0x14b8   :  { %v6112_v14 = vpop.f32.mrf.mxu1 }
0x14ba   :  { %v3050_v57 = vpop.f32.mrf.mxu1 }
0x14bb   :  { %v3051_v24 = vadd.f32 %v3050_v57, %v2982_v52 }
0x14bc   :  { %v6113_v25 = vpop.f32.mrf.mxu1 }
0x14bd   :  { %v7746_v28 = vpack.c.bf16 %v3051_v24, %v3048_v8 }
0x14bf   :  { %3270 = vrot.lane.b32.xlu1 %v7746_v28, %s6672_s21  ;;  %v3194_v49 = vsel %vm1024_vm3, %v7746_v28, 0 }
0x1531   :  { %v3271_v57 = vpop.permute.xlu1 %3270 }
0x1532   :  { %v3278_v24 = vsel %vm1024_vm3, %v3271_v57, 0 }
0x153f   :  { %v3055_v23 = vpop.f32.mrf.mxu1 }
0x1540   :  { %v3056_v11 = vadd.f32 %v3055_v23, %v2982_v52 }
0x1541   :  { %v6116_v2 = vpop.f32.mrf.mxu1 }
0x1543   :  { %v6100_v36 = vpop.f32.mrf.mxu0  ;;  %v3058_v51 = vpop.f32.mrf.mxu1 }
0x1544   :  { %v2966_v26 = vadd.f32 %v6100_v36, %v2892_v20  ;;  %v3059_v9 = vadd.f32 %v3058_v51, %v2982_v52 }
0x1545   :  { %v2957_v35 = vpop.f32.mrf.mxu0  ;;  %v6117_v55 = vpop.f32.mrf.mxu1 }
0x1546   :  { %v7753_v7 = vpack.c.bf16 %v3059_v9, %v3056_v11  ;;  %v2958_v50 = vadd.f32 %v2957_v35, %v2892_v20 }
0x1547   :  { %v6101_v43 = vpop.f32.mrf.mxu0  ;;  %v3063_v17 = vpop.f32.mrf.mxu1 }
0x1548   :  { %v2969_v10 = vadd.f32 %v6101_v43, %v2892_v20  ;;  %3272 = vrot.lane.b32.xlu0 %v7753_v7, %s6672_s21  ;;  %v3197_v33 = vsel %vm1024_vm3, %v7753_v7, 0  ;;  %v7762_v58 = vadd.f32 %v3063_v17, %v2982_v52 }
0x1549   :  { %v2960_v5 = vpop.f32.mrf.mxu0  ;;  %v6120_v63 = vpop.f32.mrf.mxu1  ;;  %6123 = vmatpush3.bf16.xpose.msra.mxu1 %v3197_v33 }
0x154a   :  { %v7759_v45 = vpack.c.bf16 %v2969_v10, %v2966_v26  ;;  %v2961_v13 = vadd.f32 %v2960_v5, %v2892_v20  ;;  %6124 = vmatprep.subr.bf16.mxu1 %v6669_v0 }
0x154b   :  { %v3066_v30 = vpop.f32.mrf.mxu1 }
0x154c   :  { %v7764_v48 = vpack.c.bf16 %v2961_v13, %v2958_v50  ;;  %v7766_v18 = vadd.f32 %v3066_v30, %v2982_v52  ;;  %3452 = vrot.lane.b32.xlu0 %v7746_v28, %s6674_s23 }
0x154d   :  { %v6121_v27 = vpop.f32.mrf.mxu1 }
0x154e   :  { %v3072_v47 = vpack.c.bf16 %v7766_v18, %v7762_v58  ;;  %3266 = vrot.lane.b32.xlu1 %v7764_v48, %s6672_s21 }
0x1551   :  { %6125 = vmatpush3.bf16.xpose.msra.mxu1 %v3194_v49 }
0x1552   :  { %3454 = vrot.lane.b32.xlu1 %v7753_v7, %s6674_s23  ;;  %6138 = vmatprep.subr.bf16.mxu1 %v6669_v0 }
0x1553   :  { %v3155_v37 = vpop.f32.mrf.mxu0 }
0x1555   :  { %v3157_v34 = vpop.f32.mrf.mxu0 }
0x1556   :  { %3450 = vrot.lane.b32.xlu1 %v7764_v48, %s6674_s23 }
0x1557   :  { %v3159_v29 = vpop.f32.mrf.mxu0 }
0x1558   :  { %v7781_v46 = vpack.c.bf16 %v3159_v29, %v3155_v37  ;;  %6127 = vmatmul.mubr.msk.bf16.vlgmr.msra.gmra.mxu1 %vm1024_vm3, %v7764_v48 }
0x1559   :  { %v3161_v32 = vpop.f32.mrf.mxu0  ;;  %6142 = vmatprep.mubr.msk.bf16.mxu1 %vm6670_vm0, %v6669_v0 }
0x155a   :  { %v7787_v31 = vpack.c.bf16 %v3161_v32, %v3157_v34 }
0x155b   :  { %v3165_v39 = vpop.f32.mrf.mxu0 }
0x155d   :  { %v3167_v38 = vpop.f32.mrf.mxu0 }
0x155f   :  { %v3169_v19 = vpop.f32.mrf.mxu0 }
0x1560   :  { %v7789_v6 = vpack.c.bf16 %v3169_v19, %v3165_v39 }
0x1561   :  { %v3171_v61 = vpop.f32.mrf.mxu0 }
0x1562   :  { %v7791_v62 = vpack.c.bf16 %v3171_v61, %v3167_v38 }
0x1563   :  { %v7793_v1 = vpop.f32.mrf.mxu0 }
0x1565   :  { %v7795_v59 = vpop.f32.mrf.mxu0 }
0x1567   :  { %v7797_v56 = vpop.f32.mrf.mxu0 }
0x1568   :  { %v3188_v3 = vpack.c.bf16 %v7797_v56, %v7793_v1 }
0x1569   :  { %v7815_v35 = vpop.f32.mrf.mxu0 }
0x15ba   :  { %v3273_v52 = vpop.permute.xlu0 %3272 }
0x15bb   :  { %v3281_v14 = vsel %vm1024_vm3, %v3273_v52, 0 }
0x15bc   :  { %6131 = vmatpush3.bf16.xpose.msra.mxu0 %v3281_v14 }
0x15bd   :  { %6132 = vmatprep.subr.bf16.mxu0 %v6669_v0 }
0x15be   :  { %v3453_v2 = vpop.permute.xlu0 %3452 }
0x15bf   :  { %v3460_v20 = vsel %vm1024_vm3, %v3453_v2, 0 }
0x15c0   :  { %v3267_v8 = vpop.permute.xlu1 %3266 }
0x15c4   :  { %6133 = vmatpush3.bf16.xpose.msra.mxu0 %v3278_v24  ;;  %v3455_v25 = vpop.permute.xlu1 %3454 }
0x15c5   :  { %6154 = vmatprep.subr.bf16.mxu0 %v6669_v0  ;;  %v3463_v23 = vsel %vm1024_vm3, %v3455_v25, 0 }
0x15c8   :  { %v3451_v36 = vpop.permute.xlu1 %3450 }
0x15cb   :  { %6135 = vmatmul.mubr.msk.bf16.vlgmr.msra.gmra.mxu0 %vm1024_vm3, %v3267_v8 }
0x15cc   :  { %6155 = vmatpush3.bf16.xpose.msra.mxu0 %v3463_v23  ;;  %6158 = vmatprep.mubr.msk.bf16.mxu0 %vm6670_vm0, %v6669_v0 }
0x15cd   :  { %6156 = vmatprep.subr.bf16.mxu0 %v6669_v0 }
0x15d4   :  { %6157 = vmatpush3.bf16.xpose.msra.mxu0 %v3460_v20 }
0x15d5   :  { %6178 = vmatprep.subr.bf16.mxu0 %v6669_v0 }
0x15db   :  { %6159 = vmatmul.mubr.msk.bf16.vlgmr.msra.gmra.mxu0 %vm1024_vm3, %v3451_v36 }
0x15dc   :  { %6182 = vmatprep.mubr.msk.bf16.mxu0 %vm6670_vm0, %v6669_v0 }
0x1618   :  { %v3233_v51 = vpop.f32.mrf.mxu1 }
0x1619   :  { %v3240_v10 = vmul.f32 0.25, %v3233_v51 }
0x161a   :  { %v6128_v11 = vpop.f32.mrf.mxu1 }
0x161b   :  { %v3242_v27 = vsel %vm1077_vm5, %v3240_v10, -inf }
0x161c   :  { %v3236_v26 = vpop.f32.mrf.mxu1 }
0x161d   :  { %v3241_v13 = vmul.f32 0.25, %v3236_v26 }
0x161e   :  { %v6129_v9 = vpop.f32.mrf.mxu1 }
0x161f   :  { %v3245_v49 = vsel %vm1077_vm5, %v3241_v13, -inf }
0x168b   :  { %v3317_v55 = vpop.f32.mrf.mxu0 }
0x168c   :  { %v3324_v43 = vmul.f32 0.25, %v3317_v55 }
0x168d   :  { %v6136_v17 = vpop.f32.mrf.mxu0 }
0x168e   :  { %v3326_v33 = vsel %vm1077_vm5, %v3324_v43, -inf }
0x168f   :  { %3327 = vmax.xlane.f32.xlu0 %v3326_v33  ;;  %v3320_v5 = vpop.f32.mrf.mxu0 }
0x1690   :  { %v3325_v63 = vmul.f32 0.25, %v3320_v5 }
0x1691   :  { %v6137_v50 = vpop.f32.mrf.mxu0 }
0x1692   :  { %v3329_v30 = vsel %vm1077_vm5, %v3325_v63, -inf }
0x1693   :  { %3330 = vmax.xlane.f32.xlu1 %v3329_v30  ;;  %3243 = vmax.xlane.f32.xlu0 %v3242_v27 }
0x1697   :  { %3246 = vmax.xlane.f32.xlu0 %v3245_v49 }
0x169b   :  { %v3499_v37 = vpop.f32.mrf.mxu0 }
0x169c   :  { %v3506_v34 = vmul.f32 0.25, %v3499_v37 }
0x169d   :  { %v6160_v29 = vpop.f32.mrf.mxu0 }
0x169e   :  { %v3508_v32 = vsel %vm1077_vm5, %v3506_v34, -inf  ;;  %v3718_v29 = vrot.slane %v7753_v7, 4 }
0x169f   :  { %v3502_v39 = vpop.f32.mrf.mxu0  ;;  %3509 = vmax.xlane.f32.xlu0 %v3508_v32 }
0x16a0   :  { %v3507_v38 = vmul.f32 0.25, %v3502_v39 }
0x16a1   :  { %v6161_v19 = vpop.f32.mrf.mxu0 }
0x16a2   :  { %v3511_v61 = vsel %vm1077_vm5, %v3507_v38, -inf }
0x16a3   :  { %3512 = vmax.xlane.f32.xlu1 %v3511_v61 }
0x1718   :  { %v3328_v52 = vpop.xlane.xlu0 %3327 }
0x1719   :  { %v3332_v14 = vsub.f32 %v3324_v43, %v3328_v52 }
0x171b   :  { %v3334_v2 = vmul.f32 1.442695, %v3332_v14 }
0x171c   :  { %v3331_v57 = vpop.xlane.xlu1 %3330  ;;  %v3244_v8 = vpop.xlane.xlu0 %3243 }
0x171d   :  { %v3248_v24 = vsub.f32 %v3240_v10, %v3244_v8  ;;  %v3333_v25 = vsub.f32 %v3325_v63, %v3331_v57 }
0x171f   :  { %v3250_v23 = vmul.f32 1.442695, %v3248_v24  ;;  %v3336_v51 = vmul.f32 1.442695, %v3333_v25 }
0x1720   :  { %v3247_v20 = vpop.xlane.xlu0 %3246 }
0x1721   :  { %v3249_v36 = vsub.f32 %v3241_v13, %v3247_v20  ;;  %6573 = vpow2.f32 %v3250_v23 }
0x1722   :  { %6575 = vpow2.f32 %v3334_v2  ;;  %v3407_v2 = vsel %vm1195_vm4, %v7789_v6, 0 }
0x1723   :  { %v3252_v11 = vmul.f32 1.442695, %v3249_v36 }
0x1725   :  { %6577 = vpow2.f32 %v3252_v11 }
0x1726   :  { %6579 = vpow2.f32 %v3336_v51 }
0x1728   :  { %v3510_v26 = vpop.xlane.xlu0 %3509 }
0x1729   :  { %v3514_v9 = vsub.f32 %v3506_v34, %v3510_v26  ;;  %v7838_v34 = vrot.slane %v3072_v47, 4  ;;  %v3535_v26 = vsel %vm1195_vm4, %v7791_v62, 0 }
0x172b   :  { %v3516_v55 = vmul.f32 1.442695, %v3514_v9  ;;  %v7845_v39 = vsel %vm1195_vm4, %v3718_v29, %v7838_v34  ;;  %v3880_v29 = vrot.slane %v3188_v3, 4 }
0x172c   :  { %v3513_v49 = vpop.xlane.xlu1 %3512 }
0x172d   :  { %6581 = vpow2.f32 %v3516_v55  ;;  %v3515_v37 = vsub.f32 %v3507_v38, %v3513_v49 }
0x172e   :  { %v6574_v17 = vpop.eup %6573 }
0x172f   :  { %v3254_v43 = vsel %vm1077_vm5, %v6574_v17, 0.0  ;;  %v6576_v33 = vpop.eup %6575  ;;  %v3518_v32 = vmul.f32 1.442695, %v3515_v37 }
0x1730   :  { %3255 = vadd.xlane.f32.xlu0 %v3254_v43  ;;  %v3338_v50 = vsel %vm1077_vm5, %v6576_v33, 0.0 }
0x1731   :  { %6583 = vpow2.f32 %v3518_v32 }
0x1732   :  { %v6578_v10 = vpop.eup %6577 }
0x1733   :  { %v3257_v5 = vsel %vm1077_vm5, %v6578_v10, 0.0  ;;  %v6580_v63 = vpop.eup %6579 }
0x1734   :  { %3258 = vadd.xlane.f32.xlu1 %v3257_v5  ;;  %3339 = vadd.xlane.f32.xlu0 %v3338_v50  ;;  %v3341_v13 = vsel %vm1077_vm5, %v6580_v63, 0.0 }
0x1738   :  { %3342 = vadd.xlane.f32.xlu1 %v3341_v13 }
0x173a   :  { %v7827_v30 = vpop.eup %6581 }
0x173b   :  { %v3520_v27 = vsel %vm1077_vm5, %v7827_v30, 0.0 }
0x173c   :  { %3521 = vadd.xlane.f32.xlu0 %v3520_v27 }
0x173e   :  { %v6584_v38 = vpop.eup %6583 }
0x173f   :  { %v3523_v19 = vsel %vm1077_vm5, %v6584_v38, 0.0 }
0x1749   :  { %3351 = vrot.lane.b32.xlu1 %v7781_v46, %s6673_s22 }
0x1752   :  { %3353 = vrot.lane.b32.xlu0 %v7789_v6, %s6673_s22 }
0x1756   :  { %3580 = vrot.lane.b32.xlu0 %v7764_v48, %s6675_s24 }
0x175a   :  { %3799 = vrot.lane.b32.xlu0 %v7845_v39, %s6672_s21 }
0x176d   :  { %3524 = vadd.xlane.f32.xlu1 %v3523_v19  ;;  %v3879_v19 = vrot.slane %v7789_v6, 4 }
0x177e   :  { %3584 = vrot.lane.b32.xlu1 %v7753_v7, %s6675_s24 }
0x1782   :  { %3582 = vrot.lane.b32.xlu1 %v7746_v28, %s6675_s24 }
0x1786   :  { %3801 = vrot.lane.b32.xlu1 %v7838_v34, %s6672_s21 }
0x178a   :  { %3797 = vrot.lane.b32.xlu1 %v7759_v45, %s6672_s21 }
0x17b9   :  { %v3256_v58 = vpop.xlane.xlu0 %3255 }
0x17bd   :  { %v3259_v48 = vpop.xlane.xlu1 %3258  ;;  %v3340_v18 = vpop.xlane.xlu0 %3339 }
0x17be   :  { %6585 = vrcp.f32 %v3340_v18 }
0x17c1   :  { %v3343_v47 = vpop.xlane.xlu1 %3342 }
0x17c2   :  { %6587 = vrcp.f32 %v3343_v47 }
0x17c3   :  { %6589 = vrcp.f32 %v3259_v48 }
0x17c4   :  { %6591 = vrcp.f32 %v3256_v58  ;;  %v7902_v58 = vsel %vm1195_vm4, %v3879_v19, %v3880_v29 }
0x17c5   :  { %v3522_v61 = vpop.xlane.xlu0 %3521  ;;  %v3352_v14 = vpop.permute.xlu1 %3351 }
0x17c6   :  { %6593 = vrcp.f32 %v3522_v61 }
0x17c9   :  { %v3354_v52 = vpop.permute.xlu0 %3353 }
0x17ca   :  { %v3360_v7 = vsel %vm1195_vm4, %v3354_v52, 0 }
0x17cb   :  { %6139 = vmatpush3.bf16.msra.mxu1 %v3360_v7  ;;  %v6586_v28 = vpop.eup %6585 }
0x17cc   :  { %6140 = vmatprep.subr.bf16.mxu1 %v6669_v0  ;;  %v3346_v8 = vmul.f32 %v6586_v28, %v6576_v33 }
0x17cf   :  { %v6588_v57 = vpop.eup %6587  ;;  %6141 = vmatpush3.bf16.msra.mxu1 %v3352_v14 }
0x17d0   :  { %6146 = vmatprep.subr.bf16.mxu1 %v6669_v0  ;;  %v3347_v24 = vmul.f32 %v6588_v57, %v6580_v63  ;;  %v6590_v23 = vpop.eup %6589 }
0x17d1   :  { %v6592_v20 = vpop.eup %6591  ;;  %v3263_v36 = vmul.f32 %v6590_v23, %v6578_v10 }
0x17d2   :  { %v3348_v25 = vpack.c.bf16 %v3347_v24, %v3346_v8  ;;  %v3262_v51 = vmul.f32 %v6592_v20, %v6574_v17 }
0x17d3   :  { %v6594_v9 = vpop.eup %6593 }
0x17d4   :  { %6143 = vmatmul.mubr.msk.bf16.vlgmr.msra.gmra.mxu1 %vm1077_vm5, %v3348_v25  ;;  %v3264_v11 = vpack.c.bf16 %v3263_v36, %v3262_v51  ;;  %v3528_v17 = vmul.f32 %v6594_v9, %v7827_v30  ;;  %v3581_v30 = vpop.permute.xlu0 %3580 }
0x17d5   :  { %6147 = vmatpush3.bf16.msra.mxu1 %v3407_v2  ;;  %6150 = vmatprep.mubr.msk.bf16.mxu1 %vm6670_vm0, %v6669_v0 }
0x17d6   :  { %6148 = vmatprep.subr.bf16.mxu1 %v6669_v0 }
0x17d8   :  { %v3800_v49 = vpop.permute.xlu0 %3799 }
0x17d9   :  { %6149 = vmatpush3.bf16.msra.mxu1 %v7781_v46  ;;  %v3807_v37 = vsel %vm1024_vm3, %v3800_v49, 0 }
0x17da   :  { %6162 = vmatprep.subr.bf16.mxu1 %v6669_v0 }
0x17dc   :  { %6151 = vmatmul.mubr.msk.bf16.vlgmr.msra.gmra.mxu1 %vm1077_vm5, %v3264_v11 }
0x17dd   :  { %6163 = vmatpush3.bf16.msra.mxu1 %v3535_v26  ;;  %6166 = vmatprep.mubr.msk.bf16.mxu1 %vm6670_vm0, %v6669_v0 }
0x17de   :  { %6164 = vmatprep.subr.bf16.mxu1 %v6669_v0 }
0x17e1   :  { %6165 = vmatpush3.bf16.msra.mxu1 %v7787_v31 }
0x17e2   :  { %6170 = vmatprep.subr.bf16.mxu1 %v6669_v0 }
0x17f6   :  { %v3525_v46 = vpop.xlane.xlu1 %3524 }
0x17f7   :  { %6595 = vrcp.f32 %v3525_v46 }
0x17fa   :  { %v3585_v33 = vpop.permute.xlu1 %3584 }
0x17fb   :  { %v3593_v5 = vsel %vm1024_vm3, %v3585_v33, 0 }
0x17fe   :  { %v3583_v63 = vpop.permute.xlu1 %3582 }
0x17ff   :  { %v3590_v50 = vsel %vm1024_vm3, %v3583_v63, 0 }
0x1802   :  { %v3802_v13 = vpop.permute.xlu1 %3801 }
0x1803   :  { %v3810_v27 = vsel %vm1024_vm3, %v3802_v13, 0 }
0x1804   :  { %v6596_v55 = vpop.eup %6595 }
0x1805   :  { %v3529_v43 = vmul.f32 %v6596_v55, %v6584_v38  ;;  %v3939_v38 = vsel %vm1195_vm4, %v3880_v29, 0 }
0x1806   :  { %v3798_v32 = vpop.permute.xlu1 %3797 }
0x1807   :  { %v3530_v10 = vpack.c.bf16 %v3529_v43, %v3528_v17 }
0x1809   :  { %6167 = vmatmul.mubr.msk.bf16.vlgmr.msra.gmra.mxu1 %vm1077_vm5, %v3530_v10 }
0x180a   :  { %6171 = vmatpush3.bf16.xpose.msra.mxu1 %v3593_v5  ;;  %6174 = vmatprep.mubr.msk.bf16.mxu1 %vm6670_vm0, %v6669_v0 }
0x180b   :  { %6172 = vmatprep.subr.bf16.mxu1 %v6669_v0 }
0x1812   :  { %6173 = vmatpush3.bf16.xpose.msra.mxu1 %v3590_v50 }
0x1813   :  { %6194 = vmatprep.subr.bf16.mxu1 %v6669_v0 }
0x1819   :  { %6175 = vmatmul.mubr.msk.bf16.vlgmr.msra.gmra.mxu1 %vm1024_vm3, %v3581_v30 }
0x181a   :  { %6195 = vmatpush3.bf16.xpose.msra.mxu1 %v3810_v27  ;;  %6198 = vmatprep.mubr.msk.bf16.mxu1 %vm6670_vm0, %v6669_v0 }
0x181b   :  { %6196 = vmatprep.subr.bf16.mxu1 %v6669_v0 }
0x1822   :  { %6197 = vmatpush3.bf16.xpose.msra.mxu1 %v3807_v37 }
0x1823   :  { %6210 = vmatprep.subr.bf16.mxu1 %v6669_v0 }
0x1829   :  { %6199 = vmatmul.mubr.msk.bf16.vlgmr.msra.gmra.mxu1 %vm1024_vm3, %v3798_v32 }
0x182a   :  { %6211 = vmatpush3.bf16.msra.mxu1 %v3939_v38  ;;  %6214 = vmatprep.mubr.msk.bf16.mxu1 %vm6670_vm0, %v6669_v0 }
0x182b   :  { %6212 = vmatprep.subr.bf16.mxu1 %v6669_v0 }
0x182e   :  { %6213 = vmatpush3.bf16.msra.mxu1 %v7902_v58 }
0x182f   :  { %6226 = vmatprep.subr.bf16.mxu1 %v6669_v0 }
0x1894   :  { %v3396_v1 = vpop.f32.mrf.mxu1 }
0x1896   :  { %v6144_v56 = vpop.f32.mrf.mxu1 }
0x1898   :  { %v3399_v3 = vpop.f32.mrf.mxu1 }
0x189a   :  { %v6145_v48 = vpop.f32.mrf.mxu1 }
0x189c   :  { %v3443_v18 = vpop.f32.mrf.mxu1 }
0x189d   :  { %v3444_v47 = vadd.f32 %v3443_v18, %v3396_v1 }
0x189e   :  { %v6152_v61 = vpop.f32.mrf.mxu1 }
0x18a0   :  { %v3446_v52 = vpop.f32.mrf.mxu1 }
0x18a1   :  { %v3447_v7 = vadd.f32 %v3446_v52, %v3399_v3 }
0x18a2   :  { %v6153_v28 = vpop.f32.mrf.mxu1 }
0x18c9   :  { %v3571_v6 = vpop.f32.mrf.mxu1 }
0x18ca   :  { %v7906_v14 = vadd.f32 %v3571_v6, %v3444_v47 }
0x18cb   :  { %v6168_v57 = vpop.f32.mrf.mxu1 }
0x18cd   :  { %v3574_v8 = vpop.f32.mrf.mxu1 }
0x18ce   :  { %v7908_v24 = vadd.f32 %v3574_v8, %v3447_v7 }
0x18cf   :  { %v6169_v25 = vpop.f32.mrf.mxu1 }
0x18d9   :  { %v3629_v23 = vpop.f32.mrf.mxu1 }
0x18da   :  { %v3636_v2 = vmul.f32 0.25, %v3629_v23 }
0x18db   :  { %v6176_v20 = vpop.f32.mrf.mxu1 }
0x18dc   :  { %v3638_v36 = vsel %vm1077_vm5, %v3636_v2, -inf }
0x18dd   :  { %3639 = vmax.xlane.f32.xlu0 %v3638_v36  ;;  %v3632_v51 = vpop.f32.mrf.mxu1 }
0x18de   :  { %v3637_v11 = vmul.f32 0.25, %v3632_v51  ;;  %v3728_v51 = vsel %vm1024_vm3, %v7838_v34, 0 }
0x18df   :  { %v6177_v26 = vpop.f32.mrf.mxu1 }
0x18e0   :  { %v3641_v46 = vsel %vm1077_vm5, %v3637_v11, -inf }
0x18e1   :  { %3642 = vmax.xlane.f32.xlu1 %v3641_v46 }
0x18e9   :  { %v3846_v9 = vpop.f32.mrf.mxu1 }
0x18ea   :  { %v3853_v55 = vmul.f32 0.25, %v3846_v9 }
0x18eb   :  { %v6200_v17 = vpop.f32.mrf.mxu1 }
0x18ec   :  { %v3855_v43 = vsel %vm1077_vm5, %v3853_v55, -inf }
0x18ed   :  { %3856 = vmax.xlane.f32.xlu0 %v3855_v43  ;;  %v3849_v33 = vpop.f32.mrf.mxu1 }
0x18ee   :  { %v3854_v10 = vmul.f32 0.25, %v3849_v33 }
0x18ef   :  { %v6201_v5 = vpop.f32.mrf.mxu1 }
0x18f0   :  { %v3858_v63 = vsel %vm1077_vm5, %v3854_v10, -inf }
0x18f1   :  { %3859 = vmax.xlane.f32.xlu0 %v3858_v63 }
0x1966   :  { %v3640_v50 = vpop.xlane.xlu0 %3639 }
0x1967   :  { %v3644_v13 = vsub.f32 %v3636_v2, %v3640_v50 }
0x1969   :  { %v3646_v30 = vmul.f32 1.442695, %v3644_v13 }
0x196a   :  { %v3643_v27 = vpop.xlane.xlu1 %3642 }
0x196b   :  { %6597 = vpow2.f32 %v3646_v30  ;;  %v3645_v49 = vsub.f32 %v3637_v11, %v3643_v27  ;;  %v3725_v11 = vsel %vm1024_vm3, %v7845_v39, 0 }
0x196d   :  { %v3648_v37 = vmul.f32 1.442695, %v3645_v49 }
0x196f   :  { %6599 = vpow2.f32 %v3648_v37 }
0x1976   :  { %v3857_v56 = vpop.xlane.xlu0 %3856 }
0x1977   :  { %v3861_v3 = vsub.f32 %v3853_v55, %v3857_v56 }
0x1978   :  { %v6598_v32 = vpop.eup %6597 }
0x1979   :  { %v3650_v38 = vsel %vm1077_vm5, %v6598_v32, 0.0  ;;  %v3863_v18 = vmul.f32 1.442695, %v3861_v3 }
0x197a   :  { %3651 = vadd.xlane.f32.xlu0 %v3650_v38  ;;  %v3860_v48 = vpop.xlane.xlu0 %3859 }
0x197b   :  { %v3862_v47 = vsub.f32 %v3854_v10, %v3860_v48  ;;  %6601 = vpow2.f32 %v3863_v18 }
0x197c   :  { %v6600_v19 = vpop.eup %6599 }
0x197d   :  { %v3653_v1 = vsel %vm1077_vm5, %v6600_v19, 0.0  ;;  %v3865_v61 = vmul.f32 1.442695, %v3862_v47 }
0x197e   :  { %3654 = vadd.xlane.f32.xlu1 %v3653_v1 }
0x197f   :  { %6603 = vpow2.f32 %v3865_v61 }
0x198f   :  { %3663 = vrot.lane.b32.xlu1 %v7787_v31, %s6673_s22  ;;  %v6602_v31 = vpop.eup %6601 }
0x1990   :  { %3665 = vrot.lane.b32.xlu0 %v7791_v62, %s6673_s22  ;;  %v3867_v52 = vsel %vm1077_vm5, %v6602_v31, 0.0  ;;  %v6604_v7 = vpop.eup %6603 }
0x1994   :  { %3884 = vrot.lane.b32.xlu0 %v3880_v29, %s6673_s22  ;;  %v3870_v29 = vsel %vm1077_vm5, %v6604_v7, 0.0 }
0x1998   :  { %3986 = vrot.lane.b32.xlu0 %v7838_v34, %s6674_s23 }
0x199c   :  { %3982 = vrot.lane.b32.xlu0 %v7759_v45, %s6674_s23 }
0x19b3   :  { %3868 = vadd.xlane.f32.xlu1 %v3867_v52 }
0x19b7   :  { %3871 = vadd.xlane.f32.xlu1 %v3870_v29 }
0x19c8   :  { %3882 = vrot.lane.b32.xlu1 %v7902_v58, %s6673_s22 }
0x19cc   :  { %3984 = vrot.lane.b32.xlu1 %v7845_v39, %s6674_s23 }
0x1a03   :  { %v3652_v28 = vpop.xlane.xlu0 %3651 }
0x1a04   :  { %6605 = vrcp.f32 %v3652_v28 }
0x1a07   :  { %v3655_v6 = vpop.xlane.xlu1 %3654  ;;  %v3666_v57 = vpop.permute.xlu0 %3665 }
0x1a08   :  { %6607 = vrcp.f32 %v3655_v6  ;;  %v3672_v8 = vsel %vm1195_vm4, %v3666_v57, 0 }
0x1a09   :  { %6179 = vmatpush3.bf16.msra.mxu0 %v3672_v8 }
0x1a0a   :  { %6180 = vmatprep.subr.bf16.mxu0 %v6669_v0 }
0x1a0b   :  { %v3664_v25 = vpop.permute.xlu1 %3663  ;;  %v3885_v26 = vpop.permute.xlu0 %3884 }
0x1a0c   :  { %v3891_v46 = vsel %vm1195_vm4, %v3885_v26, 0 }
0x1a0d   :  { %6181 = vmatpush3.bf16.msra.mxu0 %v3664_v25 }
0x1a0e   :  { %6186 = vmatprep.subr.bf16.mxu0 %v6669_v0 }
0x1a0f   :  { %v3987_v63 = vpop.permute.xlu0 %3986 }
0x1a10   :  { %v3995_v13 = vsel %vm1024_vm3, %v3987_v63, 0 }
0x1a11   :  { %v6606_v23 = vpop.eup %6605 }
0x1a12   :  { %v3658_v58 = vmul.f32 %v6606_v23, %v6598_v32 }
0x1a13   :  { %v3983_v49 = vpop.permute.xlu0 %3982 }
0x1a15   :  { %v6608_v2 = vpop.eup %6607 }
0x1a16   :  { %v3659_v20 = vmul.f32 %v6608_v2, %v6600_v19 }
0x1a18   :  { %v3660_v36 = vpack.c.bf16 %v3659_v20, %v3658_v58 }
0x1a1a   :  { %6183 = vmatmul.mubr.msk.bf16.vlgmr.msra.gmra.mxu0 %vm1077_vm5, %v3660_v36 }
0x1a1b   :  { %6187 = vmatpush3.bf16.xpose.msra.mxu0 %v3728_v51  ;;  %6190 = vmatprep.mubr.msk.bf16.mxu0 %vm6670_vm0, %v6669_v0 }
0x1a1c   :  { %6188 = vmatprep.subr.bf16.mxu0 %v6669_v0 }
0x1a23   :  { %6189 = vmatpush3.bf16.xpose.msra.mxu0 %v3725_v11 }
0x1a24   :  { %6202 = vmatprep.subr.bf16.mxu0 %v6669_v0 }
0x1a2a   :  { %6191 = vmatmul.mubr.msk.bf16.vlgmr.msra.gmra.mxu0 %vm1024_vm3, %v7759_v45 }
0x1a2b   :  { %6203 = vmatpush3.bf16.msra.mxu0 %v3891_v46  ;;  %6206 = vmatprep.mubr.msk.bf16.mxu0 %vm6670_vm0, %v6669_v0 }
0x1a2c   :  { %6204 = vmatprep.subr.bf16.mxu0 %v6669_v0 }
0x1a3c   :  { %v3869_v9 = vpop.xlane.xlu1 %3868 }
0x1a3d   :  { %6609 = vrcp.f32 %v3869_v9 }
0x1a40   :  { %v3872_v55 = vpop.xlane.xlu1 %3871 }
0x1a41   :  { %6611 = vrcp.f32 %v3872_v55 }
0x1a44   :  { %v3883_v17 = vpop.permute.xlu1 %3882 }
0x1a45   :  { %6205 = vmatpush3.bf16.msra.mxu0 %v3883_v17 }
0x1a46   :  { %6218 = vmatprep.subr.bf16.mxu0 %v6669_v0 }
0x1a48   :  { %v3985_v30 = vpop.permute.xlu1 %3984 }
0x1a49   :  { %v3992_v27 = vsel %vm1024_vm3, %v3985_v30, 0 }
0x1a4a   :  { %v6610_v43 = vpop.eup %6609 }
0x1a4b   :  { %v3875_v10 = vmul.f32 %v6610_v43, %v6602_v31 }
0x1a4e   :  { %v6612_v33 = vpop.eup %6611 }
0x1a4f   :  { %v3876_v5 = vmul.f32 %v6612_v33, %v6604_v7 }
0x1a51   :  { %v3877_v50 = vpack.c.bf16 %v3876_v5, %v3875_v10 }
0x1a53   :  { %6207 = vmatmul.mubr.msk.bf16.vlgmr.msra.gmra.mxu0 %vm1077_vm5, %v3877_v50 }
0x1a54   :  { %6219 = vmatpush3.bf16.xpose.msra.mxu0 %v3995_v13  ;;  %6222 = vmatprep.mubr.msk.bf16.mxu0 %vm6670_vm0, %v6669_v0 }
0x1a55   :  { %6220 = vmatprep.subr.bf16.mxu0 %v6669_v0 }
0x1a5c   :  { %6221 = vmatpush3.bf16.xpose.msra.mxu0 %v3992_v27 }
0x1a5d   :  { %6242 = vmatprep.subr.bf16.mxu0 %v6669_v0 }
0x1a63   :  { %6223 = vmatmul.mubr.msk.bf16.vlgmr.msra.gmra.mxu0 %vm1024_vm3, %v3983_v49 }
0x1a64   :  { %6246 = vmatprep.mubr.msk.bf16.mxu0 %vm6670_vm0, %v6669_v0 }
0x1ada   :  { %v3708_v37 = vpop.f32.mrf.mxu0 }
0x1adb   :  { %v7961_v32 = vadd.f32 %v3708_v37, %v7906_v14 }
0x1adc   :  { %v6184_v38 = vpop.f32.mrf.mxu0 }
0x1ade   :  { %v3711_v19 = vpop.f32.mrf.mxu0 }
0x1adf   :  { %v7964_v1 = vadd.f32 %v3711_v19, %v7908_v24 }
0x1ae0   :  { %v6185_v56 = vpop.f32.mrf.mxu0 }
0x1aea   :  { %v3764_v3 = vpop.f32.mrf.mxu0 }
0x1aeb   :  { %v3771_v48 = vmul.f32 0.25, %v3764_v3  ;;  %v3189_v3 = vpack.c.bf16 %v7815_v35, %v7795_v59 }
0x1aec   :  { %v6192_v18 = vpop.f32.mrf.mxu0 }
0x1aed   :  { %v3773_v47 = vsel %vm1077_vm5, %v3771_v48, -inf }
0x1aee   :  { %3774 = vmax.xlane.f32.xlu1 %v3773_v47  ;;  %v3767_v61 = vpop.f32.mrf.mxu0  ;;  %v7986_v47 = vrot.slane %v3189_v3, 4 }
0x1aef   :  { %v3772_v31 = vmul.f32 0.25, %v3767_v61 }
0x1af0   :  { %v6193_v52 = vpop.f32.mrf.mxu0 }
0x1af1   :  { %v3776_v7 = vsel %vm1077_vm5, %v3772_v31, -inf }
0x1af2   :  { %3777 = vmax.xlane.f32.xlu0 %v3776_v7 }
0x1b13   :  { %v7968_v14 = vpop.f32.mrf.mxu0 }
0x1b15   :  { %v6208_v29 = vpop.f32.mrf.mxu0 }
0x1b17   :  { %v7970_v28 = vpop.f32.mrf.mxu0 }
0x1b19   :  { %v6209_v24 = vpop.f32.mrf.mxu0 }
0x1b23   :  { %v4031_v6 = vpop.f32.mrf.mxu0 }
0x1b24   :  { %v4038_v57 = vmul.f32 0.25, %v4031_v6 }
0x1b25   :  { %v6224_v8 = vpop.f32.mrf.mxu0 }
0x1b26   :  { %v4040_v25 = vsel %vm1077_vm5, %v4038_v57, -inf }
0x1b27   :  { %4041 = vmax.xlane.f32.xlu0 %v4040_v25  ;;  %v4034_v23 = vpop.f32.mrf.mxu0 }
0x1b28   :  { %v4039_v2 = vmul.f32 0.25, %v4034_v23 }
0x1b29   :  { %v6225_v58 = vpop.f32.mrf.mxu0 }
0x1b2a   :  { %v4043_v20 = vsel %vm1077_vm5, %v4039_v2, -inf }
0x1b2b   :  { %4044 = vmax.xlane.f32.xlu0 %v4043_v20 }
0x1b77   :  { %v3775_v36 = vpop.xlane.xlu1 %3774 }
0x1b78   :  { %v3779_v51 = vsub.f32 %v3771_v48, %v3775_v36 }
0x1b7a   :  { %v3781_v11 = vmul.f32 1.442695, %v3779_v51 }
0x1b7b   :  { %v3778_v26 = vpop.xlane.xlu0 %3777 }
0x1b7c   :  { %6613 = vpow2.f32 %v3781_v11  ;;  %v3780_v46 = vsub.f32 %v3772_v31, %v3778_v26 }
0x1b7e   :  { %v3783_v9 = vmul.f32 1.442695, %v3780_v46 }
0x1b80   :  { %6615 = vpow2.f32 %v3783_v9 }
0x1b89   :  { %v6614_v55 = vpop.eup %6613 }
0x1b8a   :  { %v3785_v17 = vsel %vm1077_vm5, %v6614_v55, 0.0 }
0x1b8b   :  { %3786 = vadd.xlane.f32.xlu1 %v3785_v17 }
0x1b8d   :  { %v6616_v43 = vpop.eup %6615 }
0x1b8e   :  { %v3788_v33 = vsel %vm1077_vm5, %v6616_v43, 0.0 }
0x1b8f   :  { %3789 = vadd.xlane.f32.xlu0 %v3788_v33 }
0x1bb0   :  { %v4042_v10 = vpop.xlane.xlu0 %4041 }
0x1bb1   :  { %v4046_v5 = vsub.f32 %v4038_v57, %v4042_v10 }
0x1bb3   :  { %v4048_v63 = vmul.f32 1.442695, %v4046_v5 }
0x1bb4   :  { %v4045_v50 = vpop.xlane.xlu0 %4044 }
0x1bb5   :  { %6617 = vpow2.f32 %v4048_v63  ;;  %v4047_v13 = vsub.f32 %v4039_v2, %v4045_v50 }
0x1bb7   :  { %v4050_v30 = vmul.f32 1.442695, %v4047_v13 }
0x1bb9   :  { %6619 = vpow2.f32 %v4050_v30 }
0x1bc2   :  { %v6618_v27 = vpop.eup %6617 }
0x1bc3   :  { %v4052_v49 = vsel %vm1077_vm5, %v6618_v27, 0.0 }
0x1bc4   :  { %4053 = vadd.xlane.f32.xlu1 %v4052_v49 }
0x1bc6   :  { %v6620_v37 = vpop.eup %6619 }
0x1bc7   :  { %v4055_v38 = vsel %vm1077_vm5, %v6620_v37, 0.0 }
0x1bc8   :  { %4056 = vadd.xlane.f32.xlu0 %v4055_v38 }
0x1bd5   :  { %4121 = vrot.lane.b32.xlu1 %v7838_v34, %s6675_s24 }
0x1bd9   :  { %4117 = vrot.lane.b32.xlu1 %v7759_v45, %s6675_s24  ;;  %v4072_v45 = vsel %vm1195_vm4, %v7986_v47, 0 }
0x1bde   :  { %4119 = vrot.lane.b32.xlu0 %v7845_v39, %s6675_s24  ;;  %v4064_v39 = vrot.slane %v7791_v62, 4 }
0x1be0   :  { %v4066_v59 = vsel %vm1195_vm4, %v4064_v39, %v7986_v47 }
0x1c14   :  { %v3787_v19 = vpop.xlane.xlu1 %3786 }
0x1c15   :  { %6621 = vrcp.f32 %v3787_v19 }
0x1c18   :  { %v3790_v56 = vpop.xlane.xlu0 %3789 }
0x1c19   :  { %6623 = vrcp.f32 %v3790_v56 }
0x1c22   :  { %v6622_v48 = vpop.eup %6621 }
0x1c23   :  { %v3793_v61 = vmul.f32 %v6622_v48, %v6614_v55 }
0x1c26   :  { %v6624_v18 = vpop.eup %6623 }
0x1c27   :  { %v3794_v31 = vmul.f32 %v6624_v18, %v6616_v43 }
0x1c29   :  { %v3795_v34 = vpack.c.bf16 %v3794_v31, %v3793_v61  ;;  %v4253_v31 = vadd.f32 %v7964_v1, %v7635_v4 }
0x1c2b   :  { %6215 = vmatmul.mubr.msk.bf16.vlgmr.msra.gmra.mxu1 %vm1077_vm5, %v3795_v34  ;;  %v4256_v34 = vld [vmem:[%s8381_s7 + $0x35] ss:$0 sm:$0xff] }
0x1c2c   :  { %6227 = vmatpush3.bf16.msra.mxu1 %v4072_v45  ;;  %6230 = vmatprep.mubr.msk.bf16.mxu1 %vm6670_vm0, %v6669_v0  ;;  %v4252_v45 = vadd.f32 %v7961_v32, %v7630_v53  ;;  %v8023_v39 = vadd.f32 %v4256_v34, %v4253_v31 }
0x1c2d   :  { %6228 = vmatprep.subr.bf16.mxu1 %v6669_v0 }
0x1c30   :  { %6229 = vmatpush3.bf16.msra.mxu1 %v4066_v59 }
0x1c31   :  { %6234 = vmatprep.subr.bf16.mxu1 %v6669_v0 }
0x1c4d   :  { %v4054_v35 = vpop.xlane.xlu1 %4053 }
0x1c4e   :  { %6625 = vrcp.f32 %v4054_v35  ;;  %v8025_v35 = vadd.f32 %v4256_v34, %v4252_v45 }
0x1c51   :  { %v4057_v52 = vpop.xlane.xlu0 %4056  ;;  %v4122_v57 = vpop.permute.xlu1 %4121 }
0x1c52   :  { %6627 = vrcp.f32 %v4057_v52  ;;  %v4130_v62 = vsel %vm1024_vm3, %v4122_v57, 0 }
0x1c55   :  { %v4120_v25 = vpop.permute.xlu0 %4119  ;;  %v4118_v2 = vpop.permute.xlu1 %4117 }
0x1c56   :  { %v4127_v23 = vsel %vm1024_vm3, %v4120_v25, 0 }
0x1c5b   :  { %v6626_v7 = vpop.eup %6625 }
0x1c5c   :  { %v4060_v24 = vmul.f32 %v6626_v7, %v6618_v27 }
0x1c5f   :  { %v6628_v29 = vpop.eup %6627 }
0x1c60   :  { %v4061_v6 = vmul.f32 %v6628_v29, %v6620_v37 }
0x1c62   :  { %v4062_v8 = vpack.c.bf16 %v4061_v6, %v4060_v24 }
0x1c64   :  { %6231 = vmatmul.mubr.msk.bf16.vlgmr.msra.gmra.mxu1 %vm1077_vm5, %v4062_v8 }
0x1c65   :  { %6235 = vmatpush3.bf16.xpose.msra.mxu1 %v4130_v62  ;;  %6238 = vmatprep.mubr.msk.bf16.mxu1 %vm6670_vm0, %v6669_v0 }
0x1c66   :  { %6236 = vmatprep.subr.bf16.mxu1 %v6669_v0 }
0x1c6d   :  { %6237 = vmatpush3.bf16.xpose.msra.mxu1 %v4127_v23 }
0x1c6e   :  { %5850 = vmatprep.subr.bf16.mxu1 %v6449_v15 }
0x1c74   :  { %6239 = vmatmul.mubr.msk.bf16.vlgmr.msra.gmra.mxu1 %vm1024_vm3, %v4118_v2 }
0x1ceb   :  { %v3975_v58 = vpop.f32.mrf.mxu1 }
0x1cec   :  { %v3976_v11 = vadd.f32 %v3975_v58, %v7968_v14 }
0x1ced   :  { %v6216_v20 = vpop.f32.mrf.mxu1 }
0x1cef   :  { %v3978_v36 = vpop.f32.mrf.mxu1 }
0x1cf0   :  { %v3979_v55 = vadd.f32 %v3978_v36, %v7970_v28 }
0x1cf1   :  { %v6217_v51 = vpop.f32.mrf.mxu1 }
0x1d24   :  { %v4108_v26 = vpop.f32.mrf.mxu1 }
0x1d25   :  { %v4115_v46 = vadd.f32 %v4108_v26, %v3976_v11 }
0x1d26   :  { %v6232_v9 = vpop.f32.mrf.mxu1 }
0x1d28   :  { %v4111_v17 = vpop.f32.mrf.mxu1 }
0x1d29   :  { %v8007_v43 = vadd.f32 %v4111_v17, %v3979_v55 }
0x1d2a   :  { %v6233_v33 = vpop.f32.mrf.mxu1 }
0x1d34   :  { %v4166_v10 = vpop.f32.mrf.mxu1 }
0x1d35   :  { %v4173_v5 = vmul.f32 0.25, %v4166_v10 }
0x1d36   :  { %v6240_v63 = vpop.f32.mrf.mxu1 }
0x1d37   :  { %v4175_v50 = vsel %vm1077_vm5, %v4173_v5, -inf }
0x1d38   :  { %4176 = vmax.xlane.f32.xlu1 %v4175_v50  ;;  %v4169_v13 = vpop.f32.mrf.mxu1  ;;  %v6437_v50 = vld [vmem:[%s8385_s5 + $0xf0] ss:$8 sps:$4 sm:$0xff]  }
0x1d39   :  { %v4174_v30 = vmul.f32 0.25, %v4169_v13  ;;  %v6442_v13 = vld [vmem:[%s8385_s5 + $0xe4] ss:$8 sps:$4 sm:$0xff]  }
0x1d3a   :  { %v6241_v27 = vpop.f32.mrf.mxu1 }
0x1d3b   :  { %v4178_v14 = vsel %vm1077_vm5, %v4174_v30, -inf  ;;  %v6445_v27 = vld [vmem:[%s8385_s5 + $0xd4] ss:$8 sps:$4 sm:$0xff]  }
0x1d3c   :  { %4179 = vmax.xlane.f32.xlu0 %v4178_v14  ;;  %v6443_v14 = vld [vmem:[%s8385_s5 + $0xd0] ss:$8 sps:$4 sm:$0xff]  }
0x1dc1   :  { %v4177_v49 = vpop.xlane.xlu1 %4176 }
0x1dc2   :  { %v4181_v37 = vsub.f32 %v4173_v5, %v4177_v49  ;;  %v6446_v49 = vld [vmem:[%s8385_s5 + $0xc0] ss:$8 sps:$4 sm:$0xff]  }
0x1dc4   :  { %v4183_v38 = vmul.f32 1.442695, %v4181_v37  ;;  %v6448_v37 = vld [vmem:[%s8385_s5 + $0xc4] ss:$8 sps:$4 sm:$0xff]  }
0x1dc5   :  { %v4180_v28 = vpop.xlane.xlu0 %4179 }
0x1dc6   :  { %6629 = vpow2.f32 %v4183_v38  ;;  %v4182_v19 = vsub.f32 %v4174_v30, %v4180_v28  ;;  %v6440_v30 = vld [vmem:[%s8385_s5 + $0xe0] ss:$8 sps:$4 sm:$0xff]  }
0x1dc8   :  { %v4185_v56 = vmul.f32 1.442695, %v4182_v19 }
0x1dca   :  { %6631 = vpow2.f32 %v4185_v56 }
0x1dd3   :  { %v6630_v3 = vpop.eup %6629 }
0x1dd4   :  { %v4187_v48 = vsel %vm1077_vm5, %v6630_v3, 0.0 }
0x1dd5   :  { %4188 = vadd.xlane.f32.xlu0 %v4187_v48 }
0x1dd7   :  { %v6632_v18 = vpop.eup %6631 }
0x1dd8   :  { %v4190_v61 = vsel %vm1077_vm5, %v6632_v18, 0.0 }
0x1dd9   :  { %4191 = vadd.xlane.f32.xlu1 %v4190_v61 }
0x1dea   :  { %4198 = vrot.lane.b32.xlu1 %v4066_v59, %s6673_s22  ;;  %v4264_v59 = vsel %vm136_vm2, %v8023_v39, 0.0 }
0x1deb   :  { %4200 = vrot.lane.b32.xlu0 %v7986_v47, %s6673_s22  ;;  %v4261_v47 = vsel %vm136_vm2, %v8025_v35, 0.0 }
0x1e0a   :  { %4265 = vadd.xlane.f32.xlu0 %v4264_v59 }
0x1e0e   :  { %4262 = vadd.xlane.f32.xlu1 %v4261_v47 }
0x1e5e   :  { %v4189_v4 = vpop.xlane.xlu0 %4188 }
0x1e5f   :  { %6633 = vrcp.f32 %v4189_v4 }
0x1e62   :  { %v4192_v1 = vpop.xlane.xlu1 %4191  ;;  %v4201_v52 = vpop.permute.xlu0 %4200 }
0x1e63   :  { %6635 = vrcp.f32 %v4192_v1  ;;  %v4207_v7 = vsel %vm1195_vm4, %v4201_v52, 0 }
0x1e64   :  { %6243 = vmatpush3.bf16.msra.mxu0 %v4207_v7  ;;  %v2668_v7 = vrot.slane %v7606_v41, %v508_v44 }
0x1e65   :  { %6244 = vmatprep.subr.bf16.mxu0 %v6669_v0 }
0x1e66   :  { %v4199_v53 = vpop.permute.xlu1 %4198 }
0x1e68   :  { %6245 = vmatpush3.bf16.msra.mxu0 %v4199_v53  ;;  %v2794_v53 = vadd.f32 %v7648_v60, %v2668_v7 }
0x1e6c   :  { %v6634_v32 = vpop.eup %6633 }
0x1e6d   :  { %v4195_v24 = vmul.f32 %v6634_v32, %v6630_v3  ;;  %v2664_v32 = vrot.slane %v7606_v41, %v504_v42  ;;  %v6450_v42 = vld [vmem:[%s8379_s4 + $0x198] sm:$0xff]   ;;  %v6451_v41 = vld [vmem:[%s8379_s4 + $0x1d0] sm:$0xff]  }
0x1e6e   :  { %5851 = vmatpush3.bf16.msra.mxu1 %v6450_v42 }
0x1e6f   :  { %5852 = vmatprep.subr.bf16.mxu1 %v6451_v41 }
0x1e70   :  { %v6636_v29 = vpop.eup %6635 }
0x1e71   :  { %v4196_v6 = vmul.f32 %v6636_v29, %v6632_v18  ;;  %v4313_v29 = vadd.f32 1.0, %v2794_v53 }
0x1e73   :  { %v4197_v57 = vpack.c.bf16 %v4196_v6, %v4195_v24 }
0x1e75   :  { %6247 = vmatmul.mubr.msk.bf16.vlgmr.msra.gmra.mxu0 %vm1077_vm5, %v4197_v57  ;;  %v2792_v57 = vadd.f32 %v7642_v54, %v2664_v32  ;;  %v6452_v54 = vld [vmem:[%s8379_s4 + $0x190] sm:$0xff]  }
0x1e76   :  { %4431 = vmatprep.mubr.bf16.mxu0 %v6671_v40  ;;  %5853 = vmatpush3.bf16.msra.mxu1 %v6452_v54 }
0x1e93   :  { %v4266_v25 = vpop.xlane.xlu0 %4265 }
0x1e94   :  { %v4274_v20 = vmul.f32 0.015625, %v4266_v25 }
0x1e96   :  { %v4278_v55 = vsub.f32 %v8023_v39, %v4274_v20 }
0x1e97   :  { %v4263_v8 = vpop.xlane.xlu1 %4262 }
0x1e98   :  { %v4273_v62 = vmul.f32 0.015625, %v4263_v8  ;;  %v4282_v63 = vmul.f32 %v4278_v55, %v4278_v55  ;;  %v4317_v8 = vrot.slane %v4313_v29, %v6903_v16 }
0x1e9a   :  { %v4277_v0 = vsub.f32 %v8025_v35, %v4273_v62 }
0x1f35   :  { %v4243_v23 = vpop.f32.mrf.mxu0 }
0x1f36   :  { %v4250_v2 = vadd.f32 %v4243_v23, %v4115_v46  ;;  %v4281_v46 = vmul.f32 %v4277_v0, %v4277_v0 }
0x1f37   :  { %v6248_v58 = vpop.f32.mrf.mxu0 }
0x1f38   :  { %v4254_v36 = vadd.f32 %v4250_v2, %v7640_v12  ;;  %v4285_v5 = vsel %vm136_vm2, %v4281_v46, 0.0  ;;  %v4325_v2 = vrot.slane %v2792_v57, %v6903_v16  ;;  %v6461_v46 = vld [vmem:[%s8379_s4 + $0x1a8] sm:$0xff]  }
0x1f39   :  { %v4246_v51 = vpop.f32.mrf.mxu0 }
0x1f3a   :  { %v8037_v11 = vadd.f32 %v4256_v34, %v4254_v36  ;;  %v4251_v26 = vadd.f32 %v4246_v51, %v8007_v43  ;;  %v4288_v43 = vsel %vm136_vm2, %v4282_v63, 0.0  ;;  %v6454_v36 = vld [vmem:[%s8379_s4 + $0x188] sm:$0xff]   ;;  %v6455_v51 = vld [vmem:[%s8379_s4 + $0x1c0] sm:$0xff]  }
0x1f3b   :  { %v6249_v9 = vpop.f32.mrf.mxu0  ;;  %v6464_v63 = vld [vmem:[%s8379_s4 + $0x160] sm:$0xff]  }
0x1f3c   :  { %v4255_v17 = vadd.f32 %v4251_v26, %v7650_v21  ;;  %v4267_v33 = vsel %vm136_vm2, %v8037_v11, 0.0  ;;  %v6439_v21 = vld [vmem:[%s8385_s5 + $0xf4] ss:$8 sps:$4 sm:$0xff]   ;;  %v6456_v26 = vld [vmem:[%s8379_s4 + $0x180] sm:$0xff]  }
0x1f3d   :  { %4268 = vadd.xlane.f32.xlu0 %v4267_v33  ;;  %4407 = vmatprep.subr.bf16.mxu0 %v6439_v21  ;;  %v6457_v9 = vld [vmem:[%s8379_s4 + $0x1b8] sm:$0xff]   ;;  %v6460_v33 = vld [vmem:[%s8379_s4 + $0x170] sm:$0xff]  }
0x1f3e   :  { %v8044_v10 = vadd.f32 %v4256_v34, %v4255_v17  ;;  %4408 = vmatpush1.bf16.msra.mxu0 %v6437_v50  ;;  %v6459_v17 = vld [vmem:[%s8379_s4 + $0x1b0] sm:$0xff]  }
0x1f3f   :  { %4409 = vmatprep.subr.bf16.mxu0 %v6442_v13 }
0x1f40   :  { %v4270_v12 = vsel %vm136_vm2, %v8044_v10, 0.0 }
0x1f41   :  { %4286 = vadd.xlane.f32.xlu0 %v4285_v5  ;;  %4271 = vadd.xlane.f32.xlu1 %v4270_v12  ;;  %v6462_v5 = vld [vmem:[%s8379_s4 + $0x168] sm:$0xff]   ;;  %v6463_v12 = vld [vmem:[%s8379_s4 + $0x1a0] sm:$0xff]  }
0x1f42   :  { %4410 = vmatpush1.bf16.msra.mxu0 %v6440_v30 }
0x1f43   :  { %4411 = vmatprep.subr.bf16.mxu0 %v6445_v27 }
0x1f45   :  { %4289 = vadd.xlane.f32.xlu1 %v4288_v43 }
0x1f46   :  { %4412 = vmatpush1.bf16.msra.mxu0 %v6443_v14 }
0x1f47   :  { %4413 = vmatprep.subr.bf16.mxu0 %v6448_v37 }
0x1f4a   :  { %4414 = vmatpush1.bf16.msra.mxu0 %v6446_v49 }
0x1fc6   :  { %v4269_v38 = vpop.xlane.xlu0 %4268 }
0x1fc7   :  { %v4275_v28 = vmul.f32 0.015625, %v4269_v38 }
0x1fc9   :  { %v8075_v19 = vsub.f32 %v8037_v11, %v4275_v28 }
0x1fca   :  { %v4272_v56 = vpop.xlane.xlu1 %4271  ;;  %v4287_v3 = vpop.xlane.xlu0 %4286 }
0x1fcb   :  { %v4276_v48 = vmul.f32 0.015625, %v4272_v56  ;;  %v4297_v18 = vmul.f32 0.015625, %v4287_v3  ;;  %v4283_v61 = vmul.f32 %v8075_v19, %v8075_v19 }
0x1fcd   :  { %v8080_v31 = vsub.f32 %v8044_v10, %v4276_v48  ;;  %v4301_v34 = vadd.f32 1e-05, %v4297_v18  ;;  %v4291_v45 = vsel %vm136_vm2, %v4283_v61, 0.0  ;;  %v5627_v61 = vld [vmem:[%s8381_s7 + $0x36] ss:$8 sm:$0x3] }
0x1fce   :  { %v4290_v59 = vpop.xlane.xlu1 %4289  ;;  %4292 = vadd.xlane.f32.xlu0 %v4291_v45  ;;  %v4346_v45 = vrot.slane %v5627_v61, %v6903_v16  ;;  %v8157_v16 = vld [vmem:[%s8386_s2 + $0x8] sm:$0xf] }
0x1fcf   :  { %6637 = vrsqrt.f32 %v4301_v34  ;;  %v4298_v47 = vmul.f32 0.015625, %v4290_v59  ;;  %v4284_v4 = vmul.f32 %v8080_v31, %v8080_v31  ;;  %v4350_v34 = vrot.slane %v5627_v61, %v7003_v22 }
0x1fd1   :  { %v4302_v1 = vadd.f32 1e-05, %v4298_v47  ;;  %v4294_v52 = vsel %vm136_vm2, %v4284_v4, 0.0 }
0x1fd2   :  { %4295 = vadd.xlane.f32.xlu1 %v4294_v52 }
0x1fd3   :  { %6639 = vrsqrt.f32 %v4302_v1 }
0x1fdc   :  { %v6638_v24 = vpop.eup %6637 }
0x1fdd   :  { %v4309_v6 = vmul.f32 %v6638_v24, %v4277_v0  ;;  %v6453_v0 = vld [vmem:[%s8379_s4 + $0x1c8] sm:$0xff]  }
0x1fde   :  { %5854 = vmatprep.subr.bf16.mxu1 %v6453_v0 }
0x1fdf   :  { %v4318_v25 = vmul.f32 %v4317_v8, %v4309_v6  ;;  %5855 = vmatpush3.bf16.msra.mxu1 %v6454_v36 }
0x1fe0   :  { %v6640_v62 = vpop.eup %6639  ;;  %5856 = vmatprep.subr.bf16.mxu1 %v6455_v51 }
0x1fe1   :  { %v4310_v23 = vmul.f32 %v6640_v62, %v4278_v55  ;;  %v4326_v58 = vadd.f32 %v4325_v2, %v4318_v25  ;;  %v6458_v55 = vld [vmem:[%s8379_s4 + $0x178] sm:$0xff]  }
0x1fe3   :  { %v4319_v44 = vmul.f32 %v4317_v8, %v4310_v23  ;;  %5857 = vmatpush3.bf16.msra.mxu1 %v6456_v26  ;;  %v8162_v23 = vld [vmem:[%s8386_s2] sm:$0xf] }
0x1fe4   :  { %5858 = vmatprep.subr.bf16.mxu1 %v6457_v9 }
0x1fe5   :  { %v4327_v20 = vadd.f32 %v4325_v2, %v4319_v44  ;;  %v4850_v44 = vpack.c.bf16 %v8162_v23, %v8162_v23 }
0x1fe7   :  { %v4338_v60 = vpack.c.bf16 %v4327_v20, %v4326_v58  ;;  %5859 = vmatpush3.bf16.msra.mxu1 %v6458_v55  ;;  %v6469_v58 = vld [vmem:[%s8379_s4 + $0x1f8] sm:$0xff]   ;;  %v4927_v20 = vsel %vm4925_vm6, %v4850_v44, 0 }
0x1fe8   :  { %5860 = vmatprep.subr.bf16.mxu1 %v6459_v17  ;;  %6250 = vmatprep.subr.bf16.mxu0 %v6469_v58 }
0x1fe9   :  { %5636 = vmatmul.mubr.msk.bf16.vlgmr.msra.gmra.mxu0 %vm136_vm2, %v4338_v60 }
0x1fea   :  { %4441 = vmatprep.mubr.bf16.mxu0 %v6671_v40  ;;  %6251 = vmatpush3.bf16.msra.mxu0 %v6469_v58 }
0x1feb   :  { %5861 = vmatpush3.bf16.msra.mxu1 %v6460_v33 }
0x1fec   :  { %5862 = vmatprep.subr.bf16.mxu1 %v6461_v46 }
0x1fef   :  { %5863 = vmatpush3.bf16.msra.mxu1 %v6462_v5 }
0x1ff0   :  { %5864 = vmatprep.subr.bf16.mxu1 %v6463_v12 }
0x1ff3   :  { %5865 = vmatpush3.bf16.msra.mxu1 %v6464_v63 }
0x2057   :  { %v4293_v43 = vpop.xlane.xlu0 %4292 }
0x2058   :  { %v4299_v21 = vmul.f32 0.015625, %v4293_v43 }
0x205a   :  { %v4303_v50 = vadd.f32 1e-05, %v4299_v21  ;;  %v8177_v21 = vld [vmem:[%s8379_s4 + $0x200] sm:$0xff]  }
0x205b   :  { %v4296_v13 = vpop.xlane.xlu1 %4295 }
0x205c   :  { %6641 = vrsqrt.f32 %v4303_v50  ;;  %v4300_v30 = vmul.f32 0.015625, %v4296_v13  ;;  %v8185_v50 = vld [vmem:[%s8379_s4 + $0x208] sm:$0xff]   ;;  %v8193_v13 = vld [vmem:[%s8379_s4 + $0x210] sm:$0xff]  }
0x205e   :  { %v4304_v27 = vadd.f32 1e-05, %v4300_v30  ;;  %v8201_v30 = vld [vmem:[%s8379_s4 + $0x218] sm:$0xff]  }
0x2060   :  { %6643 = vrsqrt.f32 %v4304_v27 }
0x2069   :  { %v6642_v14 = vpop.eup %6641 }
0x206a   :  { %v4311_v49 = vmul.f32 %v6642_v14, %v8075_v19 }
0x206c   :  { %v4320_v28 = vmul.f32 %v4317_v8, %v4311_v49 }
0x206d   :  { %v6644_v37 = vpop.eup %6643 }
0x206e   :  { %v4312_v38 = vmul.f32 %v6644_v37, %v8080_v31  ;;  %v4328_v3 = vadd.f32 %v4325_v2, %v4320_v28 }
0x2070   :  { %v4321_v56 = vmul.f32 %v4317_v8, %v4312_v38 }
0x2072   :  { %v4329_v48 = vadd.f32 %v4325_v2, %v4321_v56  ;;  %v4851_v2 = vpack.c.bf16 %v8157_v16, %v8157_v16 }
0x2074   :  { %v4339_v18 = vpack.c.bf16 %v4329_v48, %v4328_v3  ;;  %5670 = vmatprep.subr.msk.bf16.mxu1 %vm4925_vm6, %v4851_v2  ;;  %v4653_v3 = vld [vmem:[%s8381_s7 + $0x37] ss:$0 sm:$0xff] }
0x2076   :  { %5637 = vmatmul.mubr.msk.bf16.gmra.mxu0 %vm136_vm2, %v4339_v18 }
0x20a9   :  { %v4433_v59 = vpop.f32.mrf.mxu0 }
0x20aa   :  { %v4434_v4 = vadd.f32 %v4433_v59, %v4346_v45  ;;  %v6473_v59 = vld [vmem:[%s8379_s4 + $0x238] sm:$0xff]  }
0x20ab   :  { %v4435_v19 = vpop.f32.mrf.mxu0 }
0x20ac   :  { %v4436_v47 = vadd.f32 %v4435_v19, %v4350_v34  ;;  %v4452_v29 = vmax.f32 %v4434_v4, 0.0  ;;  %v4847_v19 = vld [vmem:[%s8387_s8 + $0x38] sm:$0xff]  ;;  %v4845_v4 = vld [vmem:[%s8387_s8 + $0x28] sm:$0xff] }
0x20ad   :  { %v4437_v31 = vpop.f32.mrf.mxu0  ;;  %4889 = vperm.xlu1 %6283, %v4847_v19  }
0x20ae   :  { %v4438_v1 = vadd.f32 %v4437_v31, %v4346_v45  ;;  %v4453_v7 = vmax.f32 %v4436_v47, 0.0  ;;  %v4460_v62 = vmul.f32 %v4452_v29, %v4452_v29  ;;  %v4844_v47 = vld [vmem:[%s8387_s8 + $0x20] sm:$0xff]  ;;  %v4842_v31 = vld [vmem:[%s8387_s8 + $0x10] sm:$0xff] }
0x20af   :  { %v4439_v52 = vpop.f32.mrf.mxu0 }
0x20b0   :  { %v4454_v53 = vmax.f32 %v4438_v1, 0.0  ;;  %v4440_v32 = vadd.f32 %v4439_v52, %v4350_v34  ;;  %v4461_v57 = vmul.f32 %v4453_v7, %v4453_v7  ;;  %v4846_v1 = vld [vmem:[%s8387_s8 + $0x30] sm:$0xff]  ;;  %v4843_v52 = vld [vmem:[%s8387_s8 + $0x18] sm:$0xff]  ;;  %v8245_v7 = vld [vmem:[%s8387_s8] sm:$0xff] }
0x20b1   :  { %4874 = vperm.xlu1 %6283, %v4844_v47   ;;  %4884 = vperm.xlu0 %6282, %v4846_v1  }
0x20b2   :  { %v4455_v24 = vmax.f32 %v4440_v32, 0.0  ;;  %v4462_v6 = vmul.f32 %v4454_v53, %v4454_v53  ;;  %v4841_v53 = vld [vmem:[%s8387_s8 + $0x8] sm:$0xff] }
0x20b4   :  { %v4463_v8 = vmul.f32 %v4455_v24, %v4455_v24  ;;  %v4500_v22 = vpack.c.bf16 %v4462_v6, %v4460_v62 }
0x20b5   :  { %4879 = vperm.xlu1 %6283, %v4845_v4  }
0x20b6   :  { %v4501_v25 = vpack.c.bf16 %v4463_v8, %v4461_v57 }
0x20b8   :  { %4632 = vmatprep.mubr.bf16.mxu1 %v4501_v25 }
0x20b9   :  { %4633 = vmatmul.mubr.bf16.vlgmr.msra.gmra.mxu1 %v4500_v22  ;;  %4864 = vperm.xlu1 %6283, %v4842_v31  }
0x20ba   :  { %4947 = vmatpush1.bf16.msra.mxu1 %v4927_v20 }
0x20bd   :  { %4869 = vperm.xlu1 %6283, %v4843_v52  }
0x20c1   :  { %4854 = vperm.xlu1 %6283, %v8245_v7  }
0x20c5   :  { %4859 = vperm.xlu1 %6283, %v4841_v53  }
0x2136   :  { %v4443_v60 = vpop.f32.mrf.mxu0 }
0x2137   :  { %v4444_v41 = vadd.f32 %v4443_v60, %v4346_v45 }
0x2138   :  { %v4445_v15 = vpop.f32.mrf.mxu0 }
0x2139   :  { %v4446_v42 = vadd.f32 %v4445_v15, %v4350_v34  ;;  %v4456_v55 = vmax.f32 %v4444_v41, 0.0  ;;  %v6474_v15 = vld [vmem:[%s8379_s4 + $0x230] sm:$0xff]  }
0x213a   :  { %v4447_v54 = vpop.f32.mrf.mxu0 }
0x213b   :  { %v4448_v0 = vadd.f32 %v4447_v54, %v4346_v45  ;;  %v4457_v51 = vmax.f32 %v4446_v42, 0.0  ;;  %v4464_v12 = vmul.f32 %v4456_v55, %v4456_v55  ;;  %v6470_v45 = vld [vmem:[%s8379_s4 + $0x1f0] sm:$0xff]   ;;  %v8258_v42 = vpop.permute.xlu1 %4889 }
0x213c   :  { %v4449_v36 = vpop.f32.mrf.mxu0  ;;  %6252 = vmatprep.subr.bf16.mxu0 %v6470_v45 }
0x213d   :  { %v4458_v26 = vmax.f32 %v4448_v0, 0.0  ;;  %v4450_v9 = vadd.f32 %v4449_v36, %v4350_v34  ;;  %v4465_v46 = vmul.f32 %v4457_v51, %v4457_v51  ;;  %6253 = vmatpush3.bf16.msra.mxu0 %v6470_v45  ;;  %v6476_v51 = vld [vmem:[%s8379_s4 + $0x220] sm:$0xff]  }
0x213f   :  { %v4459_v17 = vmax.f32 %v4450_v9, 0.0  ;;  %v4466_v33 = vmul.f32 %v4458_v26, %v4458_v26  ;;  %v8265_v54 = vpop.permute.xlu1 %4874 }
0x2141   :  { %v4467_v5 = vmul.f32 %v4459_v17, %v4459_v17  ;;  %v4502_v43 = vpack.c.bf16 %v4466_v33, %v4464_v12 }
0x2143   :  { %v4503_v63 = vpack.c.bf16 %v4467_v5, %v4465_v46  ;;  %v8270_v26 = vpop.permute.xlu1 %4879 }
0x2145   :  { %4640 = vmatprep.mubr.bf16.mxu1 %v4503_v63 }
0x2146   :  { %4641 = vmatmul.mubr.bf16.gmra.mxu1 %v4502_v43  ;;  %v8278_v43 = vpop.permute.xlu0 %4884 }
0x2147   :  { %4964 = vmatprep.mubr.bf16.mxu1 %v6671_v40  ;;  %v8272_v17 = vpop.permute.xlu1 %4864 }
0x214b   :  { %v8274_v12 = vpop.permute.xlu1 %4869 }
0x214e   :  { %5671 = vmatmul.mubr.msk.bf16.vlgmr.msra.gmra.mxu1 %vm4912_vm7, %v8177_v21 }
0x214f   :  { %4974 = vmatprep.mubr.bf16.mxu1 %v6671_v40 }
0x2156   :  { %5672 = vmatmul.mubr.msk.bf16.gmra.mxu1 %vm4912_vm7, %v8185_v50 }
0x2157   :  { %4984 = vmatprep.mubr.bf16.mxu1 %v6671_v40 }
0x215e   :  { %5673 = vmatmul.mubr.msk.bf16.gmra.mxu1 %vm4912_vm7, %v8193_v13 }
0x215f   :  { %4994 = vmatprep.mubr.bf16.mxu1 %v6671_v40 }
0x2166   :  { %5674 = vmatmul.mubr.msk.bf16.gmra.mxu1 %vm4912_vm7, %v8201_v30 }
0x2167   :  { %5307 = vmatprep.mubr.bf16.mxu1 %v6671_v40 }
0x2179   :  { %v5866_v27 = vpop.f32.mrf.mxu1 }
0x217b   :  { %v5867_v14 = vpop.f32.mrf.mxu1 }
0x217c   :  { %v5868_v49 = vadd.f32 %v5867_v14, %v5866_v27 }
0x217d   :  { %v5869_v37 = vpop.f32.mrf.mxu1 }
0x217e   :  { %v4649_v28 = vadd.f32 %v5868_v49, %v8025_v35  ;;  %v6471_v35 = vld [vmem:[%s8379_s4 + $0x1e8] sm:$0xff]  }
0x217f   :  { %v5870_v38 = vpop.f32.mrf.mxu1  ;;  %6254 = vmatprep.subr.bf16.mxu0 %v6471_v35 }
0x2180   :  { %v5871_v56 = vadd.f32 %v5870_v38, %v5869_v37  ;;  %v4654_v18 = vadd.f32 %v4653_v3, %v4649_v28  ;;  %6255 = vmatpush3.bf16.msra.mxu0 %v6471_v35  ;;  %v8281_v37 = vpop.permute.xlu1 %4854 }
0x2182   :  { %v4650_v48 = vadd.f32 %v5871_v56, %v8023_v39  ;;  %v6472_v39 = vld [vmem:[%s8379_s4 + $0x1e0] sm:$0xff]  }
0x2183   :  { %6256 = vmatprep.subr.bf16.mxu0 %v6472_v39 }
0x2184   :  { %v4655_v61 = vadd.f32 %v4653_v3, %v4650_v48  ;;  %6257 = vmatpush3.bf16.msra.mxu0 %v6472_v39  ;;  %v8292_v47 = vpop.permute.xlu1 %4859 }
0x2185   :  { %6262 = vmatprep.subr.bf16.mxu0 %v6473_v59 }
0x2186   :  { %v4658_v34 = vpack.c.bf16 %v4655_v61, %v4654_v18 }
0x2188   :  { %6258 = vmatprep.mubr.msk.bf16.mxu0 %vm136_vm2, %v4658_v34 }
0x2206   :  { %v5872_v32 = vpop.f32.mrf.mxu1 }
0x2208   :  { %v5873_v29 = vpop.f32.mrf.mxu1 }
0x2209   :  { %v5874_v24 = vadd.f32 %v5873_v29, %v5872_v32 }
0x220a   :  { %v5875_v6 = vpop.f32.mrf.mxu1 }
0x220b   :  { %v4651_v8 = vadd.f32 %v5874_v24, %v8037_v11 }
0x220c   :  { %v5876_v57 = vpop.f32.mrf.mxu1 }
0x220d   :  { %v5877_v62 = vadd.f32 %v5876_v57, %v5875_v6  ;;  %v4656_v44 = vadd.f32 %v4653_v3, %v4651_v8 }
0x220e   :  { %v8252_v25 = vpop.f32.mrf.mxu1 }
0x220f   :  { %v4652_v22 = vadd.f32 %v5877_v62, %v8044_v10  ;;  %v6475_v10 = vld [vmem:[%s8379_s4 + $0x228] sm:$0xff]   ;;  %v4967_v29 = vadd.f32 %v8252_v25, %v8281_v37 }
0x2210   :  { %v4968_v2 = vpop.f32.mrf.mxu1 }
0x2211   :  { %v4657_v58 = vadd.f32 %v4653_v3, %v4652_v22  ;;  %v4969_v52 = vadd.f32 %v4968_v2, %v8281_v37 }
0x2212   :  { %v4970_v20 = vpop.f32.mrf.mxu1 }
0x2213   :  { %v4659_v60 = vpack.c.bf16 %v4657_v58, %v4656_v44  ;;  %v4971_v24 = vadd.f32 %v4970_v20, %v8292_v47 }
0x2214   :  { %v4972_v41 = vpop.f32.mrf.mxu1 }
0x2215   :  { %6259 = vmatmul.mubr.msk.bf16.vlgmr.msra.gmra.mxu0 %vm136_vm2, %v4659_v60  ;;  %v4973_v53 = vadd.f32 %v4972_v41, %v8292_v47  ;;  %v5005_v8 = vpack.c.bf16 %v4971_v24, %v4967_v29 }
0x2216   :  { %6263 = vmatpush3.bf16.msra.mxu0 %v6473_v59  ;;  %6270 = vmatprep.mubr.msk.bf16.mxu0 %vm136_vm2, %v4658_v34  ;;  %v4976_v11 = vpop.f32.mrf.mxu1 }
0x2217   :  { %6264 = vmatprep.subr.bf16.mxu0 %v6474_v15  ;;  %v4977_v4 = vadd.f32 %v4976_v11, %v8272_v17  ;;  %v5006_v57 = vpack.c.bf16 %v4973_v53, %v4969_v52 }
0x2218   :  { %v4978_v0 = vpop.f32.mrf.mxu1 }
0x2219   :  { %v4979_v35 = vadd.f32 %v4978_v0, %v8272_v17  ;;  %v6676_v0 = vmov 1  }
0x221a   :  { %6265 = vmatpush3.bf16.msra.mxu0 %v6474_v15  ;;  %v4980_v36 = vpop.f32.mrf.mxu1 }
0x221b   :  { %6266 = vmatprep.subr.bf16.mxu0 %v6475_v10  ;;  %v4981_v31 = vadd.f32 %v4980_v36, %v8274_v12 }
0x221c   :  { %v4982_v9 = vpop.f32.mrf.mxu1 }
0x221d   :  { %v4983_v59 = vadd.f32 %v4982_v9, %v8274_v12  ;;  %v5007_v6 = vpack.c.bf16 %v4981_v31, %v4977_v4 }
0x221e   :  { %6267 = vmatpush3.bf16.msra.mxu0 %v6475_v10  ;;  %v4986_v55 = vpop.f32.mrf.mxu1 }
0x221f   :  { %6268 = vmatprep.subr.bf16.mxu0 %v6476_v51  ;;  %v4987_v61 = vadd.f32 %v4986_v55, %v8265_v54  ;;  %v5008_v32 = vpack.c.bf16 %v4983_v59, %v4979_v35 }
0x2220   :  { %v4988_v33 = vpop.f32.mrf.mxu1 }
0x2221   :  { %v4989_v38 = vadd.f32 %v4988_v33, %v8265_v54 }
0x2222   :  { %6269 = vmatpush3.bf16.msra.mxu0 %v6476_v51  ;;  %v4990_v46 = vpop.f32.mrf.mxu1 }
0x2223   :  { %v4991_v34 = vadd.f32 %v4990_v46, %v8270_v26 }
0x2224   :  { %v4992_v5 = vpop.f32.mrf.mxu1 }
0x2225   :  { %6271 = vmatmul.mubr.msk.bf16.vlgmr.msra.gmra.mxu0 %vm136_vm2, %v4659_v60  ;;  %v4993_v28 = vadd.f32 %v4992_v5, %v8270_v26  ;;  %v5009_v1 = vpack.c.bf16 %v4991_v34, %v4987_v61 }
0x2226   :  { %v4996_v63 = vpop.f32.mrf.mxu1  ;;  %5048 = vmatprep.mubr.bf16.mxu0 %v6671_v40 }
0x2227   :  { %v4997_v49 = vadd.f32 %v4996_v63, %v8278_v43  ;;  %v5010_v19 = vpack.c.bf16 %v4993_v28, %v4989_v38 }
0x2228   :  { %v4998_v27 = vpop.f32.mrf.mxu1 }
0x2229   :  { %v4999_v3 = vadd.f32 %v4998_v27, %v8278_v43 }
0x222a   :  { %v5000_v14 = vpop.f32.mrf.mxu1 }
0x222b   :  { %v5001_v56 = vadd.f32 %v5000_v14, %v8258_v42 }
0x222c   :  { %v5002_v48 = vpop.f32.mrf.mxu1 }
0x222d   :  { %v5003_v18 = vadd.f32 %v5002_v48, %v8258_v42  ;;  %v5011_v45 = vpack.c.bf16 %v5001_v56, %v4997_v49 }
0x222f   :  { %v5012_v39 = vpack.c.bf16 %v5003_v18, %v4999_v3 }
0x2231   :  { %5024 = vmatprep.subr.bf16.mxu0 %v5012_v39 }
0x2232   :  { %5025 = vmatpush1.bf16.msra.mxu0 %v5011_v45 }
0x2233   :  { %5026 = vmatprep.subr.bf16.mxu0 %v5010_v19 }
0x2236   :  { %5027 = vmatpush1.bf16.msra.mxu0 %v5009_v1 }
0x2237   :  { %5028 = vmatprep.subr.bf16.mxu0 %v5008_v32 }
0x223a   :  { %5029 = vmatpush1.bf16.msra.mxu0 %v5007_v6 }
0x223b   :  { %5030 = vmatprep.subr.bf16.mxu0 %v5006_v57 }
0x223e   :  { %5031 = vmatpush1.bf16.msra.mxu0 %v5005_v8 }
0x22d5   :  { %v8301_v62 = vpop.f32.mrf.mxu0 }
0x22d7   :  { %v4732_v22 = vpop.f32.mrf.mxu0 }
0x22d9   :  { %v8303_v2 = vpop.f32.mrf.mxu0 }
0x22da   :  { %v4748_v44 = vpack.c.bf16 %v8303_v2, %v8301_v62 }
0x22db   :  { %v4735_v58 = vpop.f32.mrf.mxu0 }
0x22dc   :  { %v4747_v25 = vpack.c.bf16 %v4735_v58, %v4732_v22 }
0x22de   :  { %5675 = vmatmul.mubr.msk.bf16.vlgmr.msra.gmra.mxu0 %vm136_vm2, %v4747_v25 }
0x22df   :  { %5166 = vmatprep.mubr.bf16.mxu0 %v6671_v40 }
0x22e5   :  { %v6272_v20 = vpop.f32.mrf.mxu0 }
0x22e7   :  { %v4823_v60 = vpop.f32.mrf.mxu0 }
0x22e9   :  { %v6273_v15 = vpop.f32.mrf.mxu0 }
0x22ea   :  { %v4839_v41 = vpack.c.bf16 %v6273_v15, %v6272_v20 }
0x22eb   :  { %v4826_v11 = vpop.f32.mrf.mxu0 }
0x22ec   :  { %v4838_v10 = vpack.c.bf16 %v4826_v11, %v4823_v60  ;;  %5370 = vxpose.xlu0.c.b16.start.end [1/1] (short) (narrow) %v4839_v41, 16 }
0x22ee   :  { %5115 = vxpose.xlu1.c.b16.start.end [1/1] (short) (narrow) %v4838_v10, 16 }
0x22f5   :  { %6284 = vset.pattern.permute.xlu0 %v6676_v0 }
0x22f6   :  { %5112 = vperm.xlu0 %6284, %v8245_v7  }
0x239e   :  { %v5050_v36 = vpop.f32.mrf.mxu0 }
0x239f   :  { %v5059_v55 = vmul.f32 0.125, %v5050_v36 }
0x23a0   :  { %v5052_v51 = vpop.f32.mrf.mxu0 }
0x23a1   :  { %v5060_v5 = vmul.f32 0.125, %v5052_v51 }
0x23a2   :  { %v5054_v9 = vpop.f32.mrf.mxu0 }
0x23a3   :  { %v5061_v33 = vmul.f32 0.125, %v5054_v9  ;;  %v8313_v9 = vld [vmem:[%s8386_s2 + $0x8] sm:$0xf0] }
0x23a4   :  { %v5056_v46 = vpop.f32.mrf.mxu0 }
0x23a5   :  { %v5063_v63 = vmax.f32 %v5059_v55, %v5061_v33  ;;  %v5062_v27 = vmul.f32 0.125, %v5056_v46  ;;  %v5180_v46 = vpack.c.bf16 %v8313_v9, %v8313_v9 }
0x23a7   :  { %v5064_v14 = vrot.slane %v5063_v63, 4  ;;  %v5070_v49 = vmax.f32 %v5060_v5, %v5062_v27 }
0x23a9   :  { %v5065_v38 = vmax.f32 %v5063_v63, %v5064_v14  ;;  %v5071_v28 = vrot.slane %v5070_v49, 4 }
0x23ab   :  { %v5066_v56 = vrot.slane %v5065_v38, 2  ;;  %v5072_v3 = vmax.f32 %v5070_v49, %v5071_v28 }
0x23ad   :  { %v5067_v48 = vmax.f32 %v5065_v38, %v5066_v56  ;;  %v5073_v18 = vrot.slane %v5072_v3, 2  ;;  %v5184_v56 = vrot.slane %v5180_v46, 2 }
0x23af   :  { %v5068_v61 = vrot.slane %v5067_v48, 1  ;;  %v5074_v34 = vmax.f32 %v5072_v3, %v5073_v18  ;;  %v5123_v18 = vpop.trf.xlu1 }
0x23b1   :  { %v5069_v7 = vmax.f32 %v5067_v48, %v5068_v61  ;;  %v5075_v45 = vrot.slane %v5074_v34, 1 }
0x23b3   :  { %v5077_v35 = vsub.f32 %v5059_v55, %v5069_v7  ;;  %v5079_v39 = vsub.f32 %v5061_v33, %v5069_v7  ;;  %v5076_v59 = vmax.f32 %v5074_v34, %v5075_v45  ;;  %v8318_v55 = vld [vmem:[%s8386_s2] sm:$0xf0] }
0x23b5   :  { %v5081_v19 = vmul.f32 1.442695, %v5077_v35  ;;  %v5085_v4 = vmul.f32 1.442695, %v5079_v39  ;;  %v5078_v31 = vsub.f32 %v5060_v5, %v5076_v59  ;;  %v5080_v1 = vsub.f32 %v5062_v27, %v5076_v59 }
0x23b6   :  { %v5179_v5 = vpack.c.bf16 %v8318_v55, %v8318_v55 }
0x23b7   :  { %6645 = vpow2.f32 %v5081_v19  ;;  %v5083_v52 = vmul.f32 1.442695, %v5078_v31  ;;  %v5087_v53 = vmul.f32 1.442695, %v5080_v1 }
0x23b8   :  { %6647 = vpow2.f32 %v5085_v4  ;;  %v5183_v3 = vrot.slane %v5179_v5, 2 }
0x23b9   :  { %6649 = vpow2.f32 %v5083_v52 }
0x23ba   :  { %6651 = vpow2.f32 %v5087_v53  ;;  %v5186_v61 = vsel %vm4925_vm6, %v5183_v3, 0 }
0x23c4   :  { %v6646_v32 = vpop.eup %6645 }
0x23c5   :  { %v6648_v29 = vpop.eup %6647 }
0x23c6   :  { %v6650_v24 = vpop.eup %6649  ;;  %v5089_v6 = vadd.f32 %v6648_v29, %v6646_v32 }
0x23c7   :  { %v6652_v57 = vpop.eup %6651 }
0x23c8   :  { %v5090_v8 = vrot.slane %v5089_v6, 4  ;;  %v5096_v22 = vadd.f32 %v6652_v57, %v6650_v24 }
0x23ca   :  { %v5091_v58 = vadd.f32 %v5090_v8, %v5089_v6  ;;  %v5097_v25 = vrot.slane %v5096_v22, 4 }
0x23cc   :  { %v5092_v20 = vrot.slane %v5091_v58, 2  ;;  %v5098_v60 = vadd.f32 %v5097_v25, %v5096_v22 }
0x23ce   :  { %v5093_v15 = vadd.f32 %v5092_v20, %v5091_v58  ;;  %v5099_v41 = vrot.slane %v5098_v60, 2 }
0x23d0   :  { %v5094_v11 = vrot.slane %v5093_v15, 1  ;;  %v5100_v10 = vadd.f32 %v5099_v41, %v5098_v60 }
0x23d2   :  { %v5095_v0 = vadd.f32 %v5094_v11, %v5093_v15  ;;  %v5101_v36 = vrot.slane %v5100_v10, 1 }
0x23d4   :  { %v5102_v51 = vadd.f32 %v5101_v36, %v5100_v10  ;;  %6653 = vrcp.f32 %v5095_v0 }
0x23d6   :  { %6655 = vrcp.f32 %v5102_v51 }
0x23e1   :  { %v6654_v33 = vpop.eup %6653 }
0x23e2   :  { %v5105_v27 = vmul.f32 %v6654_v33, %v6646_v32  ;;  %v5107_v14 = vmul.f32 %v6654_v33, %v6648_v29 }
0x23e3   :  { %v6656_v63 = vpop.eup %6655 }
0x23e4   :  { %v5106_v49 = vmul.f32 %v6656_v63, %v6650_v24  ;;  %v5108_v38 = vmul.f32 %v6656_v63, %v6652_v57  ;;  %v5109_v48 = vpack.c.bf16 %v5107_v14, %v5105_v27 }
0x23e6   :  { %v5110_v28 = vpack.c.bf16 %v5108_v38, %v5106_v49 }
0x23e8   :  { %5148 = vmatprep.subr.bf16.mxu0 %v5110_v28 }
0x23e9   :  { %5149 = vmatpush1.bf16.msra.mxu0 %v5109_v48 }
0x23ea   :  { %5677 = vmatprep.subr.msk.bf16.mxu0 %vm4925_vm6, %v5184_v56 }
0x23ec   :  { %5676 = vmatmul.mubr.msk.bf16.vlgmr.msra.gmra.mxu0 %vm1024_vm3, %v5123_v18 }
0x23ed   :  { %5206 = vmatpush1.bf16.msra.mxu0 %v5186_v61  ;;  %5223 = vmatprep.mubr.bf16.mxu0 %v6671_v40 }
0x23f4   :  { %5678 = vmatmul.mubr.msk.bf16.vlgmr.msra.gmra.mxu0 %vm4912_vm7, %v8177_v21 }
0x23f5   :  { %5233 = vmatprep.mubr.bf16.mxu0 %v6671_v40 }
0x23fc   :  { %5679 = vmatmul.mubr.msk.bf16.gmra.mxu0 %vm4912_vm7, %v8185_v50 }
0x23fd   :  { %5243 = vmatprep.mubr.bf16.mxu0 %v6671_v40 }
0x2404   :  { %5680 = vmatmul.mubr.msk.bf16.gmra.mxu0 %vm4912_vm7, %v8193_v13 }
0x2405   :  { %5253 = vmatprep.mubr.bf16.mxu0 %v6671_v40 }
0x240c   :  { %5681 = vmatmul.mubr.msk.bf16.gmra.mxu0 %vm4912_vm7, %v8201_v30 }
0x24ac   :  { %v8339_v34 = vpop.f32.mrf.mxu0 }
0x24ae   :  { %v8341_v7 = vpop.f32.mrf.mxu0 }
0x24b0   :  { %v5172_v21 = vpop.f32.mrf.mxu0 }
0x24b2   :  { %v5173_v45 = vpop.f32.mrf.mxu0 }
0x24b4   :  { %v5225_v35 = vpop.f32.mrf.mxu0 }
0x24b5   :  { %v5226_v27 = vadd.f32 %v5225_v35, %v8281_v37 }
0x24b6   :  { %v5227_v39 = vpop.f32.mrf.mxu0 }
0x24b8   :  { %v5229_v59 = vpop.f32.mrf.mxu0 }
0x24b9   :  { %v5230_v5 = vadd.f32 %v5229_v59, %v8292_v47 }
0x24ba   :  { %v5231_v50 = vpop.f32.mrf.mxu0 }
0x24bb   :  { %v5264_v14 = vpack.c.bf16 %v5230_v5, %v5226_v27  ;;  %v5378_v27 = vpop.trf.xlu0 }
0x24bc   :  { %v5235_v19 = vpop.f32.mrf.mxu0 }
0x24bd   :  { %v5236_v46 = vadd.f32 %v5235_v19, %v8272_v17 }
0x24be   :  { %v5237_v4 = vpop.f32.mrf.mxu0 }
0x24bf   :  { %v5238_v36 = vadd.f32 %v5237_v4, %v8272_v17 }
0x24c0   :  { %v5239_v31 = vpop.f32.mrf.mxu0 }
0x24c2   :  { %v5241_v1 = vpop.f32.mrf.mxu0 }
0x24c3   :  { %v5242_v11 = vadd.f32 %v5241_v1, %v8274_v12 }
0x24c4   :  { %v5245_v13 = vpop.f32.mrf.mxu0 }
0x24c5   :  { %v5246_v0 = vadd.f32 %v5245_v13, %v8265_v54  ;;  %v5267_v33 = vpack.c.bf16 %v5242_v11, %v5238_v36 }
0x24c6   :  { %v5247_v52 = vpop.f32.mrf.mxu0 }
0x24c7   :  { %v5248_v20 = vadd.f32 %v5247_v52, %v8265_v54 }
0x24c8   :  { %v5249_v53 = vpop.f32.mrf.mxu0 }
0x24c9   :  { %v5250_v15 = vadd.f32 %v5249_v53, %v8270_v26 }
0x24ca   :  { %v5251_v32 = vpop.f32.mrf.mxu0 }
0x24cb   :  { %v5252_v8 = vadd.f32 %v5251_v32, %v8270_v26  ;;  %v5268_v51 = vpack.c.bf16 %v5250_v15, %v5246_v0  ;;  %v5228_v26 = vadd.f32 %v5227_v39, %v8281_v37 }
0x24cc   :  { %v5255_v29 = vpop.f32.mrf.mxu0 }
0x24cd   :  { %v5256_v25 = vadd.f32 %v5255_v29, %v8278_v43  ;;  %v5269_v10 = vpack.c.bf16 %v5252_v8, %v5248_v20 }
0x24ce   :  { %v5257_v30 = vpop.f32.mrf.mxu0 }
0x24cf   :  { %v5258_v22 = vadd.f32 %v5257_v30, %v8278_v43  ;;  %v5232_v43 = vadd.f32 %v5231_v50, %v8292_v47 }
0x24d0   :  { %v5259_v24 = vpop.f32.mrf.mxu0 }
0x24d1   :  { %v5260_v6 = vadd.f32 %v5259_v24, %v8258_v42  ;;  %v5265_v54 = vpack.c.bf16 %v5232_v43, %v5228_v26 }
0x24d2   :  { %v5261_v57 = vpop.f32.mrf.mxu0 }
0x24d3   :  { %v5262_v58 = vadd.f32 %v5261_v57, %v8258_v42  ;;  %v5270_v41 = vpack.c.bf16 %v5260_v6, %v5256_v25  ;;  %v5240_v42 = vadd.f32 %v5239_v31, %v8274_v12 }
0x24d5   :  { %v5271_v60 = vpack.c.bf16 %v5262_v58, %v5258_v22  ;;  %v5266_v63 = vpack.c.bf16 %v5240_v42, %v5236_v46 }
0x24d7   :  { %5283 = vmatprep.subr.bf16.mxu1 %v5271_v60 }
0x24d8   :  { %5284 = vmatpush1.bf16.msra.mxu1 %v5270_v41 }
0x24d9   :  { %5285 = vmatprep.subr.bf16.mxu1 %v5269_v10 }
0x24dc   :  { %5286 = vmatpush1.bf16.msra.mxu1 %v5268_v51 }
0x24dd   :  { %5287 = vmatprep.subr.bf16.mxu1 %v5267_v33 }
0x24e0   :  { %5288 = vmatpush1.bf16.msra.mxu1 %v5266_v63 }
0x24e1   :  { %5289 = vmatprep.subr.bf16.mxu1 %v5265_v54 }
0x24e4   :  { %5290 = vmatpush1.bf16.msra.mxu1 %v5264_v14  ;;  %v5113_v14 = vpop.permute.xlu0 %5112 }
0x24e7   :  { %5682 = vmatmul.mubr.msk.bf16.vlgmr.msra.gmra.mxu1 %vm136_vm2, %v4748_v44 }
0x24e8   :  { %5421 = vmatprep.mubr.bf16.mxu1 %v6671_v40 }
0x25a7   :  { %v5309_v17 = vpop.f32.mrf.mxu1 }
0x25a8   :  { %v5318_v38 = vmul.f32 0.125, %v5309_v17 }
0x25a9   :  { %v5311_v12 = vpop.f32.mrf.mxu1 }
0x25aa   :  { %v5319_v56 = vmul.f32 0.125, %v5311_v12  ;;  %v5169_v12 = vadd.f32 %v8339_v34, %v5113_v14 }
0x25ab   :  { %v5313_v49 = vpop.f32.mrf.mxu1 }
0x25ac   :  { %v5320_v47 = vmul.f32 0.125, %v5313_v49 }
0x25ad   :  { %v5315_v28 = vpop.f32.mrf.mxu1 }
0x25ae   :  { %v5322_v3 = vmax.f32 %v5318_v38, %v5320_v47  ;;  %v5321_v37 = vmul.f32 0.125, %v5315_v28 }
0x25b0   :  { %v5323_v48 = vrot.slane %v5322_v3, 4  ;;  %v5329_v18 = vmax.f32 %v5319_v56, %v5321_v37 }
0x25b2   :  { %v5324_v61 = vmax.f32 %v5322_v3, %v5323_v48  ;;  %v5330_v21 = vrot.slane %v5329_v18, 4 }
0x25b4   :  { %v5325_v45 = vrot.slane %v5324_v61, 2  ;;  %v5331_v35 = vmax.f32 %v5329_v18, %v5330_v21 }
0x25b6   :  { %v5326_v62 = vmax.f32 %v5324_v61, %v5325_v45  ;;  %v5332_v2 = vrot.slane %v5331_v35, 2 }
0x25b8   :  { %v5327_v44 = vrot.slane %v5326_v62, 1  ;;  %v5333_v39 = vmax.f32 %v5331_v35, %v5332_v2 }
0x25ba   :  { %v5328_v40 = vmax.f32 %v5326_v62, %v5327_v44  ;;  %v5334_v59 = vrot.slane %v5333_v39, 1 }
0x25bc   :  { %v5336_v50 = vsub.f32 %v5318_v38, %v5328_v40  ;;  %v5338_v19 = vsub.f32 %v5320_v47, %v5328_v40  ;;  %v5335_v4 = vmax.f32 %v5333_v39, %v5334_v59  ;;  %v5171_v47 = vadd.f32 %v8341_v7, %v5113_v14 }
0x25be   :  { %v5340_v31 = vmul.f32 1.442695, %v5336_v50  ;;  %v5344_v1 = vmul.f32 1.442695, %v5338_v19  ;;  %v5337_v13 = vsub.f32 %v5319_v56, %v5335_v4  ;;  %v5339_v52 = vsub.f32 %v5321_v37, %v5335_v4 }
0x25bf   :  { %v5175_v37 = vadd.f32 %v5169_v12, %v8162_v23  ;;  %v5176_v21 = vadd.f32 %v5171_v47, %v8157_v16 }
0x25c0   :  { %6657 = vpow2.f32 %v5340_v31  ;;  %v5342_v53 = vmul.f32 1.442695, %v5337_v13  ;;  %v5346_v32 = vmul.f32 1.442695, %v5339_v52 }
0x25c1   :  { %6659 = vpow2.f32 %v5344_v1 }
0x25c2   :  { %6661 = vpow2.f32 %v5342_v53 }
0x25c3   :  { %6663 = vpow2.f32 %v5346_v32 }
0x25cd   :  { %v6658_v29 = vpop.eup %6657 }
0x25ce   :  { %v6660_v30 = vpop.eup %6659 }
0x25cf   :  { %v6662_v24 = vpop.eup %6661  ;;  %v5348_v6 = vadd.f32 %v6660_v30, %v6658_v29 }
0x25d0   :  { %v6664_v57 = vpop.eup %6663 }
0x25d1   :  { %v5349_v8 = vrot.slane %v5348_v6, 4  ;;  %v5355_v22 = vadd.f32 %v6664_v57, %v6662_v24 }
0x25d3   :  { %v5350_v58 = vadd.f32 %v5349_v8, %v5348_v6  ;;  %v5356_v25 = vrot.slane %v5355_v22, 4 }
0x25d5   :  { %v5351_v20 = vrot.slane %v5350_v58, 2  ;;  %v5357_v60 = vadd.f32 %v5356_v25, %v5355_v22 }
0x25d7   :  { %v5352_v15 = vadd.f32 %v5351_v20, %v5350_v58  ;;  %v5358_v41 = vrot.slane %v5357_v60, 2 }
0x25d9   :  { %v5353_v11 = vrot.slane %v5352_v15, 1  ;;  %v5359_v10 = vadd.f32 %v5358_v41, %v5357_v60 }
0x25db   :  { %v5354_v0 = vadd.f32 %v5353_v11, %v5352_v15  ;;  %v5360_v36 = vrot.slane %v5359_v10, 1 }
0x25dd   :  { %v5361_v42 = vadd.f32 %v5360_v36, %v5359_v10  ;;  %6665 = vrcp.f32 %v5354_v0 }
0x25df   :  { %6667 = vrcp.f32 %v5361_v42 }
0x25ea   :  { %v6666_v51 = vpop.eup %6665 }
0x25eb   :  { %v5364_v33 = vmul.f32 %v6666_v51, %v6658_v29  ;;  %v5366_v46 = vmul.f32 %v6666_v51, %v6660_v30 }
0x25ec   :  { %v6668_v43 = vpop.eup %6667 }
0x25ed   :  { %v5365_v26 = vmul.f32 %v6668_v43, %v6662_v24  ;;  %v5367_v5 = vmul.f32 %v6668_v43, %v6664_v57  ;;  %v5368_v54 = vpack.c.bf16 %v5366_v46, %v5364_v33 }
0x25ef   :  { %v5369_v63 = vpack.c.bf16 %v5367_v5, %v5365_v26 }
0x25f1   :  { %5403 = vmatprep.subr.bf16.mxu1 %v5369_v63 }
0x25f2   :  { %5404 = vmatpush1.bf16.msra.mxu1 %v5368_v54 }
0x25f5   :  { %5683 = vmatmul.mubr.msk.bf16.vlgmr.msra.gmra.mxu1 %vm1024_vm3, %v5378_v27 }
0x26b5   :  { %v5423_v17 = vpop.f32.mrf.mxu1 }
0x26b6   :  { %v5424_v49 = vadd.f32 %v5423_v17, %v5113_v14 }
0x26b7   :  { %v5425_v38 = vpop.f32.mrf.mxu1 }
0x26b8   :  { %v5432_v28 = vrot.slane %v5424_v49, 4  ;;  %v5426_v56 = vadd.f32 %v5425_v38, %v5113_v14 }
0x26b9   :  { %v5427_v3 = vpop.f32.mrf.mxu1 }
0x26ba   :  { %v5436_v48 = vadd.f32 %v5432_v28, %v8318_v55  ;;  %v5433_v18 = vrot.slane %v5426_v56, 4 }
0x26bb   :  { %v5428_v61 = vpop.f32.mrf.mxu1 }
0x26bc   :  { %v5438_v45 = vsel %vm1195_vm4, %v5175_v37, %v5436_v48  ;;  %v5437_v35 = vadd.f32 %v5433_v18, %v8313_v9 }
0x26bd   :  { %5440 = vst [vmem:[%s8388_s9] sm:$0xff] %v5438_v45 }
0x26be   :  { %v5439_v34 = vsel %vm1195_vm4, %v5176_v21, %v5437_v35 }
0x26bf   :  { %5441 = vst [vmem:[%s8388_s9 + $0x8] sm:$0xff] %v5439_v34 }

</bundles_post_ra>
